<compile_context>
chip_gen: v7x
topology: tpu7x:2x2x1
jax: 0.10.0
libtpu: 0.0.40
codegen_flags: <defaults>
</compile_context>

<pallas_src>
import functools

import jax
import jax.numpy as jnp
from jax.experimental import pallas as pl
from jax.experimental.pallas import tpu as pltpu


BN_EPS = 1e-5


def _sum_all(a):
    """Sum a [N, OH, OW] array to shape [1, 1, 1].

    Chained single-axis reductions (batch adds -> lane reduce -> sublane
    reduce); every intermediate stays rank >= 2 for robust Mosaic lowering.
    """
    s = jnp.sum(a, axis=0, keepdims=True)   # [1, OH, OW]  (vreg adds)
    s = jnp.sum(s, axis=2, keepdims=True)   # [1, OH, 1]   (lane reduce, XLU)
    s = jnp.sum(s, axis=1, keepdims=True)   # [1, 1, 1]    (sublane reduce)
    return s


def _conv_bn_kernel(x_ref, p_ref, o_ref, *, n, cin, cout, kh, kw, oh, ow):
    # x_ref: [N, Cin, H, W] f32 in VMEM (whole input, tiny)
    # p_ref: flat f32 SMEM params: [conv_w row-major (Cout*Cin*KH*KW), gamma(Cout), beta(Cout)]
    # o_ref: [N, Cout, OH, OW] f32 in VMEM (final NCHW output, written once)
    X = x_ref[...]                                            # [N, Cin, H, W]
    w_size = cout * cin * kh * kw
    inv_m = jnp.float32(1.0 / (n * oh * ow))

    def widx(co, ci, i, j):
        return ((co * cin + ci) * kh + i) * kw + j

    # --- Conv2d (valid, stride 1) as KH*KW*Cin shifted windows, Cout
    #     scalar-broadcast FMAs each (pure VPU; conv bias omitted, cancelled
    #     by the BN mean subtraction below).
    accs = [jnp.zeros((n, oh, ow), jnp.float32) for _ in range(cout)]
    for ci in range(cin):
        for i in range(kh):
            for j in range(kw):
                win = X[:, ci, i:i + oh, j:j + ow]            # [N, OH, OW]
                for co in range(cout):
                    accs[co] = accs[co] + p_ref[widx(co, ci, i, j)] * win

    # --- Training-mode BatchNorm2d, one-pass statistics per channel.
    outs = []
    for co in range(cout):
        acc = accs[co]
        s = _sum_all(acc)                                      # [1, 1, 1]
        q = _sum_all(acc * acc)                                # [1, 1, 1]
        mean = s * inv_m
        var = q * inv_m - mean * mean                          # biased variance
        gamma = p_ref[w_size + co]
        beta = p_ref[w_size + cout + co]
        scale = jax.lax.rsqrt(var + BN_EPS) * gamma            # [1, 1, 1]
        shift = beta - mean * scale
        outs.append(acc * scale + shift)                       # [N, OH, OW]

    o_ref[...] = jnp.stack(outs, axis=1).astype(o_ref.dtype)   # [N, Cout, OH, OW]


def conv_bn_forward(x_nchw, conv_w, conv_b, bn_gamma, bn_beta):
    """Conv2d(3,3,3) + training-mode BatchNorm2d(3) forward (NCHW in/out).

    conv_b is accepted for interface parity but is mathematically cancelled by
    the BN mean subtraction, so it is not fed to the kernel.
    """
    del conv_b  # cancelled exactly by training-mode BN mean subtraction

    N, Cin, H, W = x_nchw.shape
    Cout, _, KH, KW = conv_w.shape
    OH, OW = H - KH + 1, W - KW + 1

    # Single flat f32 parameter vector -> one tiny SMEM operand.
    params = jnp.concatenate([
        conv_w.reshape(-1).astype(jnp.float32),
        bn_gamma.reshape(-1).astype(jnp.float32),
        bn_beta.reshape(-1).astype(jnp.float32),
    ])

    kernel = functools.partial(
        _conv_bn_kernel, n=N, cin=Cin, cout=Cout, kh=KH, kw=KW, oh=OH, ow=OW)

    return pl.pallas_call(
        kernel,
        out_shape=jax.ShapeDtypeStruct((N, Cout, OH, OW), jnp.float32),
        in_specs=[
            pl.BlockSpec((N, Cin, H, W), lambda: (0, 0, 0, 0)),
            pl.BlockSpec(memory_space=pltpu.MemorySpace.SMEM),
        ],
        out_specs=pl.BlockSpec((N, Cout, OH, OW), lambda: (0, 0, 0, 0)),
    )(x_nchw.astype(jnp.float32), params)


def _reference(x, conv_w, conv_b, bn_gamma, bn_beta):
    """Plain-JAX reference: conv2d (valid) + bias + training-mode BatchNorm2d."""
    y = jax.lax.conv_general_dilated(
        x, conv_w, window_strides=(1, 1), padding="VALID",
        dimension_numbers=("NCHW", "OIHW", "NCHW"))
    y = y + conv_b.reshape(1, -1, 1, 1)
    mean = jnp.mean(y, axis=(0, 2, 3), keepdims=True)
    var = jnp.mean((y - mean) ** 2, axis=(0, 2, 3), keepdims=True)
    return ((y - mean) * jax.lax.rsqrt(var + BN_EPS)
            * bn_gamma.reshape(1, -1, 1, 1) + bn_beta.reshape(1, -1, 1, 1))


if __name__ == "__main__":
    key = jax.random.PRNGKey(0)
    k_x, k_w, k_b = jax.random.split(key, 3)

    # Module shapes: Conv2d(3, 3, 3), BatchNorm2d(3)
    N, Cin, H, W = 2, 3, 16, 16
    Cout, KH, KW = 3, 3, 3

    x = jax.random.normal(k_x, (N, Cin, H, W), dtype=jnp.float32)

    # Deterministic synthetic params (mimic Conv2d kaiming-uniform scale).
    fan_in = Cin * KH * KW
    bound = 1.0 / (fan_in ** 0.5)
    conv_w = jax.random.uniform(
        k_w, (Cout, Cin, KH, KW), minval=-bound, maxval=bound, dtype=jnp.float32)
    conv_b = jax.random.uniform(
        k_b, (Cout,), minval=-bound, maxval=bound, dtype=jnp.float32)
    bn_gamma = jnp.ones((Cout,), dtype=jnp.float32)   # BatchNorm2d defaults
    bn_beta = jnp.zeros((Cout,), dtype=jnp.float32)

    y = conv_bn_forward(x, conv_w, conv_b, bn_gamma, bn_beta)
    jax.block_until_ready(y)

    assert y.shape == (N, Cout, H - KH + 1, W - KW + 1), y.shape

    # Correctness check against XLA reference (f32 VPU conv -> tight tolerance).
    y_ref = _reference(x, conv_w, conv_b, bn_gamma, bn_beta)
    max_err = float(jnp.max(jnp.abs(y - y_ref)))
    assert jnp.allclose(y, y_ref, atol=2e-3, rtol=2e-3), max_err

    print("KERNEL_OK")
</pallas_src>

<mosaic_0001>
module attributes {stable_mosaic.version = 11 : i64} {
  func.func @_conv_bn_kernel(%arg0: memref<2x3x16x16xf32, #tpu.memory_space<vmem>>, %arg1: memref<87xf32, #tpu.memory_space<smem>>, %arg2: memref<2x3x14x14xf32, #tpu.memory_space<vmem>>) attributes {dimension_semantics = [], scalar_prefetch = 0 : i64, scratch_operands = 0 : i64, tpu.core_type = #tpu.core_type<tc>} {
    %c0 = arith.constant 0 : index
    %c0_0 = arith.constant 0 : index
    %c0_1 = arith.constant 0 : index
    %c0_2 = arith.constant 0 : index
    %0 = vector.load %arg0[%c0, %c0_0, %c0_1, %c0_2] : memref<2x3x16x16xf32, #tpu.memory_space<vmem>>, vector<2x3x16x16xf32>
    %cst = arith.constant 0.000000e+00 : f32
    %1 = vector.broadcast %cst : f32 to vector<2x14x14xf32>
    %cst_3 = arith.constant 0.000000e+00 : f32
    %2 = vector.broadcast %cst_3 : f32 to vector<2x14x14xf32>
    %cst_4 = arith.constant 0.000000e+00 : f32
    %3 = vector.broadcast %cst_4 : f32 to vector<2x14x14xf32>
    %4 = vector.extract_strided_slice %0 {offsets = [0, 0, 0, 0], sizes = [2, 1, 14, 14], strides = [1, 1, 1, 1]} : vector<2x3x16x16xf32> to vector<2x1x14x14xf32>
    %5 = vector.shape_cast %4 : vector<2x1x14x14xf32> to vector<2x14x14xf32>
    %c0_5 = arith.constant 0 : index
    %6 = memref.load %arg1[%c0_5] : memref<87xf32, #tpu.memory_space<smem>>
    %7 = vector.broadcast %6 : f32 to vector<2x14x14xf32>
    %8 = arith.mulf %7, %5 : vector<2x14x14xf32>
    %9 = arith.addf %1, %8 : vector<2x14x14xf32>
    %c27 = arith.constant 27 : index
    %10 = memref.load %arg1[%c27] : memref<87xf32, #tpu.memory_space<smem>>
    %11 = vector.broadcast %10 : f32 to vector<2x14x14xf32>
    %12 = arith.mulf %11, %5 : vector<2x14x14xf32>
    %13 = arith.addf %2, %12 : vector<2x14x14xf32>
    %c54 = arith.constant 54 : index
    %14 = memref.load %arg1[%c54] : memref<87xf32, #tpu.memory_space<smem>>
    %15 = vector.broadcast %14 : f32 to vector<2x14x14xf32>
    %16 = arith.mulf %15, %5 : vector<2x14x14xf32>
    %17 = arith.addf %3, %16 : vector<2x14x14xf32>
    %18 = vector.extract_strided_slice %0 {offsets = [0, 0, 0, 1], sizes = [2, 1, 14, 14], strides = [1, 1, 1, 1]} : vector<2x3x16x16xf32> to vector<2x1x14x14xf32>
    %19 = vector.shape_cast %18 : vector<2x1x14x14xf32> to vector<2x14x14xf32>
    %c1 = arith.constant 1 : index
    %20 = memref.load %arg1[%c1] : memref<87xf32, #tpu.memory_space<smem>>
    %21 = vector.broadcast %20 : f32 to vector<2x14x14xf32>
    %22 = arith.mulf %21, %19 : vector<2x14x14xf32>
    %23 = arith.addf %9, %22 : vector<2x14x14xf32>
    %c28 = arith.constant 28 : index
    %24 = memref.load %arg1[%c28] : memref<87xf32, #tpu.memory_space<smem>>
    %25 = vector.broadcast %24 : f32 to vector<2x14x14xf32>
    %26 = arith.mulf %25, %19 : vector<2x14x14xf32>
    %27 = arith.addf %13, %26 : vector<2x14x14xf32>
    %c55 = arith.constant 55 : index
    %28 = memref.load %arg1[%c55] : memref<87xf32, #tpu.memory_space<smem>>
    %29 = vector.broadcast %28 : f32 to vector<2x14x14xf32>
    %30 = arith.mulf %29, %19 : vector<2x14x14xf32>
    %31 = arith.addf %17, %30 : vector<2x14x14xf32>
    %32 = vector.extract_strided_slice %0 {offsets = [0, 0, 0, 2], sizes = [2, 1, 14, 14], strides = [1, 1, 1, 1]} : vector<2x3x16x16xf32> to vector<2x1x14x14xf32>
    %33 = vector.shape_cast %32 : vector<2x1x14x14xf32> to vector<2x14x14xf32>
    %c2 = arith.constant 2 : index
    %34 = memref.load %arg1[%c2] : memref<87xf32, #tpu.memory_space<smem>>
    %35 = vector.broadcast %34 : f32 to vector<2x14x14xf32>
    %36 = arith.mulf %35, %33 : vector<2x14x14xf32>
    %37 = arith.addf %23, %36 : vector<2x14x14xf32>
    %c29 = arith.constant 29 : index
    %38 = memref.load %arg1[%c29] : memref<87xf32, #tpu.memory_space<smem>>
    %39 = vector.broadcast %38 : f32 to vector<2x14x14xf32>
    %40 = arith.mulf %39, %33 : vector<2x14x14xf32>
    %41 = arith.addf %27, %40 : vector<2x14x14xf32>
    %c56 = arith.constant 56 : index
    %42 = memref.load %arg1[%c56] : memref<87xf32, #tpu.memory_space<smem>>
    %43 = vector.broadcast %42 : f32 to vector<2x14x14xf32>
    %44 = arith.mulf %43, %33 : vector<2x14x14xf32>
    %45 = arith.addf %31, %44 : vector<2x14x14xf32>
    %46 = vector.extract_strided_slice %0 {offsets = [0, 0, 1, 0], sizes = [2, 1, 14, 14], strides = [1, 1, 1, 1]} : vector<2x3x16x16xf32> to vector<2x1x14x14xf32>
    %47 = vector.shape_cast %46 : vector<2x1x14x14xf32> to vector<2x14x14xf32>
    %c3 = arith.constant 3 : index
    %48 = memref.load %arg1[%c3] : memref<87xf32, #tpu.memory_space<smem>>
    %49 = vector.broadcast %48 : f32 to vector<2x14x14xf32>
    %50 = arith.mulf %49, %47 : vector<2x14x14xf32>
    %51 = arith.addf %37, %50 : vector<2x14x14xf32>
    %c30 = arith.constant 30 : index
    %52 = memref.load %arg1[%c30] : memref<87xf32, #tpu.memory_space<smem>>
    %53 = vector.broadcast %52 : f32 to vector<2x14x14xf32>
    %54 = arith.mulf %53, %47 : vector<2x14x14xf32>
    %55 = arith.addf %41, %54 : vector<2x14x14xf32>
    %c57 = arith.constant 57 : index
    %56 = memref.load %arg1[%c57] : memref<87xf32, #tpu.memory_space<smem>>
    %57 = vector.broadcast %56 : f32 to vector<2x14x14xf32>
    %58 = arith.mulf %57, %47 : vector<2x14x14xf32>
    %59 = arith.addf %45, %58 : vector<2x14x14xf32>
    %60 = vector.extract_strided_slice %0 {offsets = [0, 0, 1, 1], sizes = [2, 1, 14, 14], strides = [1, 1, 1, 1]} : vector<2x3x16x16xf32> to vector<2x1x14x14xf32>
    %61 = vector.shape_cast %60 : vector<2x1x14x14xf32> to vector<2x14x14xf32>
    %c4 = arith.constant 4 : index
    %62 = memref.load %arg1[%c4] : memref<87xf32, #tpu.memory_space<smem>>
    %63 = vector.broadcast %62 : f32 to vector<2x14x14xf32>
    %64 = arith.mulf %63, %61 : vector<2x14x14xf32>
    %65 = arith.addf %51, %64 : vector<2x14x14xf32>
    %c31 = arith.constant 31 : index
    %66 = memref.load %arg1[%c31] : memref<87xf32, #tpu.memory_space<smem>>
    %67 = vector.broadcast %66 : f32 to vector<2x14x14xf32>
    %68 = arith.mulf %67, %61 : vector<2x14x14xf32>
    %69 = arith.addf %55, %68 : vector<2x14x14xf32>
    %c58 = arith.constant 58 : index
    %70 = memref.load %arg1[%c58] : memref<87xf32, #tpu.memory_space<smem>>
    %71 = vector.broadcast %70 : f32 to vector<2x14x14xf32>
    %72 = arith.mulf %71, %61 : vector<2x14x14xf32>
    %73 = arith.addf %59, %72 : vector<2x14x14xf32>
    %74 = vector.extract_strided_slice %0 {offsets = [0, 0, 1, 2], sizes = [2, 1, 14, 14], strides = [1, 1, 1, 1]} : vector<2x3x16x16xf32> to vector<2x1x14x14xf32>
    %75 = vector.shape_cast %74 : vector<2x1x14x14xf32> to vector<2x14x14xf32>
    %c5 = arith.constant 5 : index
    %76 = memref.load %arg1[%c5] : memref<87xf32, #tpu.memory_space<smem>>
    %77 = vector.broadcast %76 : f32 to vector<2x14x14xf32>
    %78 = arith.mulf %77, %75 : vector<2x14x14xf32>
    %79 = arith.addf %65, %78 : vector<2x14x14xf32>
    %c32 = arith.constant 32 : index
    %80 = memref.load %arg1[%c32] : memref<87xf32, #tpu.memory_space<smem>>
    %81 = vector.broadcast %80 : f32 to vector<2x14x14xf32>
    %82 = arith.mulf %81, %75 : vector<2x14x14xf32>
    %83 = arith.addf %69, %82 : vector<2x14x14xf32>
    %c59 = arith.constant 59 : index
    %84 = memref.load %arg1[%c59] : memref<87xf32, #tpu.memory_space<smem>>
    %85 = vector.broadcast %84 : f32 to vector<2x14x14xf32>
    %86 = arith.mulf %85, %75 : vector<2x14x14xf32>
    %87 = arith.addf %73, %86 : vector<2x14x14xf32>
    %88 = vector.extract_strided_slice %0 {offsets = [0, 0, 2, 0], sizes = [2, 1, 14, 14], strides = [1, 1, 1, 1]} : vector<2x3x16x16xf32> to vector<2x1x14x14xf32>
    %89 = vector.shape_cast %88 : vector<2x1x14x14xf32> to vector<2x14x14xf32>
    %c6 = arith.constant 6 : index
    %90 = memref.load %arg1[%c6] : memref<87xf32, #tpu.memory_space<smem>>
    %91 = vector.broadcast %90 : f32 to vector<2x14x14xf32>
    %92 = arith.mulf %91, %89 : vector<2x14x14xf32>
    %93 = arith.addf %79, %92 : vector<2x14x14xf32>
    %c33 = arith.constant 33 : index
    %94 = memref.load %arg1[%c33] : memref<87xf32, #tpu.memory_space<smem>>
    %95 = vector.broadcast %94 : f32 to vector<2x14x14xf32>
    %96 = arith.mulf %95, %89 : vector<2x14x14xf32>
    %97 = arith.addf %83, %96 : vector<2x14x14xf32>
    %c60 = arith.constant 60 : index
    %98 = memref.load %arg1[%c60] : memref<87xf32, #tpu.memory_space<smem>>
    %99 = vector.broadcast %98 : f32 to vector<2x14x14xf32>
    %100 = arith.mulf %99, %89 : vector<2x14x14xf32>
    %101 = arith.addf %87, %100 : vector<2x14x14xf32>
    %102 = vector.extract_strided_slice %0 {offsets = [0, 0, 2, 1], sizes = [2, 1, 14, 14], strides = [1, 1, 1, 1]} : vector<2x3x16x16xf32> to vector<2x1x14x14xf32>
    %103 = vector.shape_cast %102 : vector<2x1x14x14xf32> to vector<2x14x14xf32>
    %c7 = arith.constant 7 : index
    %104 = memref.load %arg1[%c7] : memref<87xf32, #tpu.memory_space<smem>>
    %105 = vector.broadcast %104 : f32 to vector<2x14x14xf32>
    %106 = arith.mulf %105, %103 : vector<2x14x14xf32>
    %107 = arith.addf %93, %106 : vector<2x14x14xf32>
    %c34 = arith.constant 34 : index
    %108 = memref.load %arg1[%c34] : memref<87xf32, #tpu.memory_space<smem>>
    %109 = vector.broadcast %108 : f32 to vector<2x14x14xf32>
    %110 = arith.mulf %109, %103 : vector<2x14x14xf32>
    %111 = arith.addf %97, %110 : vector<2x14x14xf32>
    %c61 = arith.constant 61 : index
    %112 = memref.load %arg1[%c61] : memref<87xf32, #tpu.memory_space<smem>>
    %113 = vector.broadcast %112 : f32 to vector<2x14x14xf32>
    %114 = arith.mulf %113, %103 : vector<2x14x14xf32>
    %115 = arith.addf %101, %114 : vector<2x14x14xf32>
    %116 = vector.extract_strided_slice %0 {offsets = [0, 0, 2, 2], sizes = [2, 1, 14, 14], strides = [1, 1, 1, 1]} : vector<2x3x16x16xf32> to vector<2x1x14x14xf32>
    %117 = vector.shape_cast %116 : vector<2x1x14x14xf32> to vector<2x14x14xf32>
    %c8 = arith.constant 8 : index
    %118 = memref.load %arg1[%c8] : memref<87xf32, #tpu.memory_space<smem>>
    %119 = vector.broadcast %118 : f32 to vector<2x14x14xf32>
    %120 = arith.mulf %119, %117 : vector<2x14x14xf32>
    %121 = arith.addf %107, %120 : vector<2x14x14xf32>
    %c35 = arith.constant 35 : index
    %122 = memref.load %arg1[%c35] : memref<87xf32, #tpu.memory_space<smem>>
    %123 = vector.broadcast %122 : f32 to vector<2x14x14xf32>
    %124 = arith.mulf %123, %117 : vector<2x14x14xf32>
    %125 = arith.addf %111, %124 : vector<2x14x14xf32>
    %c62 = arith.constant 62 : index
    %126 = memref.load %arg1[%c62] : memref<87xf32, #tpu.memory_space<smem>>
    %127 = vector.broadcast %126 : f32 to vector<2x14x14xf32>
    %128 = arith.mulf %127, %117 : vector<2x14x14xf32>
    %129 = arith.addf %115, %128 : vector<2x14x14xf32>
    %130 = vector.extract_strided_slice %0 {offsets = [0, 1, 0, 0], sizes = [2, 1, 14, 14], strides = [1, 1, 1, 1]} : vector<2x3x16x16xf32> to vector<2x1x14x14xf32>
    %131 = vector.shape_cast %130 : vector<2x1x14x14xf32> to vector<2x14x14xf32>
    %c9 = arith.constant 9 : index
    %132 = memref.load %arg1[%c9] : memref<87xf32, #tpu.memory_space<smem>>
    %133 = vector.broadcast %132 : f32 to vector<2x14x14xf32>
    %134 = arith.mulf %133, %131 : vector<2x14x14xf32>
    %135 = arith.addf %121, %134 : vector<2x14x14xf32>
    %c36 = arith.constant 36 : index
    %136 = memref.load %arg1[%c36] : memref<87xf32, #tpu.memory_space<smem>>
    %137 = vector.broadcast %136 : f32 to vector<2x14x14xf32>
    %138 = arith.mulf %137, %131 : vector<2x14x14xf32>
    %139 = arith.addf %125, %138 : vector<2x14x14xf32>
    %c63 = arith.constant 63 : index
    %140 = memref.load %arg1[%c63] : memref<87xf32, #tpu.memory_space<smem>>
    %141 = vector.broadcast %140 : f32 to vector<2x14x14xf32>
    %142 = arith.mulf %141, %131 : vector<2x14x14xf32>
    %143 = arith.addf %129, %142 : vector<2x14x14xf32>
    %144 = vector.extract_strided_slice %0 {offsets = [0, 1, 0, 1], sizes = [2, 1, 14, 14], strides = [1, 1, 1, 1]} : vector<2x3x16x16xf32> to vector<2x1x14x14xf32>
    %145 = vector.shape_cast %144 : vector<2x1x14x14xf32> to vector<2x14x14xf32>
    %c10 = arith.constant 10 : index
    %146 = memref.load %arg1[%c10] : memref<87xf32, #tpu.memory_space<smem>>
    %147 = vector.broadcast %146 : f32 to vector<2x14x14xf32>
    %148 = arith.mulf %147, %145 : vector<2x14x14xf32>
    %149 = arith.addf %135, %148 : vector<2x14x14xf32>
    %c37 = arith.constant 37 : index
    %150 = memref.load %arg1[%c37] : memref<87xf32, #tpu.memory_space<smem>>
    %151 = vector.broadcast %150 : f32 to vector<2x14x14xf32>
    %152 = arith.mulf %151, %145 : vector<2x14x14xf32>
    %153 = arith.addf %139, %152 : vector<2x14x14xf32>
    %c64 = arith.constant 64 : index
    %154 = memref.load %arg1[%c64] : memref<87xf32, #tpu.memory_space<smem>>
    %155 = vector.broadcast %154 : f32 to vector<2x14x14xf32>
    %156 = arith.mulf %155, %145 : vector<2x14x14xf32>
    %157 = arith.addf %143, %156 : vector<2x14x14xf32>
    %158 = vector.extract_strided_slice %0 {offsets = [0, 1, 0, 2], sizes = [2, 1, 14, 14], strides = [1, 1, 1, 1]} : vector<2x3x16x16xf32> to vector<2x1x14x14xf32>
    %159 = vector.shape_cast %158 : vector<2x1x14x14xf32> to vector<2x14x14xf32>
    %c11 = arith.constant 11 : index
    %160 = memref.load %arg1[%c11] : memref<87xf32, #tpu.memory_space<smem>>
    %161 = vector.broadcast %160 : f32 to vector<2x14x14xf32>
    %162 = arith.mulf %161, %159 : vector<2x14x14xf32>
    %163 = arith.addf %149, %162 : vector<2x14x14xf32>
    %c38 = arith.constant 38 : index
    %164 = memref.load %arg1[%c38] : memref<87xf32, #tpu.memory_space<smem>>
    %165 = vector.broadcast %164 : f32 to vector<2x14x14xf32>
    %166 = arith.mulf %165, %159 : vector<2x14x14xf32>
    %167 = arith.addf %153, %166 : vector<2x14x14xf32>
    %c65 = arith.constant 65 : index
    %168 = memref.load %arg1[%c65] : memref<87xf32, #tpu.memory_space<smem>>
    %169 = vector.broadcast %168 : f32 to vector<2x14x14xf32>
    %170 = arith.mulf %169, %159 : vector<2x14x14xf32>
    %171 = arith.addf %157, %170 : vector<2x14x14xf32>
    %172 = vector.extract_strided_slice %0 {offsets = [0, 1, 1, 0], sizes = [2, 1, 14, 14], strides = [1, 1, 1, 1]} : vector<2x3x16x16xf32> to vector<2x1x14x14xf32>
    %173 = vector.shape_cast %172 : vector<2x1x14x14xf32> to vector<2x14x14xf32>
    %c12 = arith.constant 12 : index
    %174 = memref.load %arg1[%c12] : memref<87xf32, #tpu.memory_space<smem>>
    %175 = vector.broadcast %174 : f32 to vector<2x14x14xf32>
    %176 = arith.mulf %175, %173 : vector<2x14x14xf32>
    %177 = arith.addf %163, %176 : vector<2x14x14xf32>
    %c39 = arith.constant 39 : index
    %178 = memref.load %arg1[%c39] : memref<87xf32, #tpu.memory_space<smem>>
    %179 = vector.broadcast %178 : f32 to vector<2x14x14xf32>
    %180 = arith.mulf %179, %173 : vector<2x14x14xf32>
    %181 = arith.addf %167, %180 : vector<2x14x14xf32>
    %c66 = arith.constant 66 : index
    %182 = memref.load %arg1[%c66] : memref<87xf32, #tpu.memory_space<smem>>
    %183 = vector.broadcast %182 : f32 to vector<2x14x14xf32>
    %184 = arith.mulf %183, %173 : vector<2x14x14xf32>
    %185 = arith.addf %171, %184 : vector<2x14x14xf32>
    %186 = vector.extract_strided_slice %0 {offsets = [0, 1, 1, 1], sizes = [2, 1, 14, 14], strides = [1, 1, 1, 1]} : vector<2x3x16x16xf32> to vector<2x1x14x14xf32>
    %187 = vector.shape_cast %186 : vector<2x1x14x14xf32> to vector<2x14x14xf32>
    %c13 = arith.constant 13 : index
    %188 = memref.load %arg1[%c13] : memref<87xf32, #tpu.memory_space<smem>>
    %189 = vector.broadcast %188 : f32 to vector<2x14x14xf32>
    %190 = arith.mulf %189, %187 : vector<2x14x14xf32>
    %191 = arith.addf %177, %190 : vector<2x14x14xf32>
    %c40 = arith.constant 40 : index
    %192 = memref.load %arg1[%c40] : memref<87xf32, #tpu.memory_space<smem>>
    %193 = vector.broadcast %192 : f32 to vector<2x14x14xf32>
    %194 = arith.mulf %193, %187 : vector<2x14x14xf32>
    %195 = arith.addf %181, %194 : vector<2x14x14xf32>
    %c67 = arith.constant 67 : index
    %196 = memref.load %arg1[%c67] : memref<87xf32, #tpu.memory_space<smem>>
    %197 = vector.broadcast %196 : f32 to vector<2x14x14xf32>
    %198 = arith.mulf %197, %187 : vector<2x14x14xf32>
    %199 = arith.addf %185, %198 : vector<2x14x14xf32>
    %200 = vector.extract_strided_slice %0 {offsets = [0, 1, 1, 2], sizes = [2, 1, 14, 14], strides = [1, 1, 1, 1]} : vector<2x3x16x16xf32> to vector<2x1x14x14xf32>
    %201 = vector.shape_cast %200 : vector<2x1x14x14xf32> to vector<2x14x14xf32>
    %c14 = arith.constant 14 : index
    %202 = memref.load %arg1[%c14] : memref<87xf32, #tpu.memory_space<smem>>
    %203 = vector.broadcast %202 : f32 to vector<2x14x14xf32>
    %204 = arith.mulf %203, %201 : vector<2x14x14xf32>
    %205 = arith.addf %191, %204 : vector<2x14x14xf32>
    %c41 = arith.constant 41 : index
    %206 = memref.load %arg1[%c41] : memref<87xf32, #tpu.memory_space<smem>>
    %207 = vector.broadcast %206 : f32 to vector<2x14x14xf32>
    %208 = arith.mulf %207, %201 : vector<2x14x14xf32>
    %209 = arith.addf %195, %208 : vector<2x14x14xf32>
    %c68 = arith.constant 68 : index
    %210 = memref.load %arg1[%c68] : memref<87xf32, #tpu.memory_space<smem>>
    %211 = vector.broadcast %210 : f32 to vector<2x14x14xf32>
    %212 = arith.mulf %211, %201 : vector<2x14x14xf32>
    %213 = arith.addf %199, %212 : vector<2x14x14xf32>
    %214 = vector.extract_strided_slice %0 {offsets = [0, 1, 2, 0], sizes = [2, 1, 14, 14], strides = [1, 1, 1, 1]} : vector<2x3x16x16xf32> to vector<2x1x14x14xf32>
    %215 = vector.shape_cast %214 : vector<2x1x14x14xf32> to vector<2x14x14xf32>
    %c15 = arith.constant 15 : index
    %216 = memref.load %arg1[%c15] : memref<87xf32, #tpu.memory_space<smem>>
    %217 = vector.broadcast %216 : f32 to vector<2x14x14xf32>
    %218 = arith.mulf %217, %215 : vector<2x14x14xf32>
    %219 = arith.addf %205, %218 : vector<2x14x14xf32>
    %c42 = arith.constant 42 : index
    %220 = memref.load %arg1[%c42] : memref<87xf32, #tpu.memory_space<smem>>
    %221 = vector.broadcast %220 : f32 to vector<2x14x14xf32>
    %222 = arith.mulf %221, %215 : vector<2x14x14xf32>
    %223 = arith.addf %209, %222 : vector<2x14x14xf32>
    %c69 = arith.constant 69 : index
    %224 = memref.load %arg1[%c69] : memref<87xf32, #tpu.memory_space<smem>>
    %225 = vector.broadcast %224 : f32 to vector<2x14x14xf32>
    %226 = arith.mulf %225, %215 : vector<2x14x14xf32>
    %227 = arith.addf %213, %226 : vector<2x14x14xf32>
    %228 = vector.extract_strided_slice %0 {offsets = [0, 1, 2, 1], sizes = [2, 1, 14, 14], strides = [1, 1, 1, 1]} : vector<2x3x16x16xf32> to vector<2x1x14x14xf32>
    %229 = vector.shape_cast %228 : vector<2x1x14x14xf32> to vector<2x14x14xf32>
    %c16 = arith.constant 16 : index
    %230 = memref.load %arg1[%c16] : memref<87xf32, #tpu.memory_space<smem>>
    %231 = vector.broadcast %230 : f32 to vector<2x14x14xf32>
    %232 = arith.mulf %231, %229 : vector<2x14x14xf32>
    %233 = arith.addf %219, %232 : vector<2x14x14xf32>
    %c43 = arith.constant 43 : index
    %234 = memref.load %arg1[%c43] : memref<87xf32, #tpu.memory_space<smem>>
    %235 = vector.broadcast %234 : f32 to vector<2x14x14xf32>
    %236 = arith.mulf %235, %229 : vector<2x14x14xf32>
    %237 = arith.addf %223, %236 : vector<2x14x14xf32>
    %c70 = arith.constant 70 : index
    %238 = memref.load %arg1[%c70] : memref<87xf32, #tpu.memory_space<smem>>
    %239 = vector.broadcast %238 : f32 to vector<2x14x14xf32>
    %240 = arith.mulf %239, %229 : vector<2x14x14xf32>
    %241 = arith.addf %227, %240 : vector<2x14x14xf32>
    %242 = vector.extract_strided_slice %0 {offsets = [0, 1, 2, 2], sizes = [2, 1, 14, 14], strides = [1, 1, 1, 1]} : vector<2x3x16x16xf32> to vector<2x1x14x14xf32>
    %243 = vector.shape_cast %242 : vector<2x1x14x14xf32> to vector<2x14x14xf32>
    %c17 = arith.constant 17 : index
    %244 = memref.load %arg1[%c17] : memref<87xf32, #tpu.memory_space<smem>>
    %245 = vector.broadcast %244 : f32 to vector<2x14x14xf32>
    %246 = arith.mulf %245, %243 : vector<2x14x14xf32>
    %247 = arith.addf %233, %246 : vector<2x14x14xf32>
    %c44 = arith.constant 44 : index
    %248 = memref.load %arg1[%c44] : memref<87xf32, #tpu.memory_space<smem>>
    %249 = vector.broadcast %248 : f32 to vector<2x14x14xf32>
    %250 = arith.mulf %249, %243 : vector<2x14x14xf32>
    %251 = arith.addf %237, %250 : vector<2x14x14xf32>
    %c71 = arith.constant 71 : index
    %252 = memref.load %arg1[%c71] : memref<87xf32, #tpu.memory_space<smem>>
    %253 = vector.broadcast %252 : f32 to vector<2x14x14xf32>
    %254 = arith.mulf %253, %243 : vector<2x14x14xf32>
    %255 = arith.addf %241, %254 : vector<2x14x14xf32>
    %256 = vector.extract_strided_slice %0 {offsets = [0, 2, 0, 0], sizes = [2, 1, 14, 14], strides = [1, 1, 1, 1]} : vector<2x3x16x16xf32> to vector<2x1x14x14xf32>
    %257 = vector.shape_cast %256 : vector<2x1x14x14xf32> to vector<2x14x14xf32>
    %c18 = arith.constant 18 : index
    %258 = memref.load %arg1[%c18] : memref<87xf32, #tpu.memory_space<smem>>
    %259 = vector.broadcast %258 : f32 to vector<2x14x14xf32>
    %260 = arith.mulf %259, %257 : vector<2x14x14xf32>
    %261 = arith.addf %247, %260 : vector<2x14x14xf32>
    %c45 = arith.constant 45 : index
    %262 = memref.load %arg1[%c45] : memref<87xf32, #tpu.memory_space<smem>>
    %263 = vector.broadcast %262 : f32 to vector<2x14x14xf32>
    %264 = arith.mulf %263, %257 : vector<2x14x14xf32>
    %265 = arith.addf %251, %264 : vector<2x14x14xf32>
    %c72 = arith.constant 72 : index
    %266 = memref.load %arg1[%c72] : memref<87xf32, #tpu.memory_space<smem>>
    %267 = vector.broadcast %266 : f32 to vector<2x14x14xf32>
    %268 = arith.mulf %267, %257 : vector<2x14x14xf32>
    %269 = arith.addf %255, %268 : vector<2x14x14xf32>
    %270 = vector.extract_strided_slice %0 {offsets = [0, 2, 0, 1], sizes = [2, 1, 14, 14], strides = [1, 1, 1, 1]} : vector<2x3x16x16xf32> to vector<2x1x14x14xf32>
    %271 = vector.shape_cast %270 : vector<2x1x14x14xf32> to vector<2x14x14xf32>
    %c19 = arith.constant 19 : index
    %272 = memref.load %arg1[%c19] : memref<87xf32, #tpu.memory_space<smem>>
    %273 = vector.broadcast %272 : f32 to vector<2x14x14xf32>
    %274 = arith.mulf %273, %271 : vector<2x14x14xf32>
    %275 = arith.addf %261, %274 : vector<2x14x14xf32>
    %c46 = arith.constant 46 : index
    %276 = memref.load %arg1[%c46] : memref<87xf32, #tpu.memory_space<smem>>
    %277 = vector.broadcast %276 : f32 to vector<2x14x14xf32>
    %278 = arith.mulf %277, %271 : vector<2x14x14xf32>
    %279 = arith.addf %265, %278 : vector<2x14x14xf32>
    %c73 = arith.constant 73 : index
    %280 = memref.load %arg1[%c73] : memref<87xf32, #tpu.memory_space<smem>>
    %281 = vector.broadcast %280 : f32 to vector<2x14x14xf32>
    %282 = arith.mulf %281, %271 : vector<2x14x14xf32>
    %283 = arith.addf %269, %282 : vector<2x14x14xf32>
    %284 = vector.extract_strided_slice %0 {offsets = [0, 2, 0, 2], sizes = [2, 1, 14, 14], strides = [1, 1, 1, 1]} : vector<2x3x16x16xf32> to vector<2x1x14x14xf32>
    %285 = vector.shape_cast %284 : vector<2x1x14x14xf32> to vector<2x14x14xf32>
    %c20 = arith.constant 20 : index
    %286 = memref.load %arg1[%c20] : memref<87xf32, #tpu.memory_space<smem>>
    %287 = vector.broadcast %286 : f32 to vector<2x14x14xf32>
    %288 = arith.mulf %287, %285 : vector<2x14x14xf32>
    %289 = arith.addf %275, %288 : vector<2x14x14xf32>
    %c47 = arith.constant 47 : index
    %290 = memref.load %arg1[%c47] : memref<87xf32, #tpu.memory_space<smem>>
    %291 = vector.broadcast %290 : f32 to vector<2x14x14xf32>
    %292 = arith.mulf %291, %285 : vector<2x14x14xf32>
    %293 = arith.addf %279, %292 : vector<2x14x14xf32>
    %c74 = arith.constant 74 : index
    %294 = memref.load %arg1[%c74] : memref<87xf32, #tpu.memory_space<smem>>
    %295 = vector.broadcast %294 : f32 to vector<2x14x14xf32>
    %296 = arith.mulf %295, %285 : vector<2x14x14xf32>
    %297 = arith.addf %283, %296 : vector<2x14x14xf32>
    %298 = vector.extract_strided_slice %0 {offsets = [0, 2, 1, 0], sizes = [2, 1, 14, 14], strides = [1, 1, 1, 1]} : vector<2x3x16x16xf32> to vector<2x1x14x14xf32>
    %299 = vector.shape_cast %298 : vector<2x1x14x14xf32> to vector<2x14x14xf32>
    %c21 = arith.constant 21 : index
    %300 = memref.load %arg1[%c21] : memref<87xf32, #tpu.memory_space<smem>>
    %301 = vector.broadcast %300 : f32 to vector<2x14x14xf32>
    %302 = arith.mulf %301, %299 : vector<2x14x14xf32>
    %303 = arith.addf %289, %302 : vector<2x14x14xf32>
    %c48 = arith.constant 48 : index
    %304 = memref.load %arg1[%c48] : memref<87xf32, #tpu.memory_space<smem>>
    %305 = vector.broadcast %304 : f32 to vector<2x14x14xf32>
    %306 = arith.mulf %305, %299 : vector<2x14x14xf32>
    %307 = arith.addf %293, %306 : vector<2x14x14xf32>
    %c75 = arith.constant 75 : index
    %308 = memref.load %arg1[%c75] : memref<87xf32, #tpu.memory_space<smem>>
    %309 = vector.broadcast %308 : f32 to vector<2x14x14xf32>
    %310 = arith.mulf %309, %299 : vector<2x14x14xf32>
    %311 = arith.addf %297, %310 : vector<2x14x14xf32>
    %312 = vector.extract_strided_slice %0 {offsets = [0, 2, 1, 1], sizes = [2, 1, 14, 14], strides = [1, 1, 1, 1]} : vector<2x3x16x16xf32> to vector<2x1x14x14xf32>
    %313 = vector.shape_cast %312 : vector<2x1x14x14xf32> to vector<2x14x14xf32>
    %c22 = arith.constant 22 : index
    %314 = memref.load %arg1[%c22] : memref<87xf32, #tpu.memory_space<smem>>
    %315 = vector.broadcast %314 : f32 to vector<2x14x14xf32>
    %316 = arith.mulf %315, %313 : vector<2x14x14xf32>
    %317 = arith.addf %303, %316 : vector<2x14x14xf32>
    %c49 = arith.constant 49 : index
    %318 = memref.load %arg1[%c49] : memref<87xf32, #tpu.memory_space<smem>>
    %319 = vector.broadcast %318 : f32 to vector<2x14x14xf32>
    %320 = arith.mulf %319, %313 : vector<2x14x14xf32>
    %321 = arith.addf %307, %320 : vector<2x14x14xf32>
    %c76 = arith.constant 76 : index
    %322 = memref.load %arg1[%c76] : memref<87xf32, #tpu.memory_space<smem>>
    %323 = vector.broadcast %322 : f32 to vector<2x14x14xf32>
    %324 = arith.mulf %323, %313 : vector<2x14x14xf32>
    %325 = arith.addf %311, %324 : vector<2x14x14xf32>
    %326 = vector.extract_strided_slice %0 {offsets = [0, 2, 1, 2], sizes = [2, 1, 14, 14], strides = [1, 1, 1, 1]} : vector<2x3x16x16xf32> to vector<2x1x14x14xf32>
    %327 = vector.shape_cast %326 : vector<2x1x14x14xf32> to vector<2x14x14xf32>
    %c23 = arith.constant 23 : index
    %328 = memref.load %arg1[%c23] : memref<87xf32, #tpu.memory_space<smem>>
    %329 = vector.broadcast %328 : f32 to vector<2x14x14xf32>
    %330 = arith.mulf %329, %327 : vector<2x14x14xf32>
    %331 = arith.addf %317, %330 : vector<2x14x14xf32>
    %c50 = arith.constant 50 : index
    %332 = memref.load %arg1[%c50] : memref<87xf32, #tpu.memory_space<smem>>
    %333 = vector.broadcast %332 : f32 to vector<2x14x14xf32>
    %334 = arith.mulf %333, %327 : vector<2x14x14xf32>
    %335 = arith.addf %321, %334 : vector<2x14x14xf32>
    %c77 = arith.constant 77 : index
    %336 = memref.load %arg1[%c77] : memref<87xf32, #tpu.memory_space<smem>>
    %337 = vector.broadcast %336 : f32 to vector<2x14x14xf32>
    %338 = arith.mulf %337, %327 : vector<2x14x14xf32>
    %339 = arith.addf %325, %338 : vector<2x14x14xf32>
    %340 = vector.extract_strided_slice %0 {offsets = [0, 2, 2, 0], sizes = [2, 1, 14, 14], strides = [1, 1, 1, 1]} : vector<2x3x16x16xf32> to vector<2x1x14x14xf32>
    %341 = vector.shape_cast %340 : vector<2x1x14x14xf32> to vector<2x14x14xf32>
    %c24 = arith.constant 24 : index
    %342 = memref.load %arg1[%c24] : memref<87xf32, #tpu.memory_space<smem>>
    %343 = vector.broadcast %342 : f32 to vector<2x14x14xf32>
    %344 = arith.mulf %343, %341 : vector<2x14x14xf32>
    %345 = arith.addf %331, %344 : vector<2x14x14xf32>
    %c51 = arith.constant 51 : index
    %346 = memref.load %arg1[%c51] : memref<87xf32, #tpu.memory_space<smem>>
    %347 = vector.broadcast %346 : f32 to vector<2x14x14xf32>
    %348 = arith.mulf %347, %341 : vector<2x14x14xf32>
    %349 = arith.addf %335, %348 : vector<2x14x14xf32>
    %c78 = arith.constant 78 : index
    %350 = memref.load %arg1[%c78] : memref<87xf32, #tpu.memory_space<smem>>
    %351 = vector.broadcast %350 : f32 to vector<2x14x14xf32>
    %352 = arith.mulf %351, %341 : vector<2x14x14xf32>
    %353 = arith.addf %339, %352 : vector<2x14x14xf32>
    %354 = vector.extract_strided_slice %0 {offsets = [0, 2, 2, 1], sizes = [2, 1, 14, 14], strides = [1, 1, 1, 1]} : vector<2x3x16x16xf32> to vector<2x1x14x14xf32>
    %355 = vector.shape_cast %354 : vector<2x1x14x14xf32> to vector<2x14x14xf32>
    %c25 = arith.constant 25 : index
    %356 = memref.load %arg1[%c25] : memref<87xf32, #tpu.memory_space<smem>>
    %357 = vector.broadcast %356 : f32 to vector<2x14x14xf32>
    %358 = arith.mulf %357, %355 : vector<2x14x14xf32>
    %359 = arith.addf %345, %358 : vector<2x14x14xf32>
    %c52 = arith.constant 52 : index
    %360 = memref.load %arg1[%c52] : memref<87xf32, #tpu.memory_space<smem>>
    %361 = vector.broadcast %360 : f32 to vector<2x14x14xf32>
    %362 = arith.mulf %361, %355 : vector<2x14x14xf32>
    %363 = arith.addf %349, %362 : vector<2x14x14xf32>
    %c79 = arith.constant 79 : index
    %364 = memref.load %arg1[%c79] : memref<87xf32, #tpu.memory_space<smem>>
    %365 = vector.broadcast %364 : f32 to vector<2x14x14xf32>
    %366 = arith.mulf %365, %355 : vector<2x14x14xf32>
    %367 = arith.addf %353, %366 : vector<2x14x14xf32>
    %368 = vector.extract_strided_slice %0 {offsets = [0, 2, 2, 2], sizes = [2, 1, 14, 14], strides = [1, 1, 1, 1]} : vector<2x3x16x16xf32> to vector<2x1x14x14xf32>
    %369 = vector.shape_cast %368 : vector<2x1x14x14xf32> to vector<2x14x14xf32>
    %c26 = arith.constant 26 : index
    %370 = memref.load %arg1[%c26] : memref<87xf32, #tpu.memory_space<smem>>
    %371 = vector.broadcast %370 : f32 to vector<2x14x14xf32>
    %372 = arith.mulf %371, %369 : vector<2x14x14xf32>
    %373 = arith.addf %359, %372 : vector<2x14x14xf32>
    %c53 = arith.constant 53 : index
    %374 = memref.load %arg1[%c53] : memref<87xf32, #tpu.memory_space<smem>>
    %375 = vector.broadcast %374 : f32 to vector<2x14x14xf32>
    %376 = arith.mulf %375, %369 : vector<2x14x14xf32>
    %377 = arith.addf %363, %376 : vector<2x14x14xf32>
    %c80 = arith.constant 80 : index
    %378 = memref.load %arg1[%c80] : memref<87xf32, #tpu.memory_space<smem>>
    %379 = vector.broadcast %378 : f32 to vector<2x14x14xf32>
    %380 = arith.mulf %379, %369 : vector<2x14x14xf32>
    %381 = arith.addf %367, %380 : vector<2x14x14xf32>
    %cst_6 = arith.constant dense<0.000000e+00> : vector<14x14xf32>
    %382 = vector.multi_reduction <add>, %373, %cst_6 [0] : vector<2x14x14xf32> to vector<14x14xf32>
    %383 = vector.shape_cast %382 : vector<14x14xf32> to vector<1x14x14xf32>
    %cst_7 = arith.constant dense<0.000000e+00> : vector<1x14xf32>
    %384 = vector.multi_reduction <add>, %383, %cst_7 [2] : vector<1x14x14xf32> to vector<1x14xf32>
    %385 = vector.shape_cast %384 : vector<1x14xf32> to vector<1x14x1xf32>
    %cst_8 = arith.constant dense<0.000000e+00> : vector<1x1xf32>
    %386 = vector.multi_reduction <add>, %385, %cst_8 [1] : vector<1x14x1xf32> to vector<1x1xf32>
    %387 = vector.shape_cast %386 : vector<1x1xf32> to vector<1x1x1xf32>
    %388 = arith.mulf %373, %373 : vector<2x14x14xf32>
    %cst_9 = arith.constant dense<0.000000e+00> : vector<14x14xf32>
    %389 = vector.multi_reduction <add>, %388, %cst_9 [0] : vector<2x14x14xf32> to vector<14x14xf32>
    %390 = vector.shape_cast %389 : vector<14x14xf32> to vector<1x14x14xf32>
    %cst_10 = arith.constant dense<0.000000e+00> : vector<1x14xf32>
    %391 = vector.multi_reduction <add>, %390, %cst_10 [2] : vector<1x14x14xf32> to vector<1x14xf32>
    %392 = vector.shape_cast %391 : vector<1x14xf32> to vector<1x14x1xf32>
    %cst_11 = arith.constant dense<0.000000e+00> : vector<1x1xf32>
    %393 = vector.multi_reduction <add>, %392, %cst_11 [1] : vector<1x14x1xf32> to vector<1x1xf32>
    %394 = vector.shape_cast %393 : vector<1x1xf32> to vector<1x1x1xf32>
    %cst_12 = arith.constant 0.00255102036 : f32
    %395 = vector.broadcast %cst_12 : f32 to vector<1x1x1xf32>
    %396 = arith.mulf %387, %395 : vector<1x1x1xf32>
    %cst_13 = arith.constant 0.00255102036 : f32
    %397 = vector.broadcast %cst_13 : f32 to vector<1x1x1xf32>
    %398 = arith.mulf %394, %397 : vector<1x1x1xf32>
    %399 = arith.mulf %396, %396 : vector<1x1x1xf32>
    %400 = arith.subf %398, %399 : vector<1x1x1xf32>
    %c81 = arith.constant 81 : index
    %401 = memref.load %arg1[%c81] : memref<87xf32, #tpu.memory_space<smem>>
    %c84 = arith.constant 84 : index
    %402 = memref.load %arg1[%c84] : memref<87xf32, #tpu.memory_space<smem>>
    %cst_14 = arith.constant 9.99999974E-6 : f32
    %403 = vector.broadcast %cst_14 : f32 to vector<1x1x1xf32>
    %404 = arith.addf %400, %403 : vector<1x1x1xf32>
    %405 = math.rsqrt %404 : vector<1x1x1xf32>
    %406 = vector.broadcast %401 : f32 to vector<1x1x1xf32>
    %407 = arith.mulf %405, %406 : vector<1x1x1xf32>
    %408 = arith.mulf %396, %407 : vector<1x1x1xf32>
    %409 = vector.broadcast %402 : f32 to vector<1x1x1xf32>
    %410 = arith.subf %409, %408 : vector<1x1x1xf32>
    %411 = vector.broadcast %407 : vector<1x1x1xf32> to vector<2x14x14xf32>
    %412 = arith.mulf %373, %411 : vector<2x14x14xf32>
    %413 = vector.broadcast %410 : vector<1x1x1xf32> to vector<2x14x14xf32>
    %414 = arith.addf %412, %413 : vector<2x14x14xf32>
    %cst_15 = arith.constant dense<0.000000e+00> : vector<14x14xf32>
    %415 = vector.multi_reduction <add>, %377, %cst_15 [0] : vector<2x14x14xf32> to vector<14x14xf32>
    %416 = vector.shape_cast %415 : vector<14x14xf32> to vector<1x14x14xf32>
    %cst_16 = arith.constant dense<0.000000e+00> : vector<1x14xf32>
    %417 = vector.multi_reduction <add>, %416, %cst_16 [2] : vector<1x14x14xf32> to vector<1x14xf32>
    %418 = vector.shape_cast %417 : vector<1x14xf32> to vector<1x14x1xf32>
    %cst_17 = arith.constant dense<0.000000e+00> : vector<1x1xf32>
    %419 = vector.multi_reduction <add>, %418, %cst_17 [1] : vector<1x14x1xf32> to vector<1x1xf32>
    %420 = vector.shape_cast %419 : vector<1x1xf32> to vector<1x1x1xf32>
    %421 = arith.mulf %377, %377 : vector<2x14x14xf32>
    %cst_18 = arith.constant dense<0.000000e+00> : vector<14x14xf32>
    %422 = vector.multi_reduction <add>, %421, %cst_18 [0] : vector<2x14x14xf32> to vector<14x14xf32>
    %423 = vector.shape_cast %422 : vector<14x14xf32> to vector<1x14x14xf32>
    %cst_19 = arith.constant dense<0.000000e+00> : vector<1x14xf32>
    %424 = vector.multi_reduction <add>, %423, %cst_19 [2] : vector<1x14x14xf32> to vector<1x14xf32>
    %425 = vector.shape_cast %424 : vector<1x14xf32> to vector<1x14x1xf32>
    %cst_20 = arith.constant dense<0.000000e+00> : vector<1x1xf32>
    %426 = vector.multi_reduction <add>, %425, %cst_20 [1] : vector<1x14x1xf32> to vector<1x1xf32>
    %427 = vector.shape_cast %426 : vector<1x1xf32> to vector<1x1x1xf32>
    %cst_21 = arith.constant 0.00255102036 : f32
    %428 = vector.broadcast %cst_21 : f32 to vector<1x1x1xf32>
    %429 = arith.mulf %420, %428 : vector<1x1x1xf32>
    %cst_22 = arith.constant 0.00255102036 : f32
    %430 = vector.broadcast %cst_22 : f32 to vector<1x1x1xf32>
    %431 = arith.mulf %427, %430 : vector<1x1x1xf32>
    %432 = arith.mulf %429, %429 : vector<1x1x1xf32>
    %433 = arith.subf %431, %432 : vector<1x1x1xf32>
    %c82 = arith.constant 82 : index
    %434 = memref.load %arg1[%c82] : memref<87xf32, #tpu.memory_space<smem>>
    %c85 = arith.constant 85 : index
    %435 = memref.load %arg1[%c85] : memref<87xf32, #tpu.memory_space<smem>>
    %cst_23 = arith.constant 9.99999974E-6 : f32
    %436 = vector.broadcast %cst_23 : f32 to vector<1x1x1xf32>
    %437 = arith.addf %433, %436 : vector<1x1x1xf32>
    %438 = math.rsqrt %437 : vector<1x1x1xf32>
    %439 = vector.broadcast %434 : f32 to vector<1x1x1xf32>
    %440 = arith.mulf %438, %439 : vector<1x1x1xf32>
    %441 = arith.mulf %429, %440 : vector<1x1x1xf32>
    %442 = vector.broadcast %435 : f32 to vector<1x1x1xf32>
    %443 = arith.subf %442, %441 : vector<1x1x1xf32>
    %444 = vector.broadcast %440 : vector<1x1x1xf32> to vector<2x14x14xf32>
    %445 = arith.mulf %377, %444 : vector<2x14x14xf32>
    %446 = vector.broadcast %443 : vector<1x1x1xf32> to vector<2x14x14xf32>
    %447 = arith.addf %445, %446 : vector<2x14x14xf32>
    %cst_24 = arith.constant dense<0.000000e+00> : vector<14x14xf32>
    %448 = vector.multi_reduction <add>, %381, %cst_24 [0] : vector<2x14x14xf32> to vector<14x14xf32>
    %449 = vector.shape_cast %448 : vector<14x14xf32> to vector<1x14x14xf32>
    %cst_25 = arith.constant dense<0.000000e+00> : vector<1x14xf32>
    %450 = vector.multi_reduction <add>, %449, %cst_25 [2] : vector<1x14x14xf32> to vector<1x14xf32>
    %451 = vector.shape_cast %450 : vector<1x14xf32> to vector<1x14x1xf32>
    %cst_26 = arith.constant dense<0.000000e+00> : vector<1x1xf32>
    %452 = vector.multi_reduction <add>, %451, %cst_26 [1] : vector<1x14x1xf32> to vector<1x1xf32>
    %453 = vector.shape_cast %452 : vector<1x1xf32> to vector<1x1x1xf32>
    %454 = arith.mulf %381, %381 : vector<2x14x14xf32>
    %cst_27 = arith.constant dense<0.000000e+00> : vector<14x14xf32>
    %455 = vector.multi_reduction <add>, %454, %cst_27 [0] : vector<2x14x14xf32> to vector<14x14xf32>
    %456 = vector.shape_cast %455 : vector<14x14xf32> to vector<1x14x14xf32>
    %cst_28 = arith.constant dense<0.000000e+00> : vector<1x14xf32>
    %457 = vector.multi_reduction <add>, %456, %cst_28 [2] : vector<1x14x14xf32> to vector<1x14xf32>
    %458 = vector.shape_cast %457 : vector<1x14xf32> to vector<1x14x1xf32>
    %cst_29 = arith.constant dense<0.000000e+00> : vector<1x1xf32>
    %459 = vector.multi_reduction <add>, %458, %cst_29 [1] : vector<1x14x1xf32> to vector<1x1xf32>
    %460 = vector.shape_cast %459 : vector<1x1xf32> to vector<1x1x1xf32>
    %cst_30 = arith.constant 0.00255102036 : f32
    %461 = vector.broadcast %cst_30 : f32 to vector<1x1x1xf32>
    %462 = arith.mulf %453, %461 : vector<1x1x1xf32>
    %cst_31 = arith.constant 0.00255102036 : f32
    %463 = vector.broadcast %cst_31 : f32 to vector<1x1x1xf32>
    %464 = arith.mulf %460, %463 : vector<1x1x1xf32>
    %465 = arith.mulf %462, %462 : vector<1x1x1xf32>
    %466 = arith.subf %464, %465 : vector<1x1x1xf32>
    %c83 = arith.constant 83 : index
    %467 = memref.load %arg1[%c83] : memref<87xf32, #tpu.memory_space<smem>>
    %c86 = arith.constant 86 : index
    %468 = memref.load %arg1[%c86] : memref<87xf32, #tpu.memory_space<smem>>
    %cst_32 = arith.constant 9.99999974E-6 : f32
    %469 = vector.broadcast %cst_32 : f32 to vector<1x1x1xf32>
    %470 = arith.addf %466, %469 : vector<1x1x1xf32>
    %471 = math.rsqrt %470 : vector<1x1x1xf32>
    %472 = vector.broadcast %467 : f32 to vector<1x1x1xf32>
    %473 = arith.mulf %471, %472 : vector<1x1x1xf32>
    %474 = arith.mulf %462, %473 : vector<1x1x1xf32>
    %475 = vector.broadcast %468 : f32 to vector<1x1x1xf32>
    %476 = arith.subf %475, %474 : vector<1x1x1xf32>
    %477 = vector.broadcast %473 : vector<1x1x1xf32> to vector<2x14x14xf32>
    %478 = arith.mulf %381, %477 : vector<2x14x14xf32>
    %479 = vector.broadcast %476 : vector<1x1x1xf32> to vector<2x14x14xf32>
    %480 = arith.addf %478, %479 : vector<2x14x14xf32>
    %481 = vector.shape_cast %414 : vector<2x14x14xf32> to vector<2x1x14x14xf32>
    %482 = vector.shape_cast %447 : vector<2x14x14xf32> to vector<2x1x14x14xf32>
    %483 = vector.shape_cast %480 : vector<2x14x14xf32> to vector<2x1x14x14xf32>
    %484 = tpu.concatenate %481, %482, %483 in 1 : vector<2x1x14x14xf32>, vector<2x1x14x14xf32>, vector<2x1x14x14xf32> -> vector<2x3x14x14xf32>
    %c0_33 = arith.constant 0 : index
    %c0_34 = arith.constant 0 : index
    %c0_35 = arith.constant 0 : index
    %c0_36 = arith.constant 0 : index
    %485 = vector.load %arg2[%c0_33, %c0_34, %c0_35, %c0_36] : memref<2x3x14x14xf32, #tpu.memory_space<vmem>>, vector<2x3x14x14xf32>
    tpu.vector_store %arg2[%c0_33, %c0_34, %c0_35, %c0_36], %484 {strides = array<i32>} : memref<2x3x14x14xf32, #tpu.memory_space<vmem>>, vector<2x3x14x14xf32>,
    return
  }
}

</mosaic_0001>

<bundles_post_ra>
// kernel: tpu_custom_call.1
= control target key start
LH: loop header
LB: loop body
LE: loop exit
PB: predicated region body
PF: predicated region fallthrough
CT: control target
= control target key end

     0   :  { %7 = vsyncpa [#allocation3], 0  ;;  %s4755_s0 = inlined_call_operand.hbm [shape: f32[2,3,16,16], index: 0, kind: input, shape index: {}]   ;;  %s4756_s1 = inlined_call_operand.vmem [shape: f32[87], index: 1, kind: input, shape index: {}]   ;;  %s4757_s2 = inlined_call_operand.vmem [shape: f32[2,3,14,14], index: 2, kind: output, shape index: {}]  }
   0x1   :  { %8 = vsyncpa [#allocation4], 0  ;;  %s2557_s9 = smov [#allocation2]   ;;  %s27_s13 = sshll.u32 %s4756_s1, 4  ;;  %s28_s13 = int_to_ptr.vmem [resolvable:$true] %s27_s13 }
   0x2   :  { %s14_s10 = sshll.u32 %s2557_s9, 4  ;;  %s2519_s16 = scalar_lea.hbm %s4755_s0, 1536  ;;  %s15_s10 = int_to_ptr.vmem [resolvable:$true] %s14_s10 }
   0x3   :  { %p2520_p0 = scmp.ne.s32.totalorder %s4755_s0, %s2519_s16  ;;  %p2523_p1 = scmp.lt.u32.totalorder %s2519_s16, %s4755_s0 }
   0x5   :  { %p2525_p2 = pnand %p2523_p1, %p2520_p0 }
   0x7   :  { %2528 = shalt.err (!%p2525_p2)
}
   0x8   :  { %s2529_s21 = scalar_lea.vmem %s15_s10, 1536  ;;  %p2534_p4 = scmp.lt.s32.totalorder %s15_s10, %s15_s10 }
   0x9   :  { %p2530_p3 = scmp.ne.s32.totalorder %s15_s10, %s2529_s21  ;;  %p2535_p5 = scmp.lt.s32.totalorder %s2529_s21, %s2529_s21 }
   0xb   :  { %p2536_p6 = por %p2535_p5, %p2534_p4 }
   0xd   :  { %p2537_p7 = pnand %p2536_p6, %p2530_p3 }
   0xf   :  { %2540 = shalt.err (!%p2537_p7)
}
  0x10   :  { %s2558_s1 = smov 128   ;;  %s2559_s22 = smov 8  }
  0x11   :  { %20 = dma.hbm_to_vmem [thread:$0]  %s4755_s0, 1536, %s15_s10, [#allocation3], %s2558_s1, %s2558_s1, %s2559_s22  }
  0x12   :  { %s2541_s25 = scalar_lea.vmem %s28_s13, 16  ;;  %p2546_p9 = scmp.lt.s32.totalorder %s28_s13, %s28_s13 }
  0x13   :  { %p2542_p8 = scmp.ne.s32.totalorder %s28_s13, %s2541_s25  ;;  %p2547_p10 = scmp.lt.s32.totalorder %s2541_s25, %s2541_s25 }
  0x15   :  { %p2548_p11 = por %p2547_p10, %p2546_p9 }
  0x17   :  { %p2549_p12 = pnand %p2548_p11, %p2542_p8 }
  0x19   :  { %2552 = shalt.err (!%p2549_p12)
}
  0x1a   :  { %s2560_s26 = smov [#allocation5]  }
  0x1b   :  { %30 = dma.vmem_to_smem %s28_s13, 16, %s2560_s26, [#allocation4]  }
  0x1c   :  { %2553 = dma.done.wait [#allocation3], 1536  }
  0x1d   :  { %2554 = vsyncadd [#allocation3], 4294965760 }
  0x1e   :  { %2555 = dma.done.wait [#allocation4], 16  }
  0x1f   :  { %2556 = vsyncadd [#allocation4], 4294967280 }
  0x20   :  { %37 = sfence }
  0x21   :  { %s2411_s27 = sld [smem:[#allocation5 + $0x1]]  ;;  %s2412_s28 = sld [smem:[#allocation5 + $0x1c]]  ;;  %v2593_v0 = vld [vmem:[#allocation2 + $0x30] sm:$0xff]  ;;  %v2595_v1 = vld [vmem:[#allocation2] sm:$0xff]  ;;  %v2597_v3 = vld [vmem:[#allocation2 + $0x38] sm:$0xff]  ;;  %vm246_vm0 = vcmask 1046528  }
  0x22   :  { %v2599_v4 = vld [vmem:[#allocation2 + $0x8] sm:$0xff]  ;;  %s2561_s0 = smov 127   ;;  %s2413_s29 = sld [smem:[#allocation5 + $0x37]]  ;;  %vm511_vm1 = vcmask 1045504   ;;  %vm2198_vm2 = vcmask 111616   ;;  %vm2194_vm3 = vcmask 113664  }
  0x23   :  { %s2414_s30 = sld [smem:[#allocation5 + $0x2]]  ;;  %s2415_s3 = sld [smem:[#allocation5 + $0x1d]] }
  0x24   :  { %s2562_s4 = smov 126   ;;  %s2416_s5 = sld [smem:[#allocation5 + $0x38]] }
  0x25   :  { %s2420_s6 = sld [smem:[#allocation5 + $0x4]]  ;;  %s2421_s7 = sld [smem:[#allocation5 + $0x1f]] }
  0x26   :  { %s2422_s8 = sld [smem:[#allocation5 + $0x3a]]  ;;  %s2423_s9 = sld [smem:[#allocation5 + $0x5]] }
  0x27   :  { %v81_v2 = vstv %s2411_s27  ;;  %v107_v9 = vstv %s2412_s28  ;;  %s2424_s10 = sld [smem:[#allocation5 + $0x20]]  ;;  %s2425_s11 = sld [smem:[#allocation5 + $0x3b]] }
  0x28   :  { %v84_v5 = vmul.f32 %v81_v2, %v2593_v0  ;;  %v82_v6 = vmul.f32 %v81_v2, %v2595_v1  ;;  %v85_v7 = vmul.f32 %v81_v2, %v2597_v3  ;;  %v83_v8 = vmul.f32 %v81_v2, %v2599_v4  ;;  %s2429_s12 = sld [smem:[#allocation5 + $0x7]]  ;;  %s2430_s13 = sld [smem:[#allocation5 + $0x22]] }
  0x29   :  { %v109_v10 = vmul.f32 %v107_v9, %v2599_v4  ;;  %v108_v11 = vmul.f32 %v107_v9, %v2595_v1  ;;  %v111_v12 = vmul.f32 %v107_v9, %v2597_v3  ;;  %v110_v13 = vmul.f32 %v107_v9, %v2593_v0  ;;  %s2431_s14 = sld [smem:[#allocation5 + $0x3d]]  ;;  %s2432_s15 = sld [smem:[#allocation5 + $0x8]] }
  0x2a   :  { %94 = vrot.lane.b32.xlu1 %v84_v5, %s2561_s0  ;;  %90 = vrot.lane.b32.xlu0 %v82_v6, %s2561_s0  ;;  %v133_v14 = vstv %s2413_s29  ;;  %v159_v19 = vstv %s2414_s30  ;;  %s2433_s16 = sld [smem:[#allocation5 + $0x23]]  ;;  %s2434_s17 = sld [smem:[#allocation5 + $0x3e]] }
  0x2b   :  { %v135_v15 = vmul.f32 %v133_v14, %v2599_v4  ;;  %v134_v16 = vmul.f32 %v133_v14, %v2595_v1  ;;  %v137_v17 = vmul.f32 %v133_v14, %v2597_v3  ;;  %v136_v18 = vmul.f32 %v133_v14, %v2593_v0  ;;  %s2438_s18 = sld [smem:[#allocation5 + $0xa]]  ;;  %s2439_s19 = sld [smem:[#allocation5 + $0x25]] }
  0x2c   :  { %v161_v20 = vmul.f32 %v159_v19, %v2599_v4  ;;  %v160_v21 = vmul.f32 %v159_v19, %v2595_v1  ;;  %v163_v22 = vmul.f32 %v159_v19, %v2597_v3  ;;  %v162_v23 = vmul.f32 %v159_v19, %v2593_v0  ;;  %s2440_s20 = sld [smem:[#allocation5 + $0x40]]  ;;  %s2441_s21 = sld [smem:[#allocation5 + $0xb]] }
  0x2d   :  { %v185_v24 = vstv %s2415_s3  ;;  %v211_v29 = vstv %s2416_s5  ;;  %v310_v30 = vstv %s2420_s6  ;;  %v342_v41 = vstv %s2421_s7  ;;  %s2442_s1 = sld [smem:[#allocation5 + $0x26]]  ;;  %s2443_s22 = sld [smem:[#allocation5 + $0x41]] }
  0x2e   :  { %96 = vrot.lane.b32.xlu1 %v85_v7, %s2561_s0  ;;  %92 = vrot.lane.b32.xlu0 %v83_v8, %s2561_s0  ;;  %v187_v25 = vmul.f32 %v185_v24, %v2599_v4  ;;  %v186_v26 = vmul.f32 %v185_v24, %v2595_v1  ;;  %v189_v27 = vmul.f32 %v185_v24, %v2597_v3  ;;  %v374_v48 = vstv %s2422_s8  ;;  %s2447_s23 = sld [smem:[#allocation5 + $0xd]]  ;;  %s2448_s24 = sld [smem:[#allocation5 + $0x28]] }
  0x2f   :  { %v188_v28 = vmul.f32 %v185_v24, %v2593_v0  ;;  %v213_v31 = vmul.f32 %v211_v29, %v2599_v4  ;;  %v212_v32 = vmul.f32 %v211_v29, %v2595_v1  ;;  %v312_v33 = vmul.f32 %v310_v30, %v2599_v4  ;;  %s2449_s25 = sld [smem:[#allocation5 + $0x43]]  ;;  %s2450_s26 = sld [smem:[#allocation5 + $0xe]] }
  0x30   :  { %v311_v34 = vmul.f32 %v310_v30, %v2595_v1  ;;  %v215_v35 = vmul.f32 %v211_v29, %v2597_v3  ;;  %v214_v36 = vmul.f32 %v211_v29, %v2593_v0  ;;  %v314_v37 = vmul.f32 %v310_v30, %v2597_v3  ;;  %s2451_s27 = sld [smem:[#allocation5 + $0x29]]  ;;  %s2452_s28 = sld [smem:[#allocation5 + $0x44]] }
  0x31   :  { %v320_v38 = vrot.slane %v312_v33, 1  ;;  %v313_v40 = vmul.f32 %v310_v30, %v2593_v0  ;;  %v344_v45 = vmul.f32 %v342_v41, %v2599_v4  ;;  %v343_v46 = vmul.f32 %v342_v41, %v2595_v1  ;;  %s2456_s29 = sld [smem:[#allocation5 + $0x10]]  ;;  %s2457_s30 = sld [smem:[#allocation5 + $0x2b]] }
  0x32   :  { %118 = vrot.lane.b32.xlu1 %v109_v10, %s2561_s0  ;;  %116 = vrot.lane.b32.xlu0 %v108_v11, %s2561_s0  ;;  %v319_v39 = vrot.slane %v311_v34, 1  ;;  %v323_v42 = vrot.slane %v314_v37, 1  ;;  %v346_v47 = vmul.f32 %v342_v41, %v2597_v3  ;;  %v345_v52 = vmul.f32 %v342_v41, %v2593_v0  ;;  %s2458_s3 = sld [smem:[#allocation5 + $0x46]]  ;;  %s2459_s5 = sld [smem:[#allocation5 + $0x11]] }
  0x33   :  { %v322_v44 = vrot.slane %v313_v40, 1  ;;  %v352_v50 = vrot.slane %v344_v45, 1  ;;  %v351_v51 = vrot.slane %v343_v46, 1  ;;  %v376_v53 = vmul.f32 %v374_v48, %v2599_v4  ;;  %s2460_s6 = sld [smem:[#allocation5 + $0x2c]]  ;;  %s2461_s7 = sld [smem:[#allocation5 + $0x47]] }
  0x34   :  { %v321_v43 = vsel %vm246_vm0, %v319_v39, %v320_v38  ;;  %v355_v55 = vrot.slane %v346_v47, 1  ;;  %v354_v56 = vrot.slane %v345_v52, 1  ;;  %v375_v57 = vmul.f32 %v374_v48, %v2595_v1  ;;  %s50_s8 = sld [smem:[#allocation5]] }
  0x35   :  { %v324_v49 = vsel %vm246_vm0, %v322_v44, %v323_v42  ;;  %v353_v54 = vsel %vm246_vm0, %v351_v51, %v352_v50  ;;  %v384_v58 = vrot.slane %v376_v53, 1  ;;  %v406_v59 = vstv %s2423_s9  ;;  %s2409_s9 = sld [smem:[#allocation5 + $0x1b]] }
  0x36   :  { %122 = vrot.lane.b32.xlu1 %v111_v12, %s2561_s0  ;;  %120 = vrot.lane.b32.xlu0 %v110_v13, %s2561_s0  ;;  %v356_v60 = vsel %vm246_vm0, %v354_v56, %v355_v55  ;;  %v383_v61 = vrot.slane %v375_v57, 1  ;;  %v378_v62 = vmul.f32 %v374_v48, %v2597_v3  ;;  %v377_v63 = vmul.f32 %v374_v48, %v2593_v0 }
  0x37   :  { %v408_v2 = vmul.f32 %v406_v59, %v2599_v4  ;;  %v407_v8 = vmul.f32 %v406_v59, %v2595_v1  ;;  %v410_v9 = vmul.f32 %v406_v59, %v2597_v3  ;;  %v438_v10 = vstv %s2424_s10  ;;  %s2410_s10 = sld [smem:[#allocation5 + $0x36]] }
  0x38   :  { %v385_v5 = vsel %vm246_vm0, %v383_v61, %v384_v58  ;;  %v387_v6 = vrot.slane %v378_v62, 1  ;;  %v386_v7 = vrot.slane %v377_v63, 1  ;;  %v409_v14 = vmul.f32 %v406_v59, %v2593_v0 }
  0x39   :  { %v416_v12 = vrot.slane %v408_v2, 1  ;;  %v415_v13 = vrot.slane %v407_v8, 1  ;;  %v439_v19 = vmul.f32 %v438_v10, %v2595_v1  ;;  %v441_v24 = vmul.f32 %v438_v10, %v2593_v0 }
  0x3a   :  { %144 = vrot.lane.b32.xlu1 %v135_v15, %s2561_s0  ;;  %142 = vrot.lane.b32.xlu0 %v134_v16, %s2561_s0  ;;  %v388_v11 = vsel %vm246_vm0, %v386_v7, %v387_v6  ;;  %v440_v15 = vmul.f32 %v438_v10, %v2599_v4 }
  0x3b   :  { %v417_v16 = vsel %vm246_vm0, %v415_v13, %v416_v12 }
  0x3e   :  { %148 = vrot.lane.b32.xlu1 %v137_v17, %s2561_s0  ;;  %146 = vrot.lane.b32.xlu0 %v136_v18, %s2561_s0  ;;  %v419_v17 = vrot.slane %v410_v9, 1  ;;  %v418_v18 = vrot.slane %v409_v14, 1 }
  0x42   :  { %170 = vrot.lane.b32.xlu1 %v161_v20, %s2562_s4  ;;  %168 = vrot.lane.b32.xlu0 %v160_v21, %s2562_s4  ;;  %v442_v20 = vmul.f32 %v438_v10, %v2597_v3  ;;  %v420_v21 = vsel %vm246_vm0, %v418_v18, %v419_v17 }
  0x46   :  { %174 = vrot.lane.b32.xlu1 %v163_v22, %s2562_s4  ;;  %172 = vrot.lane.b32.xlu0 %v162_v23, %s2562_s4  ;;  %v448_v22 = vrot.slane %v440_v15, 1  ;;  %v447_v23 = vrot.slane %v439_v19, 1 }
  0x4a   :  { %196 = vrot.lane.b32.xlu1 %v187_v25, %s2562_s4  ;;  %194 = vrot.lane.b32.xlu0 %v186_v26, %s2562_s4  ;;  %v470_v25 = vstv %s2425_s11  ;;  %v451_v26 = vrot.slane %v442_v20, 1  ;;  %s2417_s11 = sld [smem:[#allocation5 + $0x3]] }
  0x4b   :  { %v472_v29 = vmul.f32 %v470_v25, %v2599_v4  ;;  %v471_v30 = vmul.f32 %v470_v25, %v2595_v1 }
  0x4d   :  { %v480_v34 = vrot.slane %v472_v29, 1 }
  0x4e   :  { %200 = vrot.lane.b32.xlu1 %v189_v27, %s2562_s4  ;;  %198 = vrot.lane.b32.xlu0 %v188_v28, %s2562_s4  ;;  %v449_v27 = vsel %vm246_vm0, %v447_v23, %v448_v22  ;;  %v450_v28 = vrot.slane %v441_v24, 1 }
  0x50   :  { %v452_v33 = vsel %vm246_vm0, %v450_v28, %v451_v26 }
  0x52   :  { %222 = vrot.lane.b32.xlu1 %v213_v31, %s2562_s4  ;;  %220 = vrot.lane.b32.xlu0 %v212_v32, %s2562_s4  ;;  %v474_v31 = vmul.f32 %v470_v25, %v2597_v3  ;;  %v575_v32 = vstv %s2429_s12  ;;  %s3091_s12 = sld [smem:[#allocation5 + $0x1e]] }
  0x53   :  { %v577_v37 = vmul.f32 %v575_v32, %v2599_v4  ;;  %v576_v41 = vmul.f32 %v575_v32, %v2595_v1  ;;  %v578_v47 = vmul.f32 %v575_v32, %v2593_v0 }
  0x54   :  { %v483_v39 = vrot.slane %v474_v31, 1 }
  0x55   :  { %v585_v45 = vrot.slane %v577_v37, 2  ;;  %v584_v46 = vrot.slane %v576_v41, 2  ;;  %v587_v51 = vrot.slane %v578_v47, 2  ;;  %v735_v37 = vstv %s2434_s17  ;;  %s3156_s17 = sld [smem:[#allocation5 + $0x21]] }
  0x56   :  { %226 = vrot.lane.b32.xlu1 %v215_v35, %s2562_s4  ;;  %224 = vrot.lane.b32.xlu0 %v214_v36, %s2562_s4  ;;  %v479_v35 = vrot.slane %v471_v30, 1  ;;  %v473_v36 = vmul.f32 %v470_v25, %v2593_v0  ;;  %v737_v41 = vmul.f32 %v735_v37, %v2599_v4 }
  0x58   :  { %v482_v40 = vrot.slane %v473_v36, 1 }
  0x5a   :  { %327 = vrot.lane.b32.xlu1 %v320_v38, %s2561_s0  ;;  %325 = vrot.lane.b32.xlu0 %v321_v43, %s2561_s0  ;;  %v481_v38 = vsel %vm246_vm0, %v479_v35, %v480_v34  ;;  %v607_v43 = vstv %s2430_s13  ;;  %v484_v44 = vsel %vm246_vm0, %v482_v40, %v483_v39  ;;  %s3098_s13 = sld [smem:[#allocation5 + $0x13]] }
  0x5b   :  { %v609_v48 = vmul.f32 %v607_v43, %v2599_v4  ;;  %v608_v52 = vmul.f32 %v607_v43, %v2595_v1  ;;  %v611_v53 = vmul.f32 %v607_v43, %v2597_v3 }
  0x5d   :  { %v617_v56 = vrot.slane %v609_v48, 2  ;;  %v616_v57 = vrot.slane %v608_v52, 2  ;;  %v620_v59 = vrot.slane %v611_v53, 2  ;;  %v739_v48 = vmul.f32 %v735_v37, %v2597_v3 }
  0x5e   :  { %331 = vrot.lane.b32.xlu1 %v323_v42, %s2561_s0  ;;  %329 = vrot.lane.b32.xlu0 %v324_v49, %s2561_s0  ;;  %v579_v42 = vmul.f32 %v575_v32, %v2597_v3  ;;  %v586_v49 = vsel %vm511_vm1, %v584_v46, %v585_v45  ;;  %v745_v46 = vrot.slane %v737_v41, 2 }
  0x5f   :  { %v618_v61 = vsel %vm511_vm1, %v616_v57, %v617_v56 }
  0x62   :  { %359 = vrot.lane.b32.xlu1 %v352_v50, %s2561_s0  ;;  %357 = vrot.lane.b32.xlu0 %v353_v54, %s2561_s0  ;;  %v588_v50 = vrot.slane %v579_v42, 2  ;;  %v610_v54 = vmul.f32 %v607_v43, %v2593_v0  ;;  %v736_v42 = vmul.f32 %v735_v37, %v2595_v1 }
  0x64   :  { %v744_v47 = vrot.slane %v736_v42, 2 }
  0x66   :  { %363 = vrot.lane.b32.xlu1 %v355_v55, %s2561_s0  ;;  %361 = vrot.lane.b32.xlu0 %v356_v60, %s2561_s0  ;;  %v589_v55 = vsel %vm511_vm1, %v587_v51, %v588_v50  ;;  %v619_v60 = vrot.slane %v610_v54, 2  ;;  %v748_v51 = vrot.slane %v739_v48, 2 }
  0x68   :  { %v621_v2 = vsel %vm511_vm1, %v619_v60, %v620_v59 }
  0x6a   :  { %391 = vrot.lane.b32.xlu1 %v384_v58, %s2561_s0  ;;  %389 = vrot.lane.b32.xlu0 %v385_v5, %s2561_s0  ;;  %v639_v58 = vstv %s2431_s14  ;;  %v671_v5 = vstv %s2432_s15  ;;  %s3100_s14 = sld [smem:[#allocation5 + $0x39]]  ;;  %s3109_s15 = sld [smem:[#allocation5 + $0x2e]] }
  0x6b   :  { %v641_v62 = vmul.f32 %v639_v58, %v2599_v4  ;;  %v640_v63 = vmul.f32 %v639_v58, %v2595_v1  ;;  %v643_v8 = vmul.f32 %v639_v58, %v2597_v3  ;;  %v642_v9 = vmul.f32 %v639_v58, %v2593_v0 }
  0x6c   :  { %v673_v10 = vmul.f32 %v671_v5, %v2599_v4  ;;  %v675_v18 = vmul.f32 %v671_v5, %v2597_v3  ;;  %v674_v19 = vmul.f32 %v671_v5, %v2593_v0 }
  0x6d   :  { %v648_v7 = vrot.slane %v640_v63, 2  ;;  %v652_v13 = vrot.slane %v643_v8, 2  ;;  %v651_v14 = vrot.slane %v642_v9, 2 }
  0x6e   :  { %395 = vrot.lane.b32.xlu1 %v387_v6, %s2561_s0  ;;  %393 = vrot.lane.b32.xlu0 %v388_v11, %s2561_s0  ;;  %v649_v6 = vrot.slane %v641_v62, 2  ;;  %v672_v11 = vmul.f32 %v671_v5, %v2595_v1  ;;  %v681_v15 = vrot.slane %v673_v10, 2  ;;  %v684_v24 = vrot.slane %v675_v18, 2  ;;  %v2805_v62 = vld [vmem:[#allocation2 + $0x40] sm:$0xff] }
  0x6f   :  { %v683_v25 = vrot.slane %v674_v19, 2 }
  0x71   :  { %v685_v32 = vsel %vm511_vm1, %v683_v25, %v684_v24 }
  0x72   :  { %423 = vrot.lane.b32.xlu1 %v416_v12, %s2562_s4  ;;  %421 = vrot.lane.b32.xlu0 %v417_v16, %s2562_s4  ;;  %v650_v12 = vsel %vm511_vm1, %v648_v7, %v649_v6  ;;  %v680_v16 = vrot.slane %v672_v11, 2  ;;  %v823_v7 = vstv %s2439_s19  ;;  %s3184_s19 = sld [smem:[#allocation5 + $0x3c]] }
  0x74   :  { %v682_v23 = vsel %vm511_vm1, %v680_v16, %v681_v15  ;;  %v849_v16 = vstv %s2440_s20  ;;  %s3271_s20 = sld [smem:[#allocation5 + $0x9]] }
  0x76   :  { %427 = vrot.lane.b32.xlu1 %v419_v17, %s2562_s4  ;;  %425 = vrot.lane.b32.xlu0 %v420_v21, %s2562_s4  ;;  %v653_v17 = vsel %vm511_vm1, %v651_v14, %v652_v13 }
  0x7a   :  { %455 = vrot.lane.b32.xlu1 %v448_v22, %s2562_s4  ;;  %453 = vrot.lane.b32.xlu0 %v449_v27, %s2562_s4  ;;  %v703_v22 = vstv %s2433_s16  ;;  %s3145_s16 = sld [smem:[#allocation5 + $0x6]] }
  0x7b   :  { %v704_v27 = vmul.f32 %v703_v22, %v2595_v1  ;;  %v707_v30 = vmul.f32 %v703_v22, %v2597_v3  ;;  %v706_v31 = vmul.f32 %v703_v22, %v2593_v0  ;;  %v2791_v3 = vld [vmem:[#allocation2 + $0x18] sm:$0xff] }
  0x7c   :  { %v825_v10 = vmul.f32 %v823_v7, %v2791_v3  ;;  %v851_v19 = vmul.f32 %v849_v16, %v2791_v3 }
  0x7e   :  { %459 = vrot.lane.b32.xlu1 %v451_v26, %s2562_s4  ;;  %457 = vrot.lane.b32.xlu0 %v452_v33, %s2562_s4  ;;  %v705_v26 = vmul.f32 %v703_v22, %v2599_v4 }
  0x80   :  { %v713_v33 = vrot.slane %v705_v26, 2  ;;  %v852_v26 = vmul.f32 %v849_v16, %v2805_v62 }
  0x82   :  { %487 = vrot.lane.b32.xlu1 %v480_v34, %s2562_s4  ;;  %485 = vrot.lane.b32.xlu0 %v481_v38, %s2562_s4  ;;  %v712_v34 = vrot.slane %v704_v27, 2  ;;  %v716_v38 = vrot.slane %v707_v30, 2  ;;  %v875_v27 = vstv %s2441_s21  ;;  %s3275_s21 = sld [smem:[#allocation5 + $0x24]] }
  0x84   :  { %v714_v40 = vsel %vm511_vm1, %v712_v34, %v713_v33 }
  0x86   :  { %491 = vrot.lane.b32.xlu1 %v483_v39, %s2562_s4  ;;  %489 = vrot.lane.b32.xlu0 %v484_v44, %s2562_s4  ;;  %v715_v39 = vrot.slane %v706_v31, 2 }
  0x8a   :  { %592 = vrot.lane.b32.xlu1 %v585_v45, %s2561_s0  ;;  %590 = vrot.lane.b32.xlu0 %v586_v49, %s2561_s0  ;;  %v717_v45 = vsel %vm511_vm1, %v715_v39, %v716_v38  ;;  %v738_v49 = vmul.f32 %v735_v37, %v2593_v0  ;;  %v878_v39 = vmul.f32 %v875_v27, %v2805_v62 }
  0x8c   :  { %v747_v52 = vrot.slane %v738_v49, 2 }
  0x8e   :  { %596 = vrot.lane.b32.xlu1 %v588_v50, %s2561_s0  ;;  %594 = vrot.lane.b32.xlu0 %v589_v55, %s2561_s0  ;;  %v746_v50 = vsel %vm511_vm1, %v744_v47, %v745_v46  ;;  %v749_v0 = vsel %vm511_vm1, %v747_v52, %v748_v51  ;;  %v797_v55 = vstv %s2438_s18  ;;  %v1025_v52 = vstv %s2447_s23  ;;  %s3172_s18 = sld [smem:[#allocation5 + $0x49]]  ;;  %s3394_s23 = sld [smem:[#allocation5 + $0x2f]] }
  0x92   :  { %624 = vrot.lane.b32.xlu1 %v617_v56, %s2561_s0  ;;  %622 = vrot.lane.b32.xlu0 %v618_v61, %s2561_s0  ;;  %v2793_v56 = vld [vmem:[#allocation2 + $0x10] sm:$0xff]  ;;  %v2803_v61 = vld [vmem:[#allocation2 + $0x48] sm:$0xff] }
  0x93   :  { %v798_v60 = vmul.f32 %v797_v55, %v2793_v56  ;;  %v801_v5 = vmul.f32 %v797_v55, %v2803_v61  ;;  %v824_v11 = vmul.f32 %v823_v7, %v2793_v56  ;;  %v827_v14 = vmul.f32 %v823_v7, %v2803_v61 }
  0x94   :  { %v850_v22 = vmul.f32 %v849_v16, %v2793_v56  ;;  %v853_v25 = vmul.f32 %v849_v16, %v2803_v61 }
  0x96   :  { %628 = vrot.lane.b32.xlu1 %v620_v59, %s2561_s0  ;;  %626 = vrot.lane.b32.xlu0 %v621_v2, %s2561_s0  ;;  %v799_v59 = vmul.f32 %v797_v55, %v2791_v3 }
  0x9a   :  { %656 = vrot.lane.b32.xlu1 %v649_v6, %s2561_s0  ;;  %654 = vrot.lane.b32.xlu0 %v650_v12, %s2561_s0  ;;  %v800_v6 = vmul.f32 %v797_v55, %v2805_v62 }
  0x9c   :  { %v2741_v20 = vpop.permute.xlu1 %94  ;;  %v2743_v21 = vpop.permute.xlu0 %90 }
  0x9e   :  { %660 = vrot.lane.b32.xlu1 %v652_v13, %s2561_s0  ;;  %658 = vrot.lane.b32.xlu0 %v653_v17, %s2561_s0 }
  0xa0   :  { %v2750_v28 = vpop.permute.xlu1 %96  ;;  %v2752_v29 = vpop.permute.xlu0 %92 }
  0xa2   :  { %688 = vrot.lane.b32.xlu1 %v681_v15, %s2562_s4  ;;  %686 = vrot.lane.b32.xlu0 %v682_v23, %s2562_s4  ;;  %v826_v15 = vmul.f32 %v823_v7, %v2805_v62 }
  0xa4   :  { %v2759_v35 = vpop.permute.xlu1 %118  ;;  %v2761_v36 = vpop.permute.xlu0 %116 }
  0xa6   :  { %692 = vrot.lane.b32.xlu1 %v684_v24, %s2562_s4  ;;  %690 = vrot.lane.b32.xlu0 %v685_v32, %s2562_s4  ;;  %v877_v32 = vmul.f32 %v875_v27, %v2791_v3 }
  0xa8   :  { %v2768_v43 = vpop.permute.xlu1 %122  ;;  %v2770_v44 = vpop.permute.xlu0 %120 }
  0xaa   :  { %720 = vrot.lane.b32.xlu1 %v713_v33, %s2562_s4  ;;  %718 = vrot.lane.b32.xlu0 %v714_v40, %s2562_s4  ;;  %v876_v33 = vmul.f32 %v875_v27, %v2793_v56  ;;  %v901_v40 = vstv %s2442_s1  ;;  %s3303_s1 = sld [smem:[#allocation5 + $0x3f]] }
  0xab   :  { %v905_v49 = vmul.f32 %v901_v40, %v2803_v61 }
  0xac   :  { %v2777_v4 = vpop.permute.xlu1 %144  ;;  %v2779_v1 = vpop.permute.xlu0 %142 }
  0xad   :  { %4773 = vst [vmem:[#allocation8_spill] sm:$0xff] %v2777_v4  ;;  %4774 = vst [vmem:[#allocation9_spill] sm:$0xff] %v2779_v1 }
  0xae   :  { %724 = vrot.lane.b32.xlu1 %v716_v38, %s2562_s4  ;;  %722 = vrot.lane.b32.xlu0 %v717_v45, %s2562_s4  ;;  %v879_v38 = vmul.f32 %v875_v27, %v2803_v61  ;;  %v903_v45 = vmul.f32 %v901_v40, %v2791_v3  ;;  %v1057_v27 = vstv %s2448_s24  ;;  %s3412_s24 = sld [smem:[#allocation5 + $0xc]] }
  0xb0   :  { %v2784_v53 = vpop.permute.xlu1 %148  ;;  %v2786_v54 = vpop.permute.xlu0 %146 }
  0xb1   :  { %4775 = vst [vmem:[#allocation10_spill] sm:$0xff] %v2784_v53  ;;  %4776 = vst [vmem:[#allocation11_spill] sm:$0xff] %v2786_v54 }
  0xb2   :  { %752 = vrot.lane.b32.xlu1 %v745_v46, %s2562_s4  ;;  %750 = vrot.lane.b32.xlu0 %v746_v50, %s2562_s4  ;;  %v902_v46 = vmul.f32 %v901_v40, %v2793_v56  ;;  %v904_v50 = vmul.f32 %v901_v40, %v2805_v62  ;;  %v1058_v40 = vmul.f32 %v1057_v27, %v2793_v56 }
  0xb4   :  { %v2795_v57 = vpop.permute.xlu1 %170  ;;  %v2797_v58 = vpop.permute.xlu0 %168 }
  0xb5   :  { %4777 = vst [vmem:[#allocation12_spill] sm:$0xff] %v2797_v58 }
  0xb6   :  { %756 = vrot.lane.b32.xlu1 %v748_v51, %s2562_s4  ;;  %754 = vrot.lane.b32.xlu0 %v749_v0, %s2562_s4  ;;  %v927_v51 = vstv %s2443_s22  ;;  %s3314_s22 = sld [smem:[#allocation5 + $0x14]] }
  0xb8   :  { %v2807_v63 = vpop.permute.xlu1 %174  ;;  %v2809_v2 = vpop.permute.xlu0 %172 }
  0xb9   :  { %4778 = vst [vmem:[#allocation13_spill] sm:$0xff] %v2807_v63  ;;  %4779 = vst [vmem:[#allocation14_spill] sm:$0xff] %v2809_v2  ;;  %v3291_v2 = vld [vmem:[#allocation2 + $0x50] sm:$0xff] }
  0xba   :  { %808 = vrot.lane.b32.xlu1 %v799_v59, %s2561_s0  ;;  %806 = vrot.lane.b32.xlu0 %v798_v60, %s2561_s0  ;;  %v929_v59 = vmul.f32 %v927_v51, %v2791_v3  ;;  %v928_v60 = vmul.f32 %v927_v51, %v2793_v56 }
  0xbc   :  { %v2815_v8 = vpop.permute.xlu1 %196  ;;  %v2817_v9 = vpop.permute.xlu0 %194 }
  0xbd   :  { %4780 = vst [vmem:[#allocation15_spill] sm:$0xff] %v2815_v8  ;;  %4781 = vst [vmem:[#allocation16_spill] sm:$0xff] %v2817_v9  ;;  %v551_v9 = vstv %s3184_s19  ;;  %s2472_s19 = sld [smem:[#allocation5 + $0x30]] }
  0xbe   :  { %812 = vrot.lane.b32.xlu1 %v801_v5, %s2561_s0  ;;  %810 = vrot.lane.b32.xlu0 %v800_v6, %s2561_s0  ;;  %v1027_v5 = vmul.f32 %v1025_v52, %v2791_v3  ;;  %v1026_v6 = vmul.f32 %v1025_v52, %v2793_v56 }
  0xc0   :  { %v2823_v12 = vpop.permute.xlu1 %200  ;;  %v2825_v13 = vpop.permute.xlu0 %198  ;;  %v1034_v16 = vrot.slane %v1026_v6, 1 }
  0xc1   :  { %4782 = vst [vmem:[#allocation17_spill] sm:$0xff] %v2823_v12  ;;  %4783 = vst [vmem:[#allocation18_spill] sm:$0xff] %v2825_v13  ;;  %v502_v12 = vstv %s3145_s16  ;;  %s4163_s16 = sld [smem:[#allocation5 + $0x1a]] }
  0xc2   :  { %834 = vrot.lane.b32.xlu1 %v825_v10, %s2561_s0  ;;  %832 = vrot.lane.b32.xlu0 %v824_v11, %s2561_s0  ;;  %v931_v11 = vmul.f32 %v927_v51, %v2803_v61 }
  0xc4   :  { %v2831_v17 = vpop.permute.xlu1 %222  ;;  %v2833_v18 = vpop.permute.xlu0 %220 }
  0xc5   :  { %4784 = vst [vmem:[#allocation19_spill] sm:$0xff] %v2831_v17  ;;  %4785 = vst [vmem:[#allocation20_spill] sm:$0xff] %v2833_v18 }
  0xc6   :  { %838 = vrot.lane.b32.xlu1 %v827_v14, %s2561_s0  ;;  %836 = vrot.lane.b32.xlu0 %v826_v15, %s2561_s0  ;;  %v930_v14 = vmul.f32 %v927_v51, %v2805_v62  ;;  %v1035_v15 = vrot.slane %v1027_v5, 1 }
  0xc8   :  { %v2839_v23 = vpop.permute.xlu1 %226  ;;  %v2841_v24 = vpop.permute.xlu0 %224 }
  0xc9   :  { %4786 = vst [vmem:[#allocation21_spill] sm:$0xff] %v2839_v23  ;;  %4787 = vst [vmem:[#allocation22_spill] sm:$0xff] %v2841_v24 }
  0xca   :  { %860 = vrot.lane.b32.xlu1 %v851_v19, %s2561_s0  ;;  %858 = vrot.lane.b32.xlu0 %v850_v22, %s2561_s0  ;;  %v1029_v19 = vmul.f32 %v1025_v52, %v2803_v61  ;;  %v1028_v22 = vmul.f32 %v1025_v52, %v2805_v62 }
  0xcc   :  { %v2847_v30 = vpop.permute.xlu1 %327  ;;  %v2849_v31 = vpop.permute.xlu0 %325 }
  0xcd   :  { %4788 = vst [vmem:[#allocation23_spill] sm:$0xff] %v2847_v30  ;;  %4789 = vst [vmem:[#allocation24_spill] sm:$0xff] %v2849_v31  ;;  %v3219_v30 = vstv %s3109_s15  ;;  %s4059_s15 = sld [smem:[#allocation5 + $0x48]] }
  0xce   :  { %864 = vrot.lane.b32.xlu1 %v853_v25, %s2561_s0  ;;  %862 = vrot.lane.b32.xlu0 %v852_v26, %s2561_s0 }
  0xd0   :  { %v2855_v34 = vpop.permute.xlu1 %331  ;;  %v2857_v37 = vpop.permute.xlu0 %329 }
  0xd1   :  { %4790 = vst [vmem:[#allocation25_spill] sm:$0xff] %v2855_v34  ;;  %4791 = vst [vmem:[#allocation26_spill] sm:$0xff] %v2857_v37 }
  0xd2   :  { %886 = vrot.lane.b32.xlu1 %v877_v32, %s2562_s4  ;;  %884 = vrot.lane.b32.xlu0 %v876_v33, %s2562_s4  ;;  %v1036_v32 = vsel %vm246_vm0, %v1034_v16, %v1035_v15  ;;  %v1038_v33 = vrot.slane %v1029_v19, 1 }
  0xd4   :  { %v2863_v41 = vpop.permute.xlu1 %359  ;;  %v2865_v42 = vpop.permute.xlu0 %357 }
  0xd5   :  { %4792 = vst [vmem:[#allocation27_spill] sm:$0xff] %v2863_v41  ;;  %4793 = vst [vmem:[#allocation28_spill] sm:$0xff] %v2865_v42 }
  0xd6   :  { %890 = vrot.lane.b32.xlu1 %v879_v38, %s2562_s4  ;;  %888 = vrot.lane.b32.xlu0 %v878_v39, %s2562_s4  ;;  %v1037_v38 = vrot.slane %v1028_v22, 1  ;;  %v1059_v39 = vmul.f32 %v1057_v27, %v2791_v3 }
  0xd8   :  { %v2871_v47 = vpop.permute.xlu1 %363  ;;  %v2873_v48 = vpop.permute.xlu0 %361  ;;  %v1039_v51 = vsel %vm246_vm0, %v1037_v38, %v1038_v33  ;;  %v1067_v52 = vrot.slane %v1059_v39, 1 }
  0xd9   :  { %4794 = vst [vmem:[#allocation29_spill] sm:$0xff] %v2871_v47  ;;  %4795 = vst [vmem:[#allocation30_spill] sm:$0xff] %v2873_v48 }
  0xda   :  { %912 = vrot.lane.b32.xlu1 %v903_v45, %s2562_s4  ;;  %910 = vrot.lane.b32.xlu0 %v902_v46, %s2562_s4 }
  0xdc   :  { %v2879_v0 = vpop.permute.xlu1 %391  ;;  %v2881_v55 = vpop.permute.xlu0 %389 }
  0xdd   :  { %4796 = vst [vmem:[#allocation31_spill] sm:$0xff] %v2879_v0  ;;  %4797 = vst [vmem:[#allocation32_spill] sm:$0xff] %v2881_v55 }
  0xde   :  { %916 = vrot.lane.b32.xlu1 %v905_v49, %s2562_s4  ;;  %914 = vrot.lane.b32.xlu0 %v904_v50, %s2562_s4  ;;  %v1061_v49 = vmul.f32 %v1057_v27, %v2803_v61  ;;  %v1060_v50 = vmul.f32 %v1057_v27, %v2805_v62 }
  0xe0   :  { %v2889_v7 = vpop.permute.xlu1 %395  ;;  %v2891_v10 = vpop.permute.xlu0 %393 }
  0xe1   :  { %4798 = vst [vmem:[#allocation33_spill] sm:$0xff] %v2889_v7  ;;  %4799 = vst [vmem:[#allocation34_spill] sm:$0xff] %v2891_v10  ;;  %v262_v7 = vstv %s3091_s12  ;;  %s3996_s12 = sld [smem:[#allocation5 + $0x34]] }
  0xe2   :  { %938 = vrot.lane.b32.xlu1 %v929_v59, %s2562_s4  ;;  %936 = vrot.lane.b32.xlu0 %v928_v60, %s2562_s4  ;;  %v1066_v59 = vrot.slane %v1058_v40, 1  ;;  %v1089_v60 = vstv %s2449_s25  ;;  %s3441_s25 = sld [smem:[#allocation5 + $0x4a]] }
  0xe3   :  { %v1090_v19 = vmul.f32 %v1089_v60, %v2793_v56  ;;  %v1093_v39 = vmul.f32 %v1089_v60, %v2803_v61  ;;  %v1092_v40 = vmul.f32 %v1089_v60, %v2805_v62 }
  0xe4   :  { %v2899_v25 = vpop.permute.xlu1 %423  ;;  %v2901_v26 = vpop.permute.xlu0 %421  ;;  %v1068_v16 = vsel %vm246_vm0, %v1066_v59, %v1067_v52 }
  0xe5   :  { %4800 = vst [vmem:[#allocation35_spill] sm:$0xff] %v2899_v25  ;;  %4801 = vst [vmem:[#allocation36_spill] sm:$0xff] %v2901_v26  ;;  %v1098_v38 = vrot.slane %v1090_v19, 1  ;;  %v3168_v26 = vstv %s3098_s13  ;;  %v3170_v25 = vld [vmem:[#allocation2 + $0x28] sm:$0xff]  ;;  %s4029_s13 = sld [smem:[#allocation5 + $0x4f]] }
  0xe6   :  { %942 = vrot.lane.b32.xlu1 %v931_v11, %s2562_s4  ;;  %940 = vrot.lane.b32.xlu0 %v930_v14, %s2562_s4  ;;  %v1070_v11 = vrot.slane %v1061_v49, 1  ;;  %v1069_v14 = vrot.slane %v1060_v50, 1  ;;  %v1121_v49 = vstv %s2450_s26  ;;  %4850 = vst [vmem:[#allocation85_spill] sm:$0xff] %v3170_v25  ;;  %s3467_s26 = sld [smem:[#allocation5 + $0x27]] }
  0xe7   :  { %v1122_v59 = vmul.f32 %v1121_v49, %v2793_v56 }
  0xe8   :  { %v2908_v45 = vpop.permute.xlu1 %427  ;;  %v2910_v46 = vpop.permute.xlu0 %425 }
  0xe9   :  { %4802 = vst [vmem:[#allocation37_spill] sm:$0xff] %v2908_v45  ;;  %4803 = vst [vmem:[#allocation38_spill] sm:$0xff] %v2910_v46  ;;  %v3165_v45 = vld [vmem:[#allocation2 + $0x58] sm:$0xff] }
  0xea   :  { %1042 = vrot.lane.b32.xlu1 %v1035_v15, %s2561_s0  ;;  %1040 = vrot.lane.b32.xlu0 %v1036_v32, %s2561_s0  ;;  %v1091_v15 = vmul.f32 %v1089_v60, %v2791_v3  ;;  %v1071_v32 = vsel %vm246_vm0, %v1069_v14, %v1070_v11  ;;  %4849 = vst [vmem:[#allocation84_spill] sm:$0xff] %v3165_v45 }
  0xeb   :  { %v1541_v23 = vmul.f32 %v3219_v30, %v3165_v45 }
  0xec   :  { %v2917_v5 = vpop.permute.xlu1 %455  ;;  %v2919_v6 = vpop.permute.xlu0 %453 }
  0xed   :  { %4804 = vst [vmem:[#allocation39_spill] sm:$0xff] %v2917_v5  ;;  %4805 = vst [vmem:[#allocation40_spill] sm:$0xff] %v2919_v6  ;;  %v3121_v6 = vld [vmem:[#allocation2 + $0x38] sm:$0xff] }
  0xee   :  { %1046 = vrot.lane.b32.xlu1 %v1038_v33, %s2561_s0  ;;  %1044 = vrot.lane.b32.xlu0 %v1039_v51, %s2561_s0  ;;  %v1099_v33 = vrot.slane %v1091_v15, 1  ;;  %v1102_v15 = vrot.slane %v1093_v39, 1 }
  0xf0   :  { %v2926_v22 = vpop.permute.xlu1 %459  ;;  %v2928_v27 = vpop.permute.xlu0 %457  ;;  %v1100_v14 = vsel %vm246_vm0, %v1098_v38, %v1099_v33 }
  0xf1   :  { %4806 = vst [vmem:[#allocation41_spill] sm:$0xff] %v2926_v22  ;;  %4807 = vst [vmem:[#allocation42_spill] sm:$0xff] %v2928_v27  ;;  %v1124_v27 = vmul.f32 %v1121_v49, %v2805_v62 }
  0xf2   :  { %1074 = vrot.lane.b32.xlu1 %v1067_v52, %s2561_s0  ;;  %1072 = vrot.lane.b32.xlu0 %v1068_v16, %s2561_s0  ;;  %v1123_v52 = vmul.f32 %v1121_v49, %v2791_v3  ;;  %v1101_v16 = vrot.slane %v1092_v40, 1  ;;  %v1153_v40 = vstv %s2451_s27  ;;  %s3493_s27 = sld [smem:[#allocation5 + $0x42]] }
  0xf4   :  { %v2935_v50 = vpop.permute.xlu1 %487  ;;  %v2937_v51 = vpop.permute.xlu0 %485 }
  0xf5   :  { %4808 = vst [vmem:[#allocation43_spill] sm:$0xff] %v2935_v50  ;;  %4809 = vst [vmem:[#allocation44_spill] sm:$0xff] %v2937_v51  ;;  %v1131_v51 = vrot.slane %v1123_v52, 1  ;;  %v1125_v50 = vmul.f32 %v1121_v49, %v2803_v61 }
  0xf6   :  { %1078 = vrot.lane.b32.xlu1 %v1070_v11, %s2561_s0  ;;  %1076 = vrot.lane.b32.xlu0 %v1071_v32, %s2561_s0  ;;  %v1130_v11 = vrot.slane %v1122_v59, 1  ;;  %v1103_v32 = vsel %vm246_vm0, %v1101_v16, %v1102_v15  ;;  %v1133_v59 = vrot.slane %v1124_v27, 1  ;;  %v1154_v16 = vmul.f32 %v1153_v40, %v2793_v56 }
  0xf7   :  { %v1134_v52 = vrot.slane %v1125_v50, 1 }
  0xf8   :  { %v2944_v19 = vpop.permute.xlu1 %491  ;;  %v2946_v60 = vpop.permute.xlu0 %489  ;;  %v1162_v27 = vrot.slane %v1154_v16, 1 }
  0xf9   :  { %4810 = vst [vmem:[#allocation45_spill] sm:$0xff] %v2944_v19  ;;  %4811 = vst [vmem:[#allocation46_spill] sm:$0xff] %v2946_v60 }
  0xfa   :  { %1106 = vrot.lane.b32.xlu1 %v1099_v33, %s2561_s0  ;;  %1104 = vrot.lane.b32.xlu0 %v1100_v14, %s2561_s0  ;;  %v1132_v33 = vsel %vm246_vm0, %v1130_v11, %v1131_v51  ;;  %v1155_v14 = vmul.f32 %v1153_v40, %v2791_v3  ;;  %v1135_v11 = vsel %vm246_vm0, %v1133_v59, %v1134_v52 }
  0xfc   :  { %v2953_v38 = vpop.permute.xlu1 %592  ;;  %v2955_v39 = vpop.permute.xlu0 %590  ;;  %v1163_v50 = vrot.slane %v1155_v14, 1 }
  0xfd   :  { %4812 = vst [vmem:[#allocation47_spill] sm:$0xff] %v2953_v38  ;;  %4813 = vst [vmem:[#allocation48_spill] sm:$0xff] %v2955_v39  ;;  %v1185_v39 = vstv %s2452_s28  ;;  %s3568_s28 = sld [smem:[#allocation5 + $0x16]] }
  0xfe   :  { %1110 = vrot.lane.b32.xlu1 %v1102_v15, %s2561_s0  ;;  %1108 = vrot.lane.b32.xlu0 %v1103_v32, %s2561_s0  ;;  %v1157_v15 = vmul.f32 %v1153_v40, %v2803_v61  ;;  %v1156_v32 = vmul.f32 %v1153_v40, %v2805_v62  ;;  %v1164_v40 = vsel %vm246_vm0, %v1162_v27, %v1163_v50 }
  0xff   :  { %v1186_v59 = vmul.f32 %v1185_v39, %v2793_v56 }
 0x100   :  { %v2962_v60 = vpop.permute.xlu1 %596  ;;  %v2964_v49 = vpop.permute.xlu0 %594 }
 0x101   :  { %4814 = vst [vmem:[#allocation49_spill] sm:$0xff] %v2962_v60  ;;  %4815 = vst [vmem:[#allocation50_spill] sm:$0xff] %v2964_v49  ;;  %v1187_v49 = vmul.f32 %v1185_v39, %v2791_v3 }
 0x102   :  { %1138 = vrot.lane.b32.xlu1 %v1131_v51, %s2562_s4  ;;  %1136 = vrot.lane.b32.xlu0 %v1132_v33, %s2562_s4  ;;  %v1166_v51 = vrot.slane %v1157_v15, 1  ;;  %v1165_v33 = vrot.slane %v1156_v32, 1  ;;  %v1189_v15 = vmul.f32 %v1185_v39, %v2803_v61  ;;  %v1188_v32 = vmul.f32 %v1185_v39, %v2805_v62 }
 0x104   :  { %v2971_v38 = vpop.permute.xlu1 %624  ;;  %v2973_v19 = vpop.permute.xlu0 %622 }
 0x105   :  { %4816 = vst [vmem:[#allocation51_spill] sm:$0xff] %v2971_v38  ;;  %4817 = vst [vmem:[#allocation52_spill] sm:$0xff] %v2973_v19  ;;  %v1195_v19 = vrot.slane %v1187_v49, 1  ;;  %v1289_v38 = vstv %s2456_s29  ;;  %s3592_s29 = sld [smem:[#allocation5 + $0x31]] }
 0x106   :  { %1142 = vrot.lane.b32.xlu1 %v1134_v52, %s2562_s4  ;;  %1140 = vrot.lane.b32.xlu0 %v1135_v11, %s2562_s4  ;;  %v1167_v52 = vsel %vm246_vm0, %v1165_v33, %v1166_v51  ;;  %v1194_v11 = vrot.slane %v1186_v59, 1  ;;  %v1290_v33 = vmul.f32 %v1289_v38, %v2793_v56  ;;  %v1197_v59 = vrot.slane %v1188_v32, 1 }
 0x107   :  { %v1321_v32 = vstv %s2457_s30  ;;  %s3619_s30 = sld [smem:[#allocation5 + $0xf]] }
 0x108   :  { %v2980_v14 = vpop.permute.xlu1 %628  ;;  %v2982_v16 = vpop.permute.xlu0 %626  ;;  %v1196_v49 = vsel %vm246_vm0, %v1194_v11, %v1195_v19 }
 0x109   :  { %4818 = vst [vmem:[#allocation53_spill] sm:$0xff] %v2980_v14  ;;  %4819 = vst [vmem:[#allocation54_spill] sm:$0xff] %v2982_v16  ;;  %v1292_v14 = vmul.f32 %v1289_v38, %v2805_v62 }
 0x10a   :  { %1170 = vrot.lane.b32.xlu1 %v1163_v50, %s2562_s4  ;;  %1168 = vrot.lane.b32.xlu0 %v1164_v40, %s2562_s4  ;;  %v1291_v50 = vmul.f32 %v1289_v38, %v2791_v3  ;;  %v1198_v40 = vrot.slane %v1189_v15, 1 }
 0x10c   :  { %v2989_v27 = vpop.permute.xlu1 %656  ;;  %v2991_v60 = vpop.permute.xlu0 %654 }
 0x10d   :  { %4820 = vst [vmem:[#allocation55_spill] sm:$0xff] %v2989_v27  ;;  %4821 = vst [vmem:[#allocation56_spill] sm:$0xff] %v2991_v60  ;;  %v1299_v60 = vrot.slane %v1291_v50, 2  ;;  %v1293_v27 = vmul.f32 %v1289_v38, %v2803_v61 }
 0x10e   :  { %1174 = vrot.lane.b32.xlu1 %v1166_v51, %s2562_s4  ;;  %1172 = vrot.lane.b32.xlu0 %v1167_v52, %s2562_s4  ;;  %v1298_v51 = vrot.slane %v1290_v33, 2  ;;  %v1199_v52 = vsel %vm246_vm0, %v1197_v59, %v1198_v40  ;;  %v1301_v33 = vrot.slane %v1292_v14, 2  ;;  %v1322_v59 = vmul.f32 %v1321_v32, %v2793_v56 }
 0x10f   :  { %v1302_v50 = vrot.slane %v1293_v27, 2 }
 0x110   :  { %v2998_v16 = vpop.permute.xlu1 %660  ;;  %v3000_v39 = vpop.permute.xlu0 %658  ;;  %v1330_v14 = vrot.slane %v1322_v59, 2 }
 0x111   :  { %4822 = vst [vmem:[#allocation57_spill] sm:$0xff] %v2998_v16  ;;  %4823 = vst [vmem:[#allocation58_spill] sm:$0xff] %v3000_v39  ;;  %v1353_v16 = vstv %s2458_s3  ;;  %s3637_s3 = sld [smem:[#allocation5 + $0x4c]] }
 0x112   :  { %1202 = vrot.lane.b32.xlu1 %v1195_v19, %s2562_s4  ;;  %1200 = vrot.lane.b32.xlu0 %v1196_v49, %s2562_s4  ;;  %v1300_v19 = vsel %vm511_vm1, %v1298_v51, %v1299_v60  ;;  %v1323_v49 = vmul.f32 %v1321_v32, %v2791_v3  ;;  %v1303_v51 = vsel %vm511_vm1, %v1301_v33, %v1302_v50 }
 0x113   :  { %v1354_v33 = vmul.f32 %v1353_v16, %v2793_v56 }
 0x114   :  { %v3007_v11 = vpop.permute.xlu1 %688  ;;  %v3009_v15 = vpop.permute.xlu0 %686  ;;  %v1331_v27 = vrot.slane %v1323_v49, 2 }
 0x115   :  { %4824 = vst [vmem:[#allocation59_spill] sm:$0xff] %v3007_v11  ;;  %4825 = vst [vmem:[#allocation60_spill] sm:$0xff] %v3009_v15 }
 0x116   :  { %1206 = vrot.lane.b32.xlu1 %v1198_v40, %s2562_s4  ;;  %1204 = vrot.lane.b32.xlu0 %v1199_v52, %s2562_s4  ;;  %v1325_v40 = vmul.f32 %v1321_v32, %v2803_v61  ;;  %v1324_v52 = vmul.f32 %v1321_v32, %v2805_v62  ;;  %v1332_v32 = vsel %vm511_vm1, %v1330_v14, %v1331_v27 }
 0x118   :  { %v3016_v39 = vpop.permute.xlu1 %692  ;;  %v3018_v38 = vpop.permute.xlu0 %690 }
 0x119   :  { %4826 = vst [vmem:[#allocation61_spill] sm:$0xff] %v3016_v39  ;;  %4827 = vst [vmem:[#allocation62_spill] sm:$0xff] %v3018_v38  ;;  %v1355_v38 = vmul.f32 %v1353_v16, %v2791_v3 }
 0x11a   :  { %1306 = vrot.lane.b32.xlu1 %v1299_v60, %s2561_s0  ;;  %1304 = vrot.lane.b32.xlu0 %v1300_v19, %s2561_s0  ;;  %v1334_v60 = vrot.slane %v1325_v40, 2  ;;  %v1333_v19 = vrot.slane %v1324_v52, 2  ;;  %v1357_v40 = vmul.f32 %v1353_v16, %v2803_v61  ;;  %v1356_v52 = vmul.f32 %v1353_v16, %v2805_v62 }
 0x11c   :  { %v3025_v15 = vpop.permute.xlu1 %720  ;;  %v3027_v11 = vpop.permute.xlu0 %718 }
 0x11d   :  { %4828 = vst [vmem:[#allocation63_spill] sm:$0xff] %v3025_v15  ;;  %4829 = vst [vmem:[#allocation64_spill] sm:$0xff] %v3027_v11  ;;  %v1363_v11 = vrot.slane %v1355_v38, 2  ;;  %v1385_v15 = vstv %s2459_s5  ;;  %s3745_s5 = sld [smem:[#allocation5 + $0x2a]] }
 0x11e   :  { %1310 = vrot.lane.b32.xlu1 %v1302_v50, %s2561_s0  ;;  %1308 = vrot.lane.b32.xlu0 %v1303_v51, %s2561_s0  ;;  %v1335_v50 = vsel %vm511_vm1, %v1333_v19, %v1334_v60  ;;  %v1362_v51 = vrot.slane %v1354_v33, 2  ;;  %v1386_v19 = vmul.f32 %v1385_v15, %v2793_v56  ;;  %v1365_v33 = vrot.slane %v1356_v52, 2 }
 0x11f   :  { %v1417_v52 = vstv %s2460_s6  ;;  %s3764_s6 = sld [smem:[#allocation5 + $0x45]] }
 0x120   :  { %v3034_v49 = vpop.permute.xlu1 %724  ;;  %v3036_v59 = vpop.permute.xlu0 %722  ;;  %v1364_v38 = vsel %vm511_vm1, %v1362_v51, %v1363_v11 }
 0x121   :  { %4830 = vst [vmem:[#allocation65_spill] sm:$0xff] %v3034_v49  ;;  %4831 = vst [vmem:[#allocation66_spill] sm:$0xff] %v3036_v59  ;;  %v1388_v49 = vmul.f32 %v1385_v15, %v2805_v62 }
 0x122   :  { %1338 = vrot.lane.b32.xlu1 %v1331_v27, %s2561_s0  ;;  %1336 = vrot.lane.b32.xlu0 %v1332_v32, %s2561_s0  ;;  %v1387_v27 = vmul.f32 %v1385_v15, %v2791_v3  ;;  %v1366_v32 = vrot.slane %v1357_v40, 2 }
 0x124   :  { %v3043_v14 = vpop.permute.xlu1 %752  ;;  %v3045_v39 = vpop.permute.xlu0 %750 }
 0x125   :  { %4832 = vst [vmem:[#allocation67_spill] sm:$0xff] %v3043_v14  ;;  %4833 = vst [vmem:[#allocation68_spill] sm:$0xff] %v3045_v39  ;;  %v1395_v39 = vrot.slane %v1387_v27, 2  ;;  %v1389_v14 = vmul.f32 %v1385_v15, %v2803_v61 }
 0x126   :  { %1342 = vrot.lane.b32.xlu1 %v1334_v60, %s2561_s0  ;;  %1340 = vrot.lane.b32.xlu0 %v1335_v50, %s2561_s0  ;;  %v1394_v60 = vrot.slane %v1386_v19, 2  ;;  %v1367_v50 = vsel %vm511_vm1, %v1365_v33, %v1366_v32  ;;  %v1397_v19 = vrot.slane %v1388_v49, 2  ;;  %v1418_v33 = vmul.f32 %v1417_v52, %v2793_v56 }
 0x127   :  { %v1398_v27 = vrot.slane %v1389_v14, 2  ;;  %v1421_v14 = vmul.f32 %v1417_v52, %v2803_v61 }
 0x128   :  { %v3052_v59 = vpop.permute.xlu1 %756  ;;  %v3054_v16 = vpop.permute.xlu0 %754 }
 0x129   :  { %4834 = vst [vmem:[#allocation69_spill] sm:$0xff] %v3052_v59  ;;  %4835 = vst [vmem:[#allocation70_spill] sm:$0xff] %v3054_v16  ;;  %v3111_v59 = vld [vmem:[#allocation2 + $0x30] sm:$0xff] }
 0x12a   :  { %1370 = vrot.lane.b32.xlu1 %v1363_v11, %s2561_s0  ;;  %1368 = vrot.lane.b32.xlu0 %v1364_v38, %s2561_s0  ;;  %v1396_v11 = vsel %vm511_vm1, %v1394_v60, %v1395_v39  ;;  %v1419_v38 = vmul.f32 %v1417_v52, %v2791_v3  ;;  %v3200_v41 = vmul.f32 %v3111_v59, %v262_v7 }
 0x12b   :  { %v505_v17 = vmul.f32 %v3111_v59, %v502_v12 }
 0x12c   :  { %v3061_v51 = vpop.permute.xlu1 %808  ;;  %v3063_v40 = vpop.permute.xlu0 %806  ;;  %v274_v13 = vrot.slane %v3200_v41, 1 }
 0x12d   :  { %4836 = vst [vmem:[#allocation71_spill] sm:$0xff] %v3061_v51  ;;  %4837 = vst [vmem:[#allocation72_spill] sm:$0xff] %v3063_v40  ;;  %v1427_v40 = vrot.slane %v1419_v38, 2  ;;  %v1449_v51 = vstv %s2461_s7  ;;  %s3810_s7 = sld [smem:[#allocation5 + $0x17]] }
 0x12e   :  { %1374 = vrot.lane.b32.xlu1 %v1366_v32, %s2561_s0  ;;  %1372 = vrot.lane.b32.xlu0 %v1367_v50, %s2561_s0  ;;  %v1399_v32 = vsel %vm511_vm1, %v1397_v19, %v1398_v27  ;;  %v1426_v50 = vrot.slane %v1418_v33, 2  ;;  %v1420_v19 = vmul.f32 %v1417_v52, %v2805_v62 }
 0x130   :  { %v3070_v16 = vpop.permute.xlu1 %812  ;;  %v3072_v15 = vpop.permute.xlu0 %810 }
 0x131   :  { %4838 = vst [vmem:[#allocation73_spill] sm:$0xff] %v3070_v16  ;;  %4839 = vst [vmem:[#allocation74_spill] sm:$0xff] %v3072_v15  ;;  %v1452_v15 = vmul.f32 %v1449_v51, %v2805_v62 }
 0x132   :  { %1402 = vrot.lane.b32.xlu1 %v1395_v39, %s2562_s4  ;;  %1400 = vrot.lane.b32.xlu0 %v1396_v11, %s2562_s4  ;;  %v1451_v39 = vmul.f32 %v1449_v51, %v2791_v3  ;;  %v1428_v11 = vsel %vm511_vm1, %v1426_v50, %v1427_v40  ;;  %v1450_v50 = vmul.f32 %v1449_v51, %v2793_v56 }
 0x134   :  { %v3077_v60 = vpop.permute.xlu1 %834  ;;  %v3079_v49 = vpop.permute.xlu0 %832  ;;  %v1458_v16 = vrot.slane %v1450_v50, 2 }
 0x135   :  { %4840 = vst [vmem:[#allocation75_spill] sm:$0xff] %v3077_v60  ;;  %4841 = vst [vmem:[#allocation76_spill] sm:$0xff] %v3079_v49  ;;  %v1453_v49 = vmul.f32 %v1449_v51, %v2803_v61  ;;  %v1429_v60 = vrot.slane %v1420_v19, 2  ;;  %v1461_v51 = vrot.slane %v1452_v15, 2  ;;  %v3126_v15 = vld [vmem:[#allocation2 + $0x8] sm:$0xff] }
 0x136   :  { %1406 = vrot.lane.b32.xlu1 %v1398_v27, %s2562_s4  ;;  %1404 = vrot.lane.b32.xlu0 %v1399_v32, %s2562_s4  ;;  %v1459_v27 = vrot.slane %v1451_v39, 2  ;;  %v1430_v32 = vrot.slane %v1421_v14, 2  ;;  %v237_v14 = vstv %s2417_s11  ;;  %v3181_v47 = vmul.f32 %v3126_v15, %v262_v7  ;;  %s3989_s11 = sld [smem:[#allocation5 + $0x12]] }
 0x137   :  { %v1462_v39 = vrot.slane %v1453_v49, 2  ;;  %v3175_v48 = vmul.f32 %v3121_v6, %v237_v14 }
 0x138   :  { %v3087_v38 = vpop.permute.xlu1 %838  ;;  %v3089_v33 = vpop.permute.xlu0 %836  ;;  %v1431_v19 = vsel %vm511_vm1, %v1429_v60, %v1430_v32 }
 0x139   :  { %4842 = vst [vmem:[#allocation77_spill] sm:$0xff] %v3087_v38  ;;  %4843 = vst [vmem:[#allocation78_spill] sm:$0xff] %v3089_v33  ;;  %v61_v38 = vstv %s2409_s9  ;;  %v1463_v0 = vsel %vm511_vm1, %v1461_v51, %v1462_v39  ;;  %s3883_s9 = sld [smem:[#allocation5 + $0x4d]] }
 0x13a   :  { %1434 = vrot.lane.b32.xlu1 %v1427_v40, %s2562_s4  ;;  %1432 = vrot.lane.b32.xlu0 %v1428_v11, %s2562_s4  ;;  %v51_v40 = vstv %s50_s8  ;;  %v71_v11 = vstv %s2410_s10  ;;  %v3136_v5 = vmul.f32 %v3126_v15, %v61_v38  ;;  %v3142_v10 = vmul.f32 %v3121_v6, %v61_v38  ;;  %s3845_s8 = sld [smem:[#allocation5 + $0x32]]  ;;  %s3973_s10 = sld [smem:[#allocation5 + $0x19]] }
 0x13b   :  { %v3124_v49 = vmul.f32 %v3121_v6, %v51_v40  ;;  %v3129_v60 = vmul.f32 %v3126_v15, %v51_v40  ;;  %v3203_v37 = vmul.f32 %v3121_v6, %v71_v11  ;;  %v3212_v34 = vmul.f32 %v3111_v59, %v71_v11 }
 0x13c   :  { %v3102_v52 = vpop.permute.xlu1 %860  ;;  %v3104_v33 = vpop.permute.xlu0 %858 }
 0x13d   :  { %4844 = vst [vmem:[#allocation79_spill] sm:$0xff] %v3102_v52  ;;  %4845 = vst [vmem:[#allocation80_spill] sm:$0xff] %v3104_v33  ;;  %v3114_v33 = vmul.f32 %v3111_v59, %v51_v40  ;;  %v3116_v52 = vld [vmem:[#allocation2] sm:$0xff] }
 0x13e   :  { %1466 = vrot.lane.b32.xlu1 %v1459_v27, %s2562_s4  ;;  %1438 = vrot.lane.b32.xlu0 %v1430_v32, %s2562_s4  ;;  %v3119_v22 = vmul.f32 %v3116_v52, %v51_v40  ;;  %v3139_v46 = vmul.f32 %v3116_v52, %v61_v38  ;;  %v3148_v40 = vmul.f32 %v3111_v59, %v61_v38 }
 0x13f   :  { %v3161_v55 = vmul.f32 %v3116_v52, %v237_v14  ;;  %v1460_v38 = vsel %vm511_vm1, %v1458_v16, %v1459_v27  ;;  %v3191_v51 = vmul.f32 %v3116_v52, %v71_v11  ;;  %v3194_v42 = vmul.f32 %v3116_v52, %v262_v7  ;;  %4854 = vst [vmem:[#allocation89_spill] sm:$0xff] %v3203_v37 }
 0x140   :  { %v3131_v32 = vpop.permute.xlu1 %864  ;;  %v3133_v50 = vpop.permute.xlu0 %862  ;;  %4855 = vst [vmem:[#allocation90_spill] sm:$0xff] %v3212_v34  ;;  %v552_v8 = vmul.f32 %v3116_v52, %v551_v9 }
 0x141   :  { %4846 = vst [vmem:[#allocation81_spill] sm:$0xff] %v3131_v32  ;;  %4847 = vst [vmem:[#allocation82_spill] sm:$0xff] %v3133_v50  ;;  %v3151_v32 = vmul.f32 %v3126_v15, %v71_v11  ;;  %v3154_v50 = vmul.f32 %v3126_v15, %v237_v14 }
 0x142   :  { %1436 = vrot.lane.b32.xlu1 %v1431_v19, %s2562_s4  ;;  %1470 = vrot.lane.b32.xlu0 %v1462_v39, %s2562_s4  ;;  %v3178_v19 = vmul.f32 %v3111_v59, %v237_v14  ;;  %v286_v39 = vstv %s3100_s14  ;;  %4853 = vst [vmem:[#allocation88_spill] sm:$0xff] %v3191_v51  ;;  %v3197_v14 = vmul.f32 %v3121_v6, %v262_v7  ;;  %s4040_s14 = sld [smem:[#allocation5 + $0x2d]] }
 0x143   :  { %4848 = vst [vmem:[#allocation83_spill] sm:$0xff] %v3151_v32  ;;  %v3216_v31 = vmul.f32 %v3126_v15, %v286_v39  ;;  %v1539_v7 = vmul.f32 %v3219_v30, %v3170_v25  ;;  %v3245_v24 = vmul.f32 %v3121_v6, %v286_v39  ;;  %v289_v41 = vmul.f32 %v3111_v59, %v286_v39 }
 0x144   :  { %v3186_v16 = vpop.permute.xlu1 %886  ;;  %v3188_v27 = vpop.permute.xlu0 %884  ;;  %v4868_v58 = vrot.slane %v3197_v14, 1 }
 0x145   :  { %4851 = vst [vmem:[#allocation86_spill] sm:$0xff] %v3186_v16  ;;  %4852 = vst [vmem:[#allocation87_spill] sm:$0xff] %v3188_v27  ;;  %v1515_v27 = vmul.f32 %v3168_v26, %v3165_v45  ;;  %v1513_v16 = vmul.f32 %v3168_v26, %v3170_v25  ;;  %v298_v63 = vrot.slane %v289_v41, 1  ;;  %v1514_v41 = vmul.f32 %v3168_v26, %v3291_v2 }
 0x146   :  { %1468 = vrot.lane.b32.xlu1 %v1463_v0, %s2562_s4  ;;  %1464 = vrot.lane.b32.xlu0 %v1460_v38, %s2562_s4  ;;  %v3234_v0 = vmul.f32 %v3116_v52, %v286_v39  ;;  %v527_v38 = vstv %s3156_s17  ;;  %s4212_s17 = sld [smem:[#allocation5 + $0x35]] }
 0x147   :  { %v3265_v53 = vmul.f32 %v3126_v15, %v527_v38  ;;  %v528_v39 = vmul.f32 %v3116_v52, %v527_v38  ;;  %v3269_v37 = vmul.f32 %v3121_v6, %v527_v38  ;;  %v530_v51 = vmul.f32 %v3111_v59, %v527_v38 }
 0x148   :  { %v3225_v18 = vpop.permute.xlu1 %890  ;;  %v3227_v11 = vpop.permute.xlu0 %888  ;;  %v295_v1 = vrot.slane %v3234_v0, 1  ;;  %v3288_v0 = vmul.f32 %v3121_v6, %v551_v9  ;;  %v554_v38 = vmul.f32 %v3111_v59, %v551_v9  ;;  %v4864_v59 = vrot.slane %v3175_v48, 1 }
 0x149   :  { %4856 = vst [vmem:[#allocation91_spill] sm:$0xff] %v3225_v18  ;;  %4857 = vst [vmem:[#allocation92_spill] sm:$0xff] %v3227_v11  ;;  %v3249_v11 = vstv %s3172_s18  ;;  %v3252_v18 = vmul.f32 %v3126_v15, %v502_v12  ;;  %s4250_s18 = sld [smem:[#allocation5 + $0x50]] }
 0x14a   :  { %1526 = vrot.lane.b32.xlu1 %v1515_v27, %s2561_s0  ;;  %1522 = vrot.lane.b32.xlu0 %v1513_v16, %s2561_s0  ;;  %v503_v16 = vmul.f32 %v3116_v52, %v502_v12  ;;  %v3256_v27 = vmul.f32 %v3121_v6, %v502_v12  ;;  %v1567_v12 = vmul.f32 %v3249_v11, %v3165_v45  ;;  %v515_v6 = vrot.slane %v505_v17, 2 }
 0x14b   :  { %v539_v45 = vrot.slane %v530_v51, 2  ;;  %v563_v52 = vrot.slane %v554_v38, 2  ;;  %v4862_v51 = vrot.slane %v3154_v50, 1  ;;  %v4867_v38 = vrot.slane %v3194_v42, 1 }
 0x14c   :  { %v3259_v54 = vpop.permute.xlu1 %912  ;;  %v3261_v34 = vpop.permute.xlu0 %910  ;;  %v512_v4 = vrot.slane %v503_v16, 2 }
 0x14d   :  { %4858 = vst [vmem:[#allocation93_spill] sm:$0xff] %v3259_v54  ;;  %4859 = vst [vmem:[#allocation94_spill] sm:$0xff] %v3261_v34  ;;  %v1565_v34 = vmul.f32 %v3249_v11, %v3170_v25  ;;  %v3284_v54 = vmul.f32 %v3126_v15, %v551_v9  ;;  %v536_v9 = vrot.slane %v528_v39, 2  ;;  %v560_v39 = vrot.slane %v552_v8, 2 }
 0x14e   :  { %1552 = vrot.lane.b32.xlu1 %v1541_v23, %s2561_s0  ;;  %1548 = vrot.lane.b32.xlu0 %v1539_v7, %s2561_s0  ;;  %v3293_v23 = vld [vmem:[#allocation2 + $0x20] sm:$0xff]  ;;  %v4762_v7 = vrot.slane %v3245_v24, 1  ;;  %v4866_v8 = vrot.slane %v3181_v47, 1 }
 0x14f   :  { %v1512_v16 = vmul.f32 %v3168_v26, %v3293_v23  ;;  %v4865_v26 = vrot.slane %v3178_v19, 1  ;;  %v4871_v19 = vrot.slane %v3216_v31, 1 }
 0x150   :  { %v3297_v32 = vpop.permute.xlu1 %916  ;;  %v3299_v15 = vpop.permute.xlu0 %914  ;;  %v3335_v25 = vsel %vm246_vm0, %v4867_v38, %v4866_v8  ;;  %v3354_v42 = vsel %vm246_vm0, %v298_v63, %v4762_v7  ;;  %v1538_v63 = vmul.f32 %v3219_v30, %v3293_v23 }
 0x151   :  { %4860 = vst [vmem:[#allocation95_spill] sm:$0xff] %v3297_v32  ;;  %4861 = vst [vmem:[#allocation96_spill] sm:$0xff] %v3299_v15  ;;  %v3328_v17 = vsel %vm246_vm0, %v4865_v26, %v4864_v59  ;;  %v3349_v59 = vsel %vm246_vm0, %v295_v1, %v4871_v19  ;;  %v4872_v26 = vrot.slane %v3252_v18, 2  ;;  %v1540_v1 = vmul.f32 %v3219_v30, %v3291_v2 }
 0x152   :  { %1578 = vrot.lane.b32.xlu1 %v1567_v12, %s2561_s0  ;;  %1574 = vrot.lane.b32.xlu0 %v1565_v34, %s2561_s0  ;;  %v4863_v34 = vrot.slane %v3161_v55, 1  ;;  %v3340_v55 = vsel %vm246_vm0, %v274_v13, %v4868_v58  ;;  %v767_v58 = vstv %s3271_s20  ;;  %v4873_v13 = vrot.slane %v3256_v27, 2  ;;  %s2473_s20 = sld [smem:[#allocation5 + $0x4b]] }
 0x153   :  { %v3359_v8 = vsel %vm511_vm1, %v512_v4, %v4872_v26  ;;  %v4874_v4 = vrot.slane %v3265_v53, 2  ;;  %v787_v15 = vstv %s3303_s1  ;;  %v3439_v32 = vstv %s3314_s22  ;;  %s2482_s1 = sld [smem:[#allocation5 + $0x4e]]  ;;  %s2491_s22 = sld [smem:[#allocation5 + $0x52]] }
 0x154   :  { %v3321_v12 = vsel %vm246_vm0, %v4863_v34, %v4862_v51  ;;  %v3342_v51 = vpop.permute.xlu1 %938  ;;  %v3344_v34 = vpop.permute.xlu0 %936  ;;  %v3365_v38 = vsel %vm511_vm1, %v515_v6, %v4873_v13  ;;  %v4875_v6 = vrot.slane %v3269_v37, 2  ;;  %v4877_v13 = vrot.slane %v3288_v0, 2 }
 0x155   :  { %4869 = vst [vmem:[#allocation97_spill] sm:$0xff] %v3342_v51  ;;  %4870 = vst [vmem:[#allocation98_spill] sm:$0xff] %v3344_v34  ;;  %v777_v34 = vstv %s3275_s21  ;;  %v3377_v19 = vsel %vm511_vm1, %v536_v9, %v4874_v4  ;;  %v3397_v9 = vmul.f32 %v767_v58, %v2791_v3  ;;  %v3400_v4 = vmul.f32 %v767_v58, %v2793_v56  ;;  %v4897_v51 = vld [vmem:[#allocation15_spill] sm:$0xff]  ;;  %s2481_s21 = sld [smem:[#allocation5 + $0x33]] }
 0x156   :  { %1524 = vrot.lane.b32.xlu1 %v1514_v41, %s2561_s0  ;;  %1520 = vrot.lane.b32.xlu0 %v1512_v16, %s2561_s0  ;;  %v3382_v26 = vsel %vm511_vm1, %v539_v45, %v4875_v6  ;;  %v4876_v41 = vrot.slane %v3284_v54, 2  ;;  %v3392_v30 = vsel %vm511_vm1, %v563_v52, %v4877_v13  ;;  %v3403_v45 = vmul.f32 %v767_v58, %v2803_v61 }
 0x157   :  { %v3406_v6 = vmul.f32 %v767_v58, %v2805_v62  ;;  %v104_v52 = vadd.f32 %v2741_v20, %v3114_v33  ;;  %v102_v13 = vadd.f32 %v2743_v21, %v3119_v22  ;;  %v3419_v7 = vmul.f32 %v777_v34, %v2791_v3 }
 0x158   :  { %v3387_v16 = vsel %vm511_vm1, %v560_v39, %v4876_v41  ;;  %v3408_v39 = vpop.permute.xlu1 %942  ;;  %v3410_v41 = vpop.permute.xlu0 %940  ;;  %v3423_v58 = vmul.f32 %v777_v34, %v2793_v56  ;;  %v1564_v20 = vmul.f32 %v3249_v11, %v3293_v23  ;;  %v105_v21 = vadd.f32 %v2750_v28, %v3124_v49 }
 0x159   :  { %4878 = vst [vmem:[#allocation99_spill] sm:$0xff] %v3408_v39  ;;  %4879 = vst [vmem:[#allocation100_spill] sm:$0xff] %v3410_v41  ;;  %v1566_v41 = vmul.f32 %v3249_v11, %v3291_v2  ;;  %v103_v22 = vadd.f32 %v2752_v29, %v3129_v60  ;;  %v3436_v33 = vmul.f32 %v777_v34, %v2803_v61  ;;  %v3483_v39 = vstv %s3394_s23  ;;  %s2489_s23 = sld [smem:[#allocation5 + $0x51]] }
 0x15a   :  { %4880 = vst [vmem:[#allocation101_spill] sm:$0xff] %v3419_v7  ;;  %4881 = vst [vmem:[#allocation102_spill] sm:$0xff] %v3423_v58  ;;  %1550 = vrot.lane.b32.xlu1 %v1540_v1, %s2561_s0  ;;  %1546 = vrot.lane.b32.xlu0 %v1538_v63, %s2561_s0  ;;  %v129_v1 = vadd.f32 %v2759_v35, %v3136_v5  ;;  %v128_v63 = vadd.f32 %v2761_v36, %v3139_v46  ;;  %v4889_v5 = vld [vmem:[#allocation84_spill] sm:$0xff] }
 0x15b   :  { %4882 = vst [vmem:[#allocation103_spill] sm:$0xff] %v3436_v33  ;;  %v3448_v11 = vmul.f32 %v777_v34, %v2805_v62  ;;  %v3451_v28 = vmul.f32 %v787_v15, %v2791_v3  ;;  %v131_v60 = vadd.f32 %v2768_v43, %v3142_v10  ;;  %v130_v35 = vadd.f32 %v2770_v44, %v3148_v40  ;;  %v4890_v10 = vld [vmem:[#allocation85_spill] sm:$0xff]  ;;  %v4891_v40 = vld [vmem:[#allocation83_spill] sm:$0xff] }
 0x15c   :  { %v3453_v29 = vpop.permute.xlu1 %1042  ;;  %v3455_v49 = vpop.permute.xlu0 %1040  ;;  %v3462_v36 = vmul.f32 %v787_v15, %v2793_v56  ;;  %v3465_v46 = vmul.f32 %v787_v15, %v2803_v61  ;;  %v181_v3 = vadd.f32 %v2795_v57, %v103_v22  ;;  %v1593_v43 = vmul.f32 %v3439_v32, %v4889_v5  ;;  %v4892_v56 = vld [vmem:[#allocation8_spill] sm:$0xff]  ;;  %v4895_v57 = vld [vmem:[#allocation13_spill] sm:$0xff]  ;;  %v4896_v22 = vld [vmem:[#allocation14_spill] sm:$0xff] }
 0x15d   :  { %4883 = vst [vmem:[#allocation104_spill] sm:$0xff] %v3448_v11  ;;  %4884 = vst [vmem:[#allocation105_spill] sm:$0xff] %v3451_v28  ;;  %v1591_v44 = vmul.f32 %v3439_v32, %v4890_v10  ;;  %v155_v34 = vadd.f32 %v4892_v56, %v4891_v40  ;;  %v4903_v40 = vld [vmem:[#allocation10_spill] sm:$0xff] }
 0x15e   :  { %4885 = vst [vmem:[#allocation106_spill] sm:$0xff] %v3453_v29  ;;  %4886 = vst [vmem:[#allocation107_spill] sm:$0xff] %v3455_v49  ;;  %1576 = vrot.lane.b32.xlu1 %v1566_v41, %s2561_s0  ;;  %1572 = vrot.lane.b32.xlu0 %v1564_v20, %s2561_s0  ;;  %v4893_v49 = vld [vmem:[#allocation12_spill] sm:$0xff]  ;;  %v3480_v29 = vmul.f32 %v787_v15, %v2805_v62  ;;  %v183_v41 = vadd.f32 %v4895_v57, %v105_v21  ;;  %v4902_v15 = vld [vmem:[#allocation89_spill] sm:$0xff] }
 0x15f   :  { %4887 = vst [vmem:[#allocation108_spill] sm:$0xff] %v3462_v36  ;;  %4888 = vst [vmem:[#allocation109_spill] sm:$0xff] %v3465_v46  ;;  %v180_v61 = vadd.f32 %v4893_v49, %v102_v13  ;;  %v182_v20 = vadd.f32 %v4896_v22, %v104_v52  ;;  %v207_v46 = vadd.f32 %v4897_v51, %v129_v1  ;;  %v953_v36 = vstv %s3412_s24  ;;  %v4900_v13 = vld [vmem:[#allocation88_spill] sm:$0xff]  ;;  %v4901_v49 = vld [vmem:[#allocation9_spill] sm:$0xff]  ;;  %s2492_s24 = sld [smem:[#allocation5 + $0x55]] }
 0x160   :  { %4894 = vst [vmem:[#allocation84_spill] sm:$0xff] %v3480_v29  ;;  %v3489_v28 = vpop.permute.xlu1 %1046  ;;  %v3491_v11 = vpop.permute.xlu0 %1044  ;;  %v154_v62 = vadd.f32 %v4901_v49, %v4900_v13  ;;  %v157_v56 = vadd.f32 %v4903_v40, %v4902_v15  ;;  %v4904_v29 = vld [vmem:[#allocation90_spill] sm:$0xff]  ;;  %v4905_v21 = vld [vmem:[#allocation11_spill] sm:$0xff]  ;;  %v4906_v52 = vld [vmem:[#allocation16_spill] sm:$0xff]  ;;  %v4907_v51 = vrot.slane %v3154_v50, 1  ;;  %v1617_v13 = vmul.f32 %v3483_v39, %v4890_v10 }
 0x161   :  { %4898 = vst [vmem:[#allocation85_spill] sm:$0xff] %v3489_v28  ;;  %4899 = vst [vmem:[#allocation83_spill] sm:$0xff] %v3491_v11  ;;  %v156_v57 = vadd.f32 %v4905_v21, %v4904_v29  ;;  %v206_v22 = vadd.f32 %v4906_v52, %v128_v63  ;;  %v1619_v11 = vmul.f32 %v3483_v39, %v4889_v5  ;;  %v4908_v49 = vld [vmem:[#allocation17_spill] sm:$0xff]  ;;  %v3516_v63 = vld [vmem:[#allocation2 + $0x18] sm:$0xff] }
 0x162   :  { %v3504_v1 = vadd.f32 %v4907_v51, %v181_v3  ;;  %1604 = vrot.lane.b32.xlu1 %v1593_v43, %s2562_s4  ;;  %1600 = vrot.lane.b32.xlu0 %v1591_v44, %s2562_s4  ;;  %v209_v15 = vadd.f32 %v4908_v49, %v131_v60  ;;  %v3514_v29 = vadd.f32 %v3321_v12, %v180_v61  ;;  %v3522_v3 = vstv %s3441_s25  ;;  %v3535_v12 = vld [vmem:[#allocation2 + $0x10] sm:$0xff]  ;;  %s2493_s25 = sld [smem:[#allocation5 + $0x53]] }
 0x163   :  { %v3519_v50 = vmul.f32 %v3516_v63, %v953_v36  ;;  %v4910_v43 = vrot.slane %v3175_v48, 1  ;;  %v3529_v40 = vadd.f32 %v3328_v17, %v182_v20  ;;  %v4911_v60 = vrot.slane %v3181_v47, 1  ;;  %v4914_v49 = vld [vmem:[#allocation18_spill] sm:$0xff] }
 0x164   :  { %v954_v61 = vmul.f32 %v3535_v12, %v953_v36  ;;  %v3538_v52 = vpop.permute.xlu1 %1074  ;;  %v3540_v51 = vpop.permute.xlu0 %1072  ;;  %v208_v28 = vadd.f32 %v4914_v49, %v130_v35  ;;  %v3544_v48 = vadd.f32 %v3335_v25, %v206_v22  ;;  %v977_v47 = vstv %s3467_s26  ;;  %v4916_v22 = vld [vmem:[#allocation19_spill] sm:$0xff]  ;;  %s2490_s26 = sld [smem:[#allocation5 + $0x54]] }
 0x165   :  { %4909 = vst [vmem:[#allocation8_spill] sm:$0xff] %v3519_v50  ;;  %v3526_v44 = vadd.f32 %v4910_v43, %v183_v41  ;;  %v3533_v21 = vadd.f32 %v4911_v60, %v207_v46  ;;  %4912 = vst [vmem:[#allocation12_spill] sm:$0xff] %v3538_v52  ;;  %v3546_v41 = vld [vmem:[#allocation2 + $0x48] sm:$0xff]  ;;  %v3552_v46 = vld [vmem:[#allocation2 + $0x40] sm:$0xff]  ;;  %v1645_v35 = vmul.f32 %v3522_v3, %v4889_v5 }
 0x166   :  { %4913 = vst [vmem:[#allocation13_spill] sm:$0xff] %v3540_v51  ;;  %v3549_v17 = vmul.f32 %v3546_v41, %v953_v36  ;;  %v956_v20 = vmul.f32 %v3552_v46, %v953_v36  ;;  %1630 = vrot.lane.b32.xlu1 %v1619_v11, %s2562_s4  ;;  %1626 = vrot.lane.b32.xlu0 %v1617_v13, %s2562_s4  ;;  %v4917_v60 = vld [vmem:[#allocation20_spill] sm:$0xff]  ;;  %v4918_v51 = vrot.slane %v3197_v14, 1  ;;  %v962_v11 = vrot.slane %v954_v61, 1  ;;  %v4923_v14 = vld [vmem:[#allocation22_spill] sm:$0xff] }
 0x167   :  { %v1643_v25 = vmul.f32 %v3522_v3, %v4890_v10  ;;  %v233_v43 = vadd.f32 %v4916_v22, %v155_v34  ;;  %v232_v49 = vadd.f32 %v4917_v60, %v154_v62  ;;  %v3571_v13 = vmul.f32 %v3516_v63, %v977_v47  ;;  %v4922_v62 = vld [vmem:[#allocation21_spill] sm:$0xff] }
 0x168   :  { %4915 = vst [vmem:[#allocation14_spill] sm:$0xff] %v3549_v17  ;;  %v3565_v52 = vadd.f32 %v4918_v51, %v209_v15  ;;  %v978_v33 = vmul.f32 %v3535_v12, %v977_v47  ;;  %v3574_v58 = vpop.permute.xlu1 %1078  ;;  %v3576_v7 = vpop.permute.xlu0 %1076  ;;  %v1001_v34 = vstv %s3493_s27  ;;  %v235_v22 = vadd.f32 %v4922_v62, %v157_v56  ;;  %s4692_s27 = sld [smem:[#allocation5 + $0x56]] }
 0x169   :  { %4919 = vst [vmem:[#allocation15_spill] sm:$0xff] %v3571_v13  ;;  %4920 = vst [vmem:[#allocation88_spill] sm:$0xff] %v3574_v58  ;;  %v234_v15 = vadd.f32 %v4923_v14, %v156_v57  ;;  %v283_v51 = vadd.f32 %v3340_v55, %v208_v28  ;;  %v965_v36 = vrot.slane %v956_v20, 1  ;;  %v3584_v61 = vmul.f32 %v3546_v41, %v977_v47 }
 0x16a   :  { %4921 = vst [vmem:[#allocation9_spill] sm:$0xff] %v3576_v7  ;;  %1656 = vrot.lane.b32.xlu1 %v1645_v35, %s2562_s4  ;;  %1652 = vrot.lane.b32.xlu0 %v1643_v25, %s2562_s4  ;;  %v1592_v7 = vmul.f32 %v3439_v32, %v3291_v2  ;;  %v1590_v56 = vmul.f32 %v3439_v32, %v3293_v23  ;;  %v4925_v55 = vrot.slane %v3216_v31, 1  ;;  %v4926_v62 = vrot.slane %v3519_v50, 1 }
 0x16b   :  { %4924 = vst [vmem:[#allocation89_spill] sm:$0xff] %v3584_v61  ;;  %v980_v57 = vmul.f32 %v3552_v46, %v977_v47  ;;  %v3598_v20 = vmul.f32 %v3516_v63, %v1001_v34  ;;  %v1002_v35 = vmul.f32 %v3535_v12, %v1001_v34  ;;  %v305_v25 = vadd.f32 %v3349_v59, %v232_v49 }
 0x16c   :  { %v306_v28 = vadd.f32 %v4925_v55, %v233_v43  ;;  %v3605_v14 = vsel %vm246_vm0, %v962_v11, %v4926_v62  ;;  %v986_v60 = vrot.slane %v978_v33, 1  ;;  %v3608_v58 = vpop.permute.xlu1 %1106  ;;  %v3610_v31 = vpop.permute.xlu0 %1104  ;;  %v4929_v47 = vrot.slane %v3245_v24, 1  ;;  %v4934_v62 = vld [vmem:[#allocation25_spill] sm:$0xff] }
 0x16d   :  { %4927 = vst [vmem:[#allocation10_spill] sm:$0xff] %v3605_v14  ;;  %4928 = vst [vmem:[#allocation90_spill] sm:$0xff] %v3610_v31  ;;  %v307_v55 = vadd.f32 %v3354_v42, %v234_v15  ;;  %v3616_v59 = vmul.f32 %v3546_v41, %v1001_v34  ;;  %v1004_v49 = vmul.f32 %v3552_v46, %v1001_v34  ;;  %v4930_v11 = vrot.slane %v3549_v17, 1  ;;  %v4939_v31 = vld [vmem:[#allocation26_spill] sm:$0xff] }
 0x16e   :  { %v308_v43 = vadd.f32 %v4929_v47, %v235_v22  ;;  %1602 = vrot.lane.b32.xlu1 %v1592_v7, %s2562_s4  ;;  %1598 = vrot.lane.b32.xlu0 %v1590_v56, %s2562_s4  ;;  %v1618_v24 = vmul.f32 %v3483_v39, %v3291_v2  ;;  %v1616_v42 = vmul.f32 %v3483_v39, %v3293_v23  ;;  %v989_v34 = vrot.slane %v980_v57, 1  ;;  %v4933_v56 = vld [vmem:[#allocation24_spill] sm:$0xff]  ;;  %v4947_v14 = vld [vmem:[#allocation30_spill] sm:$0xff] }
 0x16f   :  { %v3624_v33 = vsel %vm246_vm0, %v965_v36, %v4930_v11  ;;  %v1010_v15 = vrot.slane %v1002_v35, 1  ;;  %v3635_v47 = vstv %s3568_s28  ;;  %v4932_v36 = vld [vmem:[#allocation23_spill] sm:$0xff]  ;;  %v337_v11 = vadd.f32 %v4933_v56, %v3514_v29 }
 0x170   :  { %4931 = vst [vmem:[#allocation11_spill] sm:$0xff] %v3624_v33  ;;  %v338_v7 = vadd.f32 %v4932_v36, %v3504_v1  ;;  %v340_v32 = vadd.f32 %v4934_v62, %v3526_v44  ;;  %v4935_v39 = vrot.slane %v3571_v13, 1  ;;  %v3650_v35 = vpop.permute.xlu1 %1110  ;;  %v3652_v22 = vpop.permute.xlu0 %1108  ;;  %v339_v33 = vadd.f32 %v4939_v31, %v3529_v40 }
 0x171   :  { %4937 = vst [vmem:[#allocation17_spill] sm:$0xff] %v3650_v35  ;;  %4938 = vst [vmem:[#allocation18_spill] sm:$0xff] %v3652_v22  ;;  %v1013_v36 = vrot.slane %v1004_v49, 1  ;;  %v1644_v29 = vmul.f32 %v3522_v3, %v3291_v2  ;;  %v1642_v44 = vmul.f32 %v3522_v3, %v3293_v23  ;;  %v3669_v40 = vmul.f32 %v3635_v47, %v4890_v10  ;;  %v4940_v49 = vld [vmem:[#allocation27_spill] sm:$0xff]  ;;  %v4946_v22 = vld [vmem:[#allocation29_spill] sm:$0xff] }
 0x172   :  { %v3648_v57 = vsel %vm246_vm0, %v986_v60, %v4935_v39  ;;  %1628 = vrot.lane.b32.xlu1 %v1618_v24, %s2562_s4  ;;  %1624 = vrot.lane.b32.xlu0 %v1616_v42, %s2562_s4  ;;  %v3665_v60 = vmul.f32 %v3635_v47, %v4889_v5  ;;  %v3672_v31 = vstv %s3592_s29  ;;  %v370_v62 = vadd.f32 %v4940_v49, %v3533_v21  ;;  %v4941_v24 = vld [vmem:[#allocation28_spill] sm:$0xff]  ;;  %v4948_v35 = vld [vmem:[#allocation35_spill] sm:$0xff] }
 0x173   :  { %4936 = vst [vmem:[#allocation16_spill] sm:$0xff] %v3648_v57  ;;  %v369_v42 = vadd.f32 %v4941_v24, %v3544_v48  ;;  %v4942_v56 = vrot.slane %v3584_v61, 1  ;;  %v4944_v39 = vrot.slane %v3598_v20, 1  ;;  %v372_v57 = vadd.f32 %v4946_v22, %v3565_v52  ;;  %v4949_v49 = vld [vmem:[#allocation36_spill] sm:$0xff] }
 0x174   :  { %v371_v13 = vadd.f32 %v4947_v14, %v283_v51  ;;  %v434_v21 = vadd.f32 %v4948_v35, %v338_v7  ;;  %v433_v17 = vadd.f32 %v4949_v49, %v337_v11  ;;  %v3693_v48 = vpop.permute.xlu1 %1138  ;;  %v3695_v24 = vpop.permute.xlu0 %1136  ;;  %v3705_v52 = vmul.f32 %v3672_v31, %v4889_v5  ;;  %v4955_v14 = vld [vmem:[#allocation31_spill] sm:$0xff]  ;;  %v4956_v35 = vld [vmem:[#allocation32_spill] sm:$0xff]  ;;  %v4958_v49 = vld [vmem:[#allocation34_spill] sm:$0xff] }
 0x175   :  { %v3681_v3 = vsel %vm246_vm0, %v989_v34, %v4942_v56  ;;  %v3686_v1 = vsel %vm246_vm0, %v1010_v15, %v4944_v39  ;;  %4950 = vst [vmem:[#allocation21_spill] sm:$0xff] %v3693_v48  ;;  %4951 = vst [vmem:[#allocation22_spill] sm:$0xff] %v3695_v24  ;;  %v4952_v34 = vld [vmem:[#allocation37_spill] sm:$0xff]  ;;  %v1217_v51 = vstv %s3619_s30  ;;  %v402_v22 = vadd.f32 %v4955_v14, %v306_v28 }
 0x176   :  { %4943 = vst [vmem:[#allocation19_spill] sm:$0xff] %v3681_v3  ;;  %4945 = vst [vmem:[#allocation20_spill] sm:$0xff] %v3686_v1  ;;  %v436_v56 = vadd.f32 %v4952_v34, %v340_v32  ;;  %v4953_v3 = vrot.slane %v3616_v59, 1  ;;  %1654 = vrot.lane.b32.xlu1 %v1644_v29, %s2562_s4  ;;  %1650 = vrot.lane.b32.xlu0 %v1642_v44, %s2562_s4  ;;  %v3715_v11 = vmul.f32 %v3672_v31, %v4890_v10 }
 0x177   :  { %v403_v34 = vadd.f32 %v4958_v49, %v307_v55  ;;  %v4959_v28 = vrot.slane %v3252_v18, 2  ;;  %v3728_v44 = vadd.f32 %v3359_v8, %v433_v17  ;;  %v3735_v7 = vmul.f32 %v3516_v63, %v1217_v51  ;;  %v4970_v8 = vld [vmem:[#allocation43_spill] sm:$0xff] }
 0x178   :  { %v3701_v15 = vsel %vm246_vm0, %v1013_v36, %v4953_v3  ;;  %v401_v36 = vadd.f32 %v4956_v35, %v305_v25  ;;  %v4957_v3 = vld [vmem:[#allocation33_spill] sm:$0xff]  ;;  %v3730_v14 = vpop.permute.xlu1 %1142  ;;  %v3732_v32 = vpop.permute.xlu0 %1140  ;;  %v1218_v25 = vmul.f32 %v3535_v12, %v1217_v51  ;;  %v4963_v35 = vld [vmem:[#allocation39_spill] sm:$0xff]  ;;  %v4964_v18 = vrot.slane %v3256_v27, 2 }
 0x179   :  { %4954 = vst [vmem:[#allocation23_spill] sm:$0xff] %v3701_v15  ;;  %v404_v39 = vadd.f32 %v4957_v3, %v308_v43  ;;  %v3721_v15 = vstv %s3637_s3  ;;  %v3725_v29 = vadd.f32 %v4959_v28, %v434_v21  ;;  %4960 = vst [vmem:[#allocation24_spill] sm:$0xff] %v3730_v14  ;;  %v4962_v43 = vld [vmem:[#allocation38_spill] sm:$0xff]  ;;  %v466_v3 = vadd.f32 %v4963_v35, %v370_v62  ;;  %v4967_v28 = vld [vmem:[#allocation40_spill] sm:$0xff] }
 0x17a   :  { %4961 = vst [vmem:[#allocation25_spill] sm:$0xff] %v3732_v32  ;;  %v435_v55 = vadd.f32 %v4962_v43, %v339_v33  ;;  %v3742_v21 = vadd.f32 %v4964_v18, %v436_v56  ;;  %v4965_v17 = vrot.slane %v3665_v60, 1  ;;  %v4966_v49 = vrot.slane %v3669_v40, 1  ;;  %v4968_v35 = vld [vmem:[#allocation41_spill] sm:$0xff]  ;;  %v4971_v32 = vld [vmem:[#allocation44_spill] sm:$0xff] }
 0x17b   :  { %v3756_v62 = vmul.f32 %v3721_v15, %v4889_v5  ;;  %v3760_v27 = vmul.f32 %v3721_v15, %v4890_v10  ;;  %v1742_v56 = vmul.f32 %v3635_v47, %v3291_v2  ;;  %v465_v43 = vadd.f32 %v4967_v28, %v369_v42 }
 0x17c   :  { %1760 = vrot.lane.b32.xlu1 %v4965_v17, %s2561_s0  ;;  %1756 = vrot.lane.b32.xlu0 %v4966_v49, %s2561_s0  ;;  %v468_v18 = vadd.f32 %v4968_v35, %v372_v57  ;;  %v4969_v17 = vld [vmem:[#allocation42_spill] sm:$0xff]  ;;  %v1740_v33 = vmul.f32 %v3635_v47, %v3293_v23  ;;  %v498_v1 = vadd.f32 %v4970_v8, %v402_v22  ;;  %v3773_v14 = vpop.permute.xlu1 %1170  ;;  %v3775_v61 = vpop.permute.xlu0 %1168  ;;  %v4767_v48 = vrot.slane %v3735_v7, 2 }
 0x17d   :  { %v467_v49 = vadd.f32 %v4969_v17, %v371_v13  ;;  %v497_v24 = vadd.f32 %v4971_v32, %v401_v36  ;;  %v1226_v50 = vrot.slane %v1218_v25, 2  ;;  %v3779_v42 = vadd.f32 %v3365_v38, %v435_v55 }
 0x17e   :  { %v4972_v57 = vrot.slane %v3265_v53, 2  ;;  %v3786_v47 = vmul.f32 %v3546_v41, %v1217_v51  ;;  %v3789_v22 = vmul.f32 %v3552_v46, %v1217_v51  ;;  %v4973_v32 = vrot.slane %v3705_v52, 1 }
 0x17f   :  { %v4974_v36 = vrot.slane %v3715_v11, 1  ;;  %v1816_v38 = vrot.slane %v3756_v62, 1  ;;  %v1813_v53 = vrot.slane %v3760_v27, 1  ;;  %v1751_v25 = vrot.slane %v1742_v56, 1 }
 0x180   :  { %v3783_v13 = vadd.f32 %v4972_v57, %v466_v3  ;;  %1792 = vrot.lane.b32.xlu1 %v4973_v32, %s2561_s0  ;;  %v1774_v55 = vmul.f32 %v3672_v31, %v3291_v2  ;;  %v3802_v51 = vadd.f32 %v3377_v19, %v465_v43  ;;  %v4975_v3 = vrot.slane %v3269_v37, 2  ;;  %v3822_v37 = vpop.permute.xlu1 %1174  ;;  %v3824_v43 = vpop.permute.xlu0 %1172 }
 0x181   :  { %1788 = vrot.lane.b32.xlu0 %v4974_v36, %s2561_s0  ;;  %v1748_v28 = vrot.slane %v1740_v33, 1  ;;  %v1772_v35 = vmul.f32 %v3672_v31, %v3293_v23  ;;  %v3813_v17 = vadd.f32 %v3382_v26, %v467_v49  ;;  %v4976_v56 = vrot.slane %v3284_v54, 2  ;;  %4977 = vst [vmem:[#allocation26_spill] sm:$0xff] %v3824_v43  ;;  %v4979_v33 = vld [vmem:[#allocation45_spill] sm:$0xff]  ;;  %v4158_v43 = vld [vmem:[#allocation2 + $0x58] sm:$0xff] }
 0x182   :  { %v3806_v8 = vadd.f32 %v4975_v3, %v468_v18  ;;  %v3820_v19 = vadd.f32 %v3387_v16, %v497_v24  ;;  %v3829_v31 = vsel %vm511_vm1, %v1226_v50, %v4767_v48  ;;  %v500_v26 = vadd.f32 %v4979_v33, %v404_v39  ;;  %v4980_v18 = vld [vmem:[#allocation46_spill] sm:$0xff] }
 0x183   :  { %v3817_v57 = vadd.f32 %v4976_v56, %v498_v1  ;;  %4978 = vst [vmem:[#allocation27_spill] sm:$0xff] %v3829_v31  ;;  %v499_v49 = vadd.f32 %v4980_v18, %v403_v34  ;;  %v4768_v54 = vrot.slane %v3786_v47, 2  ;;  %v1241_v1 = vstv %s3745_s5 }
 0x184   :  { %1824 = vrot.lane.b32.xlu1 %v1816_v38, %s2561_s0  ;;  %v4981_v16 = vrot.slane %v3665_v60, 1  ;;  %v1783_v24 = vrot.slane %v1774_v55, 1  ;;  %v1229_v39 = vrot.slane %v3789_v22, 2  ;;  %v1265_v34 = vstv %s3764_s6  ;;  %v3855_v60 = vpop.permute.xlu1 %1202 }
 0x185   :  { %1820 = vrot.lane.b32.xlu0 %v1813_v53, %s2561_s0  ;;  %v4982_v32 = vrot.slane %v3669_v40, 1  ;;  %v1780_v3 = vrot.slane %v1772_v35, 1  ;;  %v1806_v56 = vmul.f32 %v3721_v15, %v3291_v2  ;;  %v1804_v33 = vmul.f32 %v3721_v15, %v3293_v23 }
 0x186   :  { %v1753_v50 = vsel %vm246_vm0, %v1751_v25, %v4981_v16  ;;  %v3857_v25 = vpop.permute.xlu0 %1200  ;;  %v3860_v22 = vmul.f32 %v3516_v63, %v1241_v1  ;;  %v1242_v55 = vmul.f32 %v3535_v12, %v1241_v1  ;;  %v3864_v40 = vmul.f32 %v3546_v41, %v1241_v1 }
 0x187   :  { %v1750_v36 = vsel %vm246_vm0, %v1748_v28, %v4982_v32  ;;  %4983 = vst [vmem:[#allocation28_spill] sm:$0xff] %v3857_v25  ;;  %v1244_v28 = vmul.f32 %v3552_v46, %v1241_v1  ;;  %v4984_v35 = vrot.slane %v3288_v0, 2  ;;  %v3872_v15 = vadd.f32 %v3392_v30, %v499_v49 }
 0x188   :  { %v3875_v16 = vmul.f32 %v3516_v63, %v1265_v34  ;;  %v1266_v32 = vmul.f32 %v3535_v12, %v1265_v34  ;;  %1758 = vrot.lane.b32.xlu1 %v1753_v50, %s2561_s0  ;;  %v4985_v48 = vrot.slane %v3705_v52, 1  ;;  %v3886_v0 = vmul.f32 %v3546_v41, %v1265_v34 }
 0x189   :  { %v3869_v18 = vadd.f32 %v4984_v35, %v500_v26  ;;  %1754 = vrot.lane.b32.xlu0 %v1750_v36, %s2561_s0  ;;  %v1268_v30 = vmul.f32 %v3552_v46, %v1265_v34  ;;  %v4986_v63 = vrot.slane %v3715_v11, 1  ;;  %v1815_v12 = vrot.slane %v1806_v56, 1  ;;  %v3893_v36 = vpop.permute.xlu1 %1206  ;;  %v4988_v46 = vld [vmem:[#allocation47_spill] sm:$0xff]  ;;  %v4989_v11 = vld [vmem:[#allocation48_spill] sm:$0xff] }
 0x18a   :  { %v1785_v1 = vsel %vm246_vm0, %v1783_v24, %v4985_v48  ;;  %v1812_v49 = vrot.slane %v1804_v33, 1  ;;  %v1835_v50 = vstv %s3810_s7  ;;  %v3895_v52 = vpop.permute.xlu0 %1204  ;;  %v4769_v48 = vrot.slane %v3860_v22, 2 }
 0x18b   :  { %v1782_v26 = vsel %vm246_vm0, %v1780_v3, %v4986_v63  ;;  %4987 = vst [vmem:[#allocation29_spill] sm:$0xff] %v3895_v52  ;;  %v1250_v24 = vrot.slane %v1242_v55, 2  ;;  %v1253_v35 = vrot.slane %v1244_v28, 2  ;;  %v603_v34 = vadd.f32 %v4988_v46, %v3725_v29  ;;  %v4991_v46 = vld [vmem:[#allocation49_spill] sm:$0xff] }
 0x18c   :  { %v602_v3 = vadd.f32 %v4989_v11, %v3728_v44  ;;  %v3906_v56 = vsel %vm511_vm1, %v1229_v39, %v4768_v54  ;;  %1790 = vrot.lane.b32.xlu1 %v1785_v1, %s2561_s0  ;;  %v3912_v55 = vmul.f32 %v1835_v50, %v4889_v5  ;;  %v3915_v28 = vmul.f32 %v1835_v50, %v4890_v10  ;;  %v4992_v54 = vld [vmem:[#allocation50_spill] sm:$0xff] }
 0x18d   :  { %4990 = vst [vmem:[#allocation30_spill] sm:$0xff] %v3906_v56  ;;  %1786 = vrot.lane.b32.xlu0 %v1782_v26, %s2561_s0  ;;  %v1867_v29 = vstv %s3845_s8  ;;  %v1274_v63 = vrot.slane %v1266_v32, 2  ;;  %v1817_v44 = vsel %vm246_vm0, %v1815_v12, %v1816_v38  ;;  %v1814_v39 = vsel %vm246_vm0, %v1812_v49, %v1813_v53  ;;  %v3929_v41 = vpop.permute.xlu1 %1306  ;;  %v4997_v53 = vld [vmem:[#allocation51_spill] sm:$0xff] }
 0x18e   :  { %v4770_v1 = vrot.slane %v3886_v0, 2  ;;  %v1277_v26 = vrot.slane %v1268_v30, 2  ;;  %v605_v11 = vadd.f32 %v4991_v46, %v3742_v21  ;;  %v604_v33 = vadd.f32 %v4992_v54, %v3779_v42  ;;  %v3931_v32 = vpop.permute.xlu0 %1304  ;;  %v4998_v30 = vld [vmem:[#allocation52_spill] sm:$0xff]  ;;  %v4999_v46 = vld [vmem:[#allocation53_spill] sm:$0xff] }
 0x18f   :  { %4993 = vst [vmem:[#allocation35_spill] sm:$0xff] %v3931_v32  ;;  %v3936_v62 = vsel %vm511_vm1, %v1250_v24, %v4769_v48  ;;  %v4995_v27 = vrot.slane %v3864_v40, 2  ;;  %v635_v21 = vadd.f32 %v4997_v53, %v3783_v13  ;;  %v634_v42 = vadd.f32 %v4998_v30, %v3802_v51 }
 0x190   :  { %4994 = vst [vmem:[#allocation36_spill] sm:$0xff] %v3936_v62  ;;  %v3948_v54 = vmul.f32 %v1867_v29, %v4889_v5  ;;  %v3951_v12 = vmul.f32 %v1867_v29, %v4890_v10  ;;  %1822 = vrot.lane.b32.xlu1 %v1817_v44, %s2561_s0  ;;  %v1848_v49 = vrot.slane %v3912_v55, 1  ;;  %v1845_v24 = vrot.slane %v3915_v28, 1  ;;  %v5004_v28 = vld [vmem:[#allocation55_spill] sm:$0xff] }
 0x191   :  { %v3941_v38 = vsel %vm511_vm1, %v1253_v35, %v4995_v27  ;;  %1818 = vrot.lane.b32.xlu0 %v1814_v39, %s2561_s0  ;;  %v1899_v35 = vstv %s3883_s9  ;;  %v1838_v13 = vmul.f32 %v1835_v50, %v3291_v2  ;;  %v637_v51 = vadd.f32 %v4999_v46, %v3806_v8  ;;  %v5000_v27 = vld [vmem:[#allocation54_spill] sm:$0xff]  ;;  %v5005_v8 = vld [vmem:[#allocation56_spill] sm:$0xff]  ;;  %v5006_v46 = vld [vmem:[#allocation59_spill] sm:$0xff] }
 0x192   :  { %4996 = vst [vmem:[#allocation37_spill] sm:$0xff] %v3941_v38  ;;  %v636_v53 = vadd.f32 %v5000_v27, %v3813_v17  ;;  %v5001_v30 = vrot.slane %v3875_v16, 2  ;;  %v3971_v55 = vsel %vm511_vm1, %v1277_v26, %v4770_v1  ;;  %v667_v44 = vadd.f32 %v5004_v28, %v3817_v57  ;;  %v3980_v27 = vpop.permute.xlu1 %1310  ;;  %v3982_v38 = vpop.permute.xlu0 %1308  ;;  %v5009_v57 = vld [vmem:[#allocation61_spill] sm:$0xff]  ;;  %v5010_v28 = vld [vmem:[#allocation62_spill] sm:$0xff] }
 0x193   :  { %5003 = vst [vmem:[#allocation32_spill] sm:$0xff] %v3971_v55  ;;  %v666_v39 = vadd.f32 %v5005_v8, %v3820_v19  ;;  %v699_v17 = vadd.f32 %v5006_v46, %v603_v34  ;;  %5007 = vst [vmem:[#allocation33_spill] sm:$0xff] %v3982_v38  ;;  %v1880_v26 = vrot.slane %v3948_v54, 1  ;;  %v1877_v1 = vrot.slane %v3951_v12, 1  ;;  %v5012_v12 = vld [vmem:[#allocation58_spill] sm:$0xff] }
 0x194   :  { %v3966_v48 = vsel %vm511_vm1, %v1274_v63, %v5001_v30  ;;  %v1836_v63 = vmul.f32 %v1835_v50, %v3293_v23  ;;  %v5008_v30 = vld [vmem:[#allocation60_spill] sm:$0xff]  ;;  %v1903_v55 = vmul.f32 %v1899_v35, %v4889_v5  ;;  %v701_v19 = vadd.f32 %v5009_v57, %v605_v11  ;;  %1856 = vrot.lane.b32.xlu1 %v1848_v49, %s2562_s4 }
 0x195   :  { %5002 = vst [vmem:[#allocation31_spill] sm:$0xff] %v3966_v48  ;;  %v698_v48 = vadd.f32 %v5008_v30, %v602_v3  ;;  %v700_v34 = vadd.f32 %v5010_v28, %v604_v33  ;;  %1852 = vrot.lane.b32.xlu0 %v1845_v24, %s2562_s4  ;;  %v1901_v50 = vmul.f32 %v1899_v35, %v4890_v10  ;;  %v1847_v8 = vrot.slane %v1838_v13, 1  ;;  %v5011_v3 = vld [vmem:[#allocation57_spill] sm:$0xff]  ;;  %v5013_v33 = vld [vmem:[#allocation63_spill] sm:$0xff] }
 0x196   :  { %v669_v54 = vadd.f32 %v5011_v3, %v3869_v18  ;;  %v668_v46 = vadd.f32 %v5012_v12, %v3872_v15  ;;  %v1870_v30 = vmul.f32 %v1867_v29, %v3291_v2  ;;  %v1868_v11 = vmul.f32 %v1867_v29, %v3293_v23  ;;  %v4008_v52 = vpop.permute.xlu1 %1338  ;;  %v4010_v13 = vpop.permute.xlu0 %1336  ;;  %v5015_v3 = vld [vmem:[#allocation64_spill] sm:$0xff] }
 0x197   :  { %v731_v57 = vadd.f32 %v5013_v33, %v635_v21  ;;  %v4006_v28 = vadd.f32 %v3397_v9, %v699_v17  ;;  %5014 = vst [vmem:[#allocation34_spill] sm:$0xff] %v4010_v13  ;;  %v1844_v25 = vrot.slane %v1836_v63, 1  ;;  %v1902_v18 = vmul.f32 %v1899_v35, %v3291_v2 }
 0x198   :  { %v730_v38 = vadd.f32 %v5015_v3, %v634_v42  ;;  %v4015_v15 = vadd.f32 %v3400_v4, %v698_v48  ;;  %v1912_v12 = vrot.slane %v1903_v55, 1  ;;  %v1900_v29 = vmul.f32 %v1899_v35, %v3293_v23  ;;  %1888 = vrot.lane.b32.xlu1 %v1880_v26, %s2562_s4  ;;  %v5016_v42 = vld [vmem:[#allocation65_spill] sm:$0xff] }
 0x199   :  { %v4019_v21 = vadd.f32 %v3403_v45, %v701_v19  ;;  %v4022_v9 = vadd.f32 %v3406_v6, %v700_v34  ;;  %1884 = vrot.lane.b32.xlu0 %v1877_v1, %s2562_s4  ;;  %v1909_v17 = vrot.slane %v1901_v50, 1  ;;  %v1849_v63 = vsel %vm246_vm0, %v1847_v8, %v1848_v49  ;;  %v5017_v45 = vld [vmem:[#allocation66_spill] sm:$0xff]  ;;  %v5018_v19 = vld [vmem:[#allocation101_spill] sm:$0xff] }
 0x19a   :  { %v733_v4 = vadd.f32 %v5016_v42, %v637_v51  ;;  %v1879_v48 = vrot.slane %v1870_v30, 1  ;;  %v1876_v55 = vrot.slane %v1868_v11, 1  ;;  %v2003_v33 = vstv %s3973_s10  ;;  %v4035_v34 = vpop.permute.xlu1 %1342  ;;  %v4037_v3 = vpop.permute.xlu0 %1340  ;;  %v5020_v51 = vld [vmem:[#allocation67_spill] sm:$0xff]  ;;  %v5021_v30 = vld [vmem:[#allocation102_spill] sm:$0xff] }
 0x19b   :  { %v732_v35 = vadd.f32 %v5017_v45, %v636_v53  ;;  %v4033_v6 = vadd.f32 %v5018_v19, %v731_v57  ;;  %5019 = vst [vmem:[#allocation38_spill] sm:$0xff] %v4037_v3  ;;  %v1846_v49 = vsel %vm246_vm0, %v1844_v25, %v1845_v24  ;;  %v1911_v50 = vrot.slane %v1902_v18, 1  ;;  %v5022_v45 = vld [vmem:[#allocation68_spill] sm:$0xff]  ;;  %v5024_v18 = vld [vmem:[#allocation103_spill] sm:$0xff] }
 0x19c   :  { %v763_v8 = vadd.f32 %v5020_v51, %v667_v44  ;;  %v4044_v11 = vadd.f32 %v5021_v30, %v730_v38  ;;  %v1908_v42 = vrot.slane %v1900_v29, 1  ;;  %v1481_v53 = vstv %s3989_s11  ;;  %1920 = vrot.lane.b32.xlu1 %v1912_v12, %s2562_s4  ;;  %v5023_v38 = vld [vmem:[#allocation69_spill] sm:$0xff]  ;;  %v5025_v51 = vld [vmem:[#allocation70_spill] sm:$0xff] }
 0x19d   :  { %v762_v13 = vadd.f32 %v5022_v45, %v666_v39  ;;  %1916 = vrot.lane.b32.xlu0 %v1909_v17, %s2562_s4  ;;  %v4051_v57 = vmul.f32 %v2003_v33, %v4889_v5  ;;  %v4054_v25 = vmul.f32 %v2003_v33, %v4890_v10  ;;  %v4057_v24 = vstv %s3996_s12  ;;  %v5026_v45 = vld [vmem:[#allocation104_spill] sm:$0xff] }
 0x19e   :  { %v765_v44 = vadd.f32 %v5023_v38, %v669_v54  ;;  %v4063_v29 = vadd.f32 %v5024_v18, %v733_v4  ;;  %v1881_v39 = vsel %vm246_vm0, %v1879_v48, %v1880_v26  ;;  %v1878_v19 = vsel %vm246_vm0, %v1876_v55, %v1877_v1  ;;  %v4071_v32 = vpop.permute.xlu1 %1370  ;;  %v4073_v62 = vpop.permute.xlu0 %1368  ;;  %v5028_v4 = vld [vmem:[#allocation105_spill] sm:$0xff]  ;;  %v5029_v48 = vld [vmem:[#allocation108_spill] sm:$0xff] }
 0x19f   :  { %v764_v30 = vadd.f32 %v5025_v51, %v668_v46  ;;  %v4069_v3 = vadd.f32 %v5026_v45, %v732_v35  ;;  %5027 = vst [vmem:[#allocation39_spill] sm:$0xff] %v4073_v62  ;;  %v1913_v56 = vsel %vm246_vm0, %v1911_v50, %v1912_v12  ;;  %v4077_v54 = vmul.f32 %v1481_v53, %v4890_v10  ;;  %v5031_v50 = vld [vmem:[#allocation79_spill] sm:$0xff] }
 0x1a0   :  { %v793_v38 = vadd.f32 %v5028_v4, %v763_v8  ;;  %v1910_v26 = vsel %vm246_vm0, %v1908_v42, %v1909_v17  ;;  %v4083_v1 = vmul.f32 %v4057_v24, %v4889_v5  ;;  %v4087_v46 = vmul.f32 %v4057_v24, %v4890_v10  ;;  %1854 = vrot.lane.b32.xlu1 %v1849_v63, %s2562_s4  ;;  %v5032_v42 = vld [vmem:[#allocation109_spill] sm:$0xff] }
 0x1a1   :  { %v4090_v55 = vadd.f32 %v5029_v48, %v762_v13  ;;  %1850 = vrot.lane.b32.xlu0 %v1846_v49, %s2562_s4  ;;  %v2016_v12 = vrot.slane %v4051_v57, 2  ;;  %v2013_v17 = vrot.slane %v4054_v25, 2  ;;  %v4097_v35 = vmul.f32 %v1481_v53, %v3293_v23  ;;  %v5033_v13 = vld [vmem:[#allocation84_spill] sm:$0xff] }
 0x1a2   :  { %v871_v8 = vadd.f32 %v5031_v50, %v793_v38  ;;  %v795_v18 = vadd.f32 %v5032_v42, %v765_v44  ;;  %v2067_v51 = vstv %s4029_s13  ;;  %v4103_v45 = vmul.f32 %v1481_v53, %v4889_v5  ;;  %v4108_v49 = vpop.permute.xlu1 %1374  ;;  %v4110_v57 = vpop.permute.xlu0 %1372  ;;  %v5035_v38 = vld [vmem:[#allocation97_spill] sm:$0xff] }
 0x1a3   :  { %5030 = vst [vmem:[#allocation40_spill] sm:$0xff] %v4097_v35  ;;  %v4106_v63 = vadd.f32 %v5033_v13, %v764_v30  ;;  %5034 = vst [vmem:[#allocation41_spill] sm:$0xff] %v4110_v57  ;;  %v2006_v25 = vmul.f32 %v2003_v33, %v3291_v2  ;;  %v2004_v4 = vmul.f32 %v2003_v33, %v3293_v23  ;;  %v1491_v48 = vstv %s4040_s14  ;;  %v5037_v30 = vld [vmem:[#allocation71_spill] sm:$0xff]  ;;  %v5038_v35 = vld [vmem:[#allocation72_spill] sm:$0xff] }
 0x1a4   :  { %v949_v50 = vadd.f32 %v5035_v38, %v871_v8  ;;  %v4119_v62 = vmul.f32 %v1481_v53, %v3291_v2  ;;  %v819_v13 = vadd.f32 %v5037_v30, %v4006_v28  ;;  %v4125_v57 = vadd.f32 %v5038_v35, %v4015_v15  ;;  %1886 = vrot.lane.b32.xlu1 %v1881_v39, %s2562_s4  ;;  %v5040_v38 = vld [vmem:[#allocation81_spill] sm:$0xff] }
 0x1a5   :  { %1882 = vrot.lane.b32.xlu0 %v1878_v19, %s2562_s4  ;;  %v4130_v33 = vmul.f32 %v2067_v51, %v4889_v5  ;;  %v4133_v8 = vstv %s4059_s15  ;;  %v873_v42 = vadd.f32 %v5040_v38, %v795_v18  ;;  %v4137_v53 = vmul.f32 %v2067_v51, %v4890_v10  ;;  %v5043_v39 = vld [vmem:[#allocation73_spill] sm:$0xff]  ;;  %v5044_v19 = vld [vmem:[#allocation74_spill] sm:$0xff] }
 0x1a6   :  { %5036 = vst [vmem:[#allocation42_spill] sm:$0xff] %v4119_v62  ;;  %5039 = vst [vmem:[#allocation43_spill] sm:$0xff] %v4133_v8  ;;  %v4140_v28 = vmul.f32 %v1491_v48, %v4890_v10  ;;  %v4143_v15 = vmul.f32 %v1491_v48, %v3293_v23  ;;  %v821_v35 = vadd.f32 %v5043_v39, %v4019_v21  ;;  %v4151_v30 = vpop.permute.xlu1 %1402  ;;  %v4153_v44 = vpop.permute.xlu0 %1400  ;;  %v2015_v18 = vrot.slane %v2006_v25, 2  ;;  %v5045_v62 = vld [vmem:[#allocation99_spill] sm:$0xff]  ;;  %v4165_v21 = vld [vmem:[#allocation2 + $0x28] sm:$0xff] }
 0x1a7   :  { %v4149_v5 = vadd.f32 %v5044_v19, %v4022_v9  ;;  %v2012_v38 = vrot.slane %v2004_v4, 2  ;;  %v951_v31 = vadd.f32 %v5045_v62, %v873_v42  ;;  %v5046_v10 = vrot.slane %v3598_v20, 1  ;;  %v5048_v25 = vld [vmem:[#allocation86_spill] sm:$0xff]  ;;  %v5049_v42 = vld [vmem:[#allocation75_spill] sm:$0xff]  ;;  %v5050_v19 = vld [vmem:[#allocation76_spill] sm:$0xff] }
 0x1a8   :  { %5041 = vst [vmem:[#allocation44_spill] sm:$0xff] %v4140_v28  ;;  %5042 = vst [vmem:[#allocation45_spill] sm:$0xff] %v4143_v15  ;;  %v4161_v15 = vmul.f32 %v4158_v43, %v1491_v48  ;;  %v4169_v9 = vmul.f32 %v4165_v21, %v4133_v8  ;;  %v897_v4 = vadd.f32 %v5048_v25, %v819_v13  ;;  %1918 = vrot.lane.b32.xlu1 %v1913_v56, %s2562_s4  ;;  %v5051_v13 = vld [vmem:[#allocation91_spill] sm:$0xff] }
 0x1a9   :  { %v1021_v28 = vadd.f32 %v5046_v10, %v949_v50  ;;  %1914 = vrot.lane.b32.xlu0 %v1910_v26, %s2562_s4  ;;  %v2080_v20 = vrot.slane %v4130_v33, 2  ;;  %v2038_v62 = vmul.f32 %v4057_v24, %v3291_v2  ;;  %v2036_v50 = vmul.f32 %v4057_v24, %v3293_v23 }
 0x1aa   :  { %5047 = vst [vmem:[#allocation46_spill] sm:$0xff] %v4169_v9  ;;  %v845_v39 = vadd.f32 %v5049_v42, %v4033_v6  ;;  %v4183_v10 = vadd.f32 %v5050_v19, %v4044_v11  ;;  %v899_v25 = vadd.f32 %v5051_v13, %v821_v35  ;;  %v4187_v26 = vpop.permute.xlu1 %1406  ;;  %v4189_v33 = vpop.permute.xlu0 %1404  ;;  %v4192_v9 = vsel %vm511_vm1, %v2015_v18, %v2016_v12  ;;  %v5053_v11 = vld [vmem:[#allocation77_spill] sm:$0xff]  ;;  %v5056_v18 = vld [vmem:[#allocation8_spill] sm:$0xff] }
 0x1ab   :  { %v1117_v56 = vadd.f32 %v3608_v58, %v1021_v28  ;;  %5052 = vst [vmem:[#allocation47_spill] sm:$0xff] %v4189_v33  ;;  %v4195_v24 = vsel %vm511_vm1, %v2012_v38, %v2013_v17  ;;  %v2070_v6 = vmul.f32 %v2067_v51, %v3291_v2  ;;  %v2068_v42 = vmul.f32 %v2067_v51, %v3293_v23 }
 0x1ac   :  { %v847_v19 = vadd.f32 %v5053_v11, %v4063_v29  ;;  %v5054_v35 = vrot.slane %v3616_v59, 1  ;;  %v4206_v13 = vmul.f32 %v4158_v43, %v4133_v8  ;;  %v5057_v33 = vrot.slane %v5056_v18, 1  ;;  %2024 = vrot.lane.b32.xlu1 %v2016_v12, %s2561_s0  ;;  %v5060_v29 = vld [vmem:[#allocation95_spill] sm:$0xff]  ;;  %v5061_v11 = vld [vmem:[#allocation14_spill] sm:$0xff] }
 0x1ad   :  { %v1213_v28 = vadd.f32 %v3855_v60, %v1117_v56  ;;  %2020 = vrot.lane.b32.xlu0 %v2013_v17, %s2561_s0  ;;  %v2047_v23 = vrot.slane %v2038_v62, 2  ;;  %v2044_v51 = vrot.slane %v2036_v50, 2  ;;  %v4215_v59 = vmul.f32 %v1491_v48, %v3291_v2  ;;  %v5064_v12 = vld [vmem:[#allocation78_spill] sm:$0xff] }
 0x1ae   :  { %v1023_v58 = vadd.f32 %v5054_v35, %v951_v31  ;;  %5055 = vst [vmem:[#allocation48_spill] sm:$0xff] %v4206_v13  ;;  %v973_v38 = vadd.f32 %v5057_v33, %v897_v4  ;;  %v5059_v31 = vld [vmem:[#allocation93_spill] sm:$0xff]  ;;  %v925_v56 = vadd.f32 %v5060_v29, %v847_v19  ;;  %v5062_v35 = vrot.slane %v5061_v11, 1  ;;  %v5065_v62 = vld [vmem:[#allocation106_spill] sm:$0xff]  ;;  %v4225_v8 = vpop.permute.xlu1 %1434  ;;  %v4227_v13 = vpop.permute.xlu0 %1432 }
 0x1af   :  { %5058 = vst [vmem:[#allocation49_spill] sm:$0xff] %v4215_v59  ;;  %v923_v60 = vadd.f32 %v5059_v31, %v845_v39  ;;  %v5063_v4 = vld [vmem:[#allocation17_spill] sm:$0xff]  ;;  %v846_v17 = vadd.f32 %v5064_v12, %v4069_v3  ;;  %v2079_v2 = vrot.slane %v2070_v6, 2  ;;  %v2076_v48 = vrot.slane %v2068_v42, 2 }
 0x1b0   :  { %v975_v18 = vadd.f32 %v5062_v35, %v899_v25  ;;  %v1119_v33 = vadd.f32 %v5063_v4, %v1023_v58  ;;  %v1053_v50 = vadd.f32 %v5065_v62, %v973_v38  ;;  %v5066_v59 = vld [vmem:[#allocation85_spill] sm:$0xff]  ;;  %v5067_v31 = vrot.slane %v3875_v16, 2  ;;  %v5077_v62 = vld [vmem:[#allocation24_spill] sm:$0xff] }
 0x1b1   :  { %v4234_v29 = vstv %s4163_s16  ;;  %v5068_v58 = vld [vmem:[#allocation21_spill] sm:$0xff]  ;;  %v5069_v3 = vrot.slane %v4083_v1, 2  ;;  %v5070_v38 = vrot.slane %v4087_v46, 2  ;;  %v2077_v6 = vrot.slane %v4137_v53, 2  ;;  %v5078_v1 = vld [vmem:[#allocation80_spill] sm:$0xff] }
 0x1b2   :  { %v1055_v39 = vadd.f32 %v5066_v59, %v975_v18  ;;  %v1215_v19 = vadd.f32 %v3893_v36, %v1119_v33  ;;  %v1285_v25 = vadd.f32 %v5067_v31, %v1213_v28  ;;  %v1149_v11 = vadd.f32 %v5068_v58, %v1053_v50  ;;  %v5073_v59 = vld [vmem:[#allocation15_spill] sm:$0xff]  ;;  %v5075_v4 = vld [vmem:[#allocation89_spill] sm:$0xff]  ;;  %v1467_v31 = vpop.permute.xlu1 %1466  ;;  %v1439_v46 = vpop.permute.xlu0 %1438 }
 0x1b3   :  { %2056 = vrot.lane.b32.xlu1 %v5069_v3, %s2561_s0  ;;  %2052 = vrot.lane.b32.xlu0 %v5070_v38, %s2561_s0  ;;  %v5071_v42 = vmov %v5069_v3  ;;  %v5072_v16 = vmov %v5070_v38  ;;  %v5074_v35 = vrot.slane %v5073_v59, 1  ;;  %v5076_v33 = vrot.slane %v5075_v4, 1  ;;  %v5080_v3 = vld [vmem:[#allocation88_spill] sm:$0xff] }
 0x1b4   :  { %v2049_v36 = vsel %vm511_vm1, %v2047_v23, %v5071_v42  ;;  %v2046_v28 = vsel %vm511_vm1, %v2044_v51, %v5072_v16  ;;  %v1151_v50 = vadd.f32 %v5077_v62, %v1055_v39  ;;  %v1381_v53 = vadd.f32 %v4071_v32, %v1285_v25  ;;  %v5082_v42 = vld [vmem:[#allocation87_spill] sm:$0xff]  ;;  %v5083_v16 = vld [vmem:[#allocation92_spill] sm:$0xff] }
 0x1b5   :  { %v997_v18 = vadd.f32 %v5074_v35, %v923_v60  ;;  %v999_v12 = vadd.f32 %v5076_v33, %v925_v56  ;;  %v870_v23 = vadd.f32 %v5078_v1, %v4090_v55  ;;  %v4261_v51 = vsel %vm511_vm1, %v2079_v2, %v2080_v20  ;;  %v5079_v56 = vld [vmem:[#allocation12_spill] sm:$0xff] }
 0x1b6   :  { %v4264_v58 = vsel %vm511_vm1, %v2076_v48, %v2077_v6  ;;  %v4268_v60 = vmul.f32 %v4158_v43, %v4234_v29  ;;  %v5081_v25 = vrot.slane %v3886_v0, 2  ;;  %v4274_v55 = vadd.f32 %v1467_v31, %v1381_v53  ;;  %v4297_v62 = vpop.permute.xlu1 %1436  ;;  %v1471_v53 = vpop.permute.xlu0 %1470 }
 0x1b7   :  { %v1085_v39 = vadd.f32 %v5079_v56, %v997_v18  ;;  %v1087_v32 = vadd.f32 %v5080_v3, %v999_v12  ;;  %v896_v2 = vadd.f32 %v5082_v42, %v4125_v57  ;;  %v898_v48 = vadd.f32 %v5083_v16, %v4149_v5  ;;  %2088 = vrot.lane.b32.xlu1 %v2080_v20, %s2561_s0  ;;  %v5086_v5 = vld [vmem:[#allocation82_spill] sm:$0xff]  ;;  %v5088_v12 = vld [vmem:[#allocation96_spill] sm:$0xff]  ;;  %v5094_v42 = vld [vmem:[#allocation83_spill] sm:$0xff] }
 0x1b8   :  { %v1287_v38 = vadd.f32 %v5081_v25, %v1215_v19  ;;  %v5084_v59 = vrot.slane %v3735_v7, 2  ;;  %2084 = vrot.lane.b32.xlu0 %v2077_v6, %s2561_s0  ;;  %v4285_v18 = vstv %s4212_s17  ;;  %v5085_v4 = vrot.slane %v3786_v47, 2 }
 0x1b9   :  { %v1181_v0 = vadd.f32 %v3773_v14, %v1085_v39  ;;  %v1183_v19 = vadd.f32 %v3822_v37, %v1087_v32  ;;  %v872_v7 = vadd.f32 %v5086_v5, %v4106_v63  ;;  %v924_v6 = vadd.f32 %v5088_v12, %v846_v17  ;;  %v5100_v5 = vld [vmem:[#allocation22_spill] sm:$0xff]  ;;  %v5101_v12 = vld [vmem:[#allocation25_spill] sm:$0xff] }
 0x1ba   :  { %v1237_v35 = vadd.f32 %v5084_v59, %v1149_v11  ;;  %v1239_v33 = vadd.f32 %v5085_v4, %v1151_v50  ;;  %v1383_v57 = vadd.f32 %v4108_v49, %v1287_v38  ;;  %v5087_v11 = vld [vmem:[#allocation94_spill] sm:$0xff]  ;;  %v4301_v14 = vmul.f32 %v4165_v21, %v4234_v29  ;;  %v4333_v4 = vpop.permute.xlu0 %1464 }
 0x1bb   :  { %v922_v20 = vadd.f32 %v5087_v11, %v4183_v10  ;;  %v2112_v63 = vrot.slane %v4268_v60, 2  ;;  %v5089_v50 = vld [vmem:[#allocation10_spill] sm:$0xff]  ;;  %v5090_v10 = vld [vmem:[#allocation11_spill] sm:$0xff]  ;;  %2022 = vrot.lane.b32.xlu1 %v4192_v9, %s2561_s0  ;;  %v4316_v17 = vmul.f32 %v4158_v43, %v4285_v18  ;;  %v5092_v39 = vrot.slane %v3864_v40, 2  ;;  %v5098_v40 = vld [vmem:[#allocation100_spill] sm:$0xff] }
 0x1bc   :  { %v1317_v47 = vadd.f32 %v3929_v41, %v1237_v35  ;;  %v1319_v37 = vadd.f32 %v3980_v27, %v1239_v33  ;;  %v4305_v49 = vadd.f32 %v1471_v53, %v1383_v57  ;;  %v972_v1 = vadd.f32 %v5089_v50, %v896_v2  ;;  %2018 = vrot.lane.b32.xlu0 %v4195_v24, %s2561_s0  ;;  %v5093_v9 = vld [vmem:[#allocation107_spill] sm:$0xff]  ;;  %v5095_v2 = vld [vmem:[#allocation16_spill] sm:$0xff]  ;;  %v4331_v35 = vpop.permute.xlu1 %1468  ;;  %v5099_v33 = vld [vmem:[#allocation13_spill] sm:$0xff] }
 0x1bd   :  { %v974_v31 = vadd.f32 %v5090_v10, %v898_v48  ;;  %v4319_v41 = vstv %s4250_s18  ;;  %v5091_v27 = vrot.slane %v3860_v22, 2  ;;  %v1263_v3 = vadd.f32 %v5092_v39, %v1183_v19  ;;  %v5096_v48 = vld [vmem:[#allocation19_spill] sm:$0xff]  ;;  %v5097_v22 = vld [vmem:[#allocation98_spill] sm:$0xff]  ;;  %v5103_v10 = vld [vmem:[#allocation20_spill] sm:$0xff] }
 0x1be   :  { %v1413_v32 = vadd.f32 %v4151_v30, %v1317_v47  ;;  %v1415_v25 = vadd.f32 %v4187_v26, %v1319_v37  ;;  %v1052_v38 = vadd.f32 %v5093_v9, %v972_v1  ;;  %v996_v16 = vadd.f32 %v5095_v2, %v922_v20  ;;  %v1523_v1 = vpop.permute.xlu0 %1522  ;;  %v5105_v39 = vld [vmem:[#allocation26_spill] sm:$0xff]  ;;  %v5108_v2 = vld [vmem:[#allocation44_spill] sm:$0xff] }
 0x1bf   :  { %v1261_v56 = vadd.f32 %v5091_v27, %v1181_v0  ;;  %v1054_v24 = vadd.f32 %v5094_v42, %v974_v31  ;;  %v998_v59 = vadd.f32 %v5096_v48, %v924_v6  ;;  %v948_v0 = vadd.f32 %v5097_v22, %v870_v23  ;;  %2054 = vrot.lane.b32.xlu1 %v2049_v36, %s2561_s0  ;;  %v5104_v27 = vld [vmem:[#allocation23_spill] sm:$0xff]  ;;  %v5109_v48 = vld [vmem:[#allocation90_spill] sm:$0xff] }
 0x1c0   :  { %v950_v19 = vadd.f32 %v5098_v40, %v872_v7  ;;  %v1351_v26 = vadd.f32 %v4035_v34, %v1263_v3  ;;  %v1084_v57 = vadd.f32 %v5099_v33, %v996_v16  ;;  %v1148_v11 = vadd.f32 %v5100_v5, %v1052_v38  ;;  %2050 = vrot.lane.b32.xlu0 %v2046_v28, %s2561_s0  ;;  %v5102_v34 = vld [vmem:[#allocation9_spill] sm:$0xff]  ;;  %v1527_v50 = vpop.permute.xlu1 %1526  ;;  %v5107_v38 = vld [vmem:[#allocation30_spill] sm:$0xff]  ;;  %v5111_v40 = vld [vmem:[#allocation36_spill] sm:$0xff] }
 0x1c1   :  { %v1349_v30 = vadd.f32 %v4008_v52, %v1261_v56  ;;  %v1150_v20 = vadd.f32 %v5101_v12, %v1054_v24  ;;  %v2109_v6 = vrot.slane %v4301_v14, 2  ;;  %v1489_v7 = vadd.f32 %v4103_v45, %v1415_v25  ;;  %v4366_v45 = vld [vmem:[#allocation2 + $0x50] sm:$0xff]  ;;  %v5106_v25 = vld [vmem:[#allocation27_spill] sm:$0xff]  ;;  %v5113_v5 = vld [vmem:[#allocation33_spill] sm:$0xff] }
 0x1c2   :  { %v1447_v53 = vadd.f32 %v1439_v46, %v1351_v26  ;;  %v1487_v52 = vadd.f32 %v4077_v54, %v1413_v32  ;;  %v1086_v47 = vadd.f32 %v5102_v34, %v998_v59  ;;  %v1180_v37 = vadd.f32 %v3775_v61, %v1084_v57  ;;  %v5110_v22 = vld [vmem:[#allocation18_spill] sm:$0xff]  ;;  %v4385_v26 = vld [vmem:[#allocation2 + $0x20] sm:$0xff]  ;;  %v5112_v33 = vld [vmem:[#allocation35_spill] sm:$0xff] }
 0x1c3   :  { %v1445_v23 = vadd.f32 %v4225_v8, %v1349_v30  ;;  %v4352_v36 = vmul.f32 %v4165_v21, %v4285_v18  ;;  %v4356_v28 = vmul.f32 %v4158_v43, %v4319_v41  ;;  %v4358_v8 = vadd.f32 %v1527_v50, %v1489_v7  ;;  %2086 = vrot.lane.b32.xlu1 %v4261_v51, %s2561_s0  ;;  %v1549_v30 = vpop.permute.xlu0 %1548 }
 0x1c4   :  { %v4360_v46 = vadd.f32 %v1523_v1, %v1487_v52  ;;  %v4364_v54 = vmul.f32 %v4165_v21, %v4319_v41  ;;  %v2102_v61 = vmul.f32 %v4366_v45, %v4234_v29  ;;  %v1020_v31 = vadd.f32 %v5103_v10, %v948_v0  ;;  %2082 = vrot.lane.b32.xlu0 %v4264_v58, %s2561_s0  ;;  %v1553_v51 = vpop.permute.xlu1 %1552  ;;  %v5116_v52 = vld [vmem:[#allocation37_spill] sm:$0xff]  ;;  %v5118_v1 = vld [vmem:[#allocation48_spill] sm:$0xff]  ;;  %s2471_s0 = sld [smem:[#allocation5 + $0x15]] }
 0x1c5   :  { %v1022_v56 = vadd.f32 %v5104_v27, %v950_v19  ;;  %v1182_v3 = vadd.f32 %v5105_v39, %v1086_v47  ;;  %v2144_v32 = vrot.slane %v4316_v17, 2  ;;  %v1236_v9 = vadd.f32 %v5106_v25, %v1148_v11 }
 0x1c6   :  { %v1238_v42 = vadd.f32 %v5107_v38, %v1150_v20  ;;  %v1499_v24 = vadd.f32 %v4161_v15, %v1447_v53  ;;  %v1497_v16 = vadd.f32 %v5108_v2, %v1445_v23  ;;  %v1116_v59 = vadd.f32 %v5109_v48, %v1020_v31  ;;  %v5114_v20 = vld [vmem:[#allocation28_spill] sm:$0xff]  ;;  %v5115_v53 = vld [vmem:[#allocation29_spill] sm:$0xff]  ;;  %v5119_v31 = vld [vmem:[#allocation46_spill] sm:$0xff] }
 0x1c7   :  { %v1118_v0 = vadd.f32 %v5110_v22, %v1022_v56  ;;  %v1260_v19 = vadd.f32 %v5111_v40, %v1180_v37  ;;  %v2100_v58 = vmul.f32 %v4385_v26, %v4234_v29  ;;  %v1316_v57 = vadd.f32 %v5112_v33, %v1236_v9  ;;  %2120 = vrot.lane.b32.xlu1 %v2112_v63, %s2562_s4  ;;  %v5117_v37 = vld [vmem:[#allocation47_spill] sm:$0xff]  ;;  %v1575_v39 = vpop.permute.xlu0 %1574  ;;  %v5124_v40 = vld [vmem:[#allocation42_spill] sm:$0xff] }
 0x1c8   :  { %v1318_v11 = vadd.f32 %v5113_v5, %v1238_v42  ;;  %v4391_v15 = vadd.f32 %v1553_v51, %v1499_v24  ;;  %v4393_v12 = vadd.f32 %v1549_v30, %v1497_v16  ;;  %v1212_v23 = vadd.f32 %v5114_v20, %v1116_v59  ;;  %2116 = vrot.lane.b32.xlu0 %v2109_v6, %s2562_s4  ;;  %v1579_v56 = vpop.permute.xlu1 %1578  ;;  %v5125_v51 = vld [vmem:[#allocation40_spill] sm:$0xff]  ;;  %v5126_v5 = vld [vmem:[#allocation43_spill] sm:$0xff]  ;;  %v5128_v20 = vld [vmem:[#allocation41_spill] sm:$0xff] }
 0x1c9   :  { %v1214_v7 = vadd.f32 %v5115_v53, %v1118_v0  ;;  %v1262_v34 = vadd.f32 %v5116_v52, %v1182_v3  ;;  %v2141_v29 = vrot.slane %v4352_v36, 2  ;;  %v1412_v47 = vadd.f32 %v4153_v44, %v1316_v57  ;;  %v5120_v36 = vld [vmem:[#allocation34_spill] sm:$0xff] }
 0x1ca   :  { %v1414_v50 = vadd.f32 %v5117_v37, %v1318_v11  ;;  %v1509_v10 = vadd.f32 %v5118_v1, %v4305_v49  ;;  %v1507_v27 = vadd.f32 %v5119_v31, %v4274_v55  ;;  %v2176_v3 = vrot.slane %v4356_v28, 2  ;;  %v5121_v44 = vld [vmem:[#allocation38_spill] sm:$0xff]  ;;  %v5122_v49 = vld [vmem:[#allocation31_spill] sm:$0xff]  ;;  %v5123_v55 = vld [vmem:[#allocation32_spill] sm:$0xff] }
 0x1cb   :  { %v2111_v25 = vrot.slane %v2102_v61, 2  ;;  %v2108_v9 = vrot.slane %v2100_v58, 2  ;;  %v2134_v38 = vmul.f32 %v4366_v45, %v4285_v18  ;;  %v1348_v42 = vadd.f32 %v5120_v36, %v1260_v19  ;;  %2152 = vrot.lane.b32.xlu1 %v2144_v32, %s2562_s4  ;;  %v1521_v33 = vpop.permute.xlu0 %1520 }
 0x1cc   :  { %v1350_v24 = vadd.f32 %v5121_v44, %v1262_v34  ;;  %v4416_v2 = vadd.f32 %v1579_v56, %v1509_v10  ;;  %v4418_v16 = vadd.f32 %v1575_v39, %v1507_v27  ;;  %v1284_v48 = vadd.f32 %v5122_v49, %v1212_v23  ;;  %2148 = vrot.lane.b32.xlu0 %v2141_v29, %s2562_s4  ;;  %v1525_v58 = vpop.permute.xlu1 %1524 }
 0x1cd   :  { %v1286_v59 = vadd.f32 %v5123_v55, %v1214_v7  ;;  %v2173_v28 = vrot.slane %v4364_v54, 2  ;;  %v2132_v61 = vmul.f32 %v4385_v26, %v4285_v18  ;;  %v1444_v22 = vadd.f32 %v4227_v13, %v1348_v42 }
 0x1ce   :  { %v1446_v0 = vadd.f32 %v4297_v62, %v1350_v24  ;;  %v1488_v19 = vadd.f32 %v5124_v40, %v1414_v50  ;;  %v1486_v30 = vadd.f32 %v5125_v51, %v1412_v47  ;;  %v2113_v57 = vsel %vm511_vm1, %v2111_v25, %v2112_v63  ;;  %v5127_v62 = vld [vmem:[#allocation39_spill] sm:$0xff]  ;;  %v5129_v47 = vld [vmem:[#allocation49_spill] sm:$0xff] }
 0x1cf   :  { %v2110_v54 = vsel %vm511_vm1, %v2108_v9, %v2109_v6  ;;  %v1504_v18 = vmul.f32 %v4366_v45, %v5126_v5  ;;  %v1502_v13 = vmul.f32 %v4385_v26, %v5126_v5  ;;  %v1380_v11 = vadd.f32 %v5127_v62, %v1284_v48  ;;  %2184 = vrot.lane.b32.xlu1 %v2176_v3, %s2562_s4  ;;  %v5130_v50 = vld [vmem:[#allocation45_spill] sm:$0xff]  ;;  %v1547_v31 = vpop.permute.xlu0 %1546 }
 0x1d0   :  { %v1382_v23 = vadd.f32 %v5128_v20, %v1286_v59  ;;  %v1534_v53 = vadd.f32 %v1525_v58, %v1488_v19  ;;  %v1532_v7 = vadd.f32 %v1521_v33, %v1486_v30  ;;  %2180 = vrot.lane.b32.xlu0 %v2173_v28, %s2562_s4  ;;  %v2143_v60 = vrot.slane %v2134_v38, 2  ;;  %v1551_v10 = vpop.permute.xlu1 %1550 }
 0x1d1   :  { %v2140_v14 = vrot.slane %v2132_v61, 2  ;;  %v2166_v63 = vmul.f32 %v4366_v45, %v4319_v41  ;;  %v2164_v6 = vmul.f32 %v4385_v26, %v4319_v41  ;;  %v1476_v34 = vadd.f32 %v4333_v4, %v1380_v11 }
 0x1d2   :  { %v1478_v52 = vadd.f32 %v4331_v35, %v1382_v23  ;;  %v1498_v37 = vadd.f32 %v5129_v47, %v1446_v0  ;;  %v1496_v1 = vadd.f32 %v5130_v50, %v1444_v22  ;;  %v2145_v41 = vsel %vm511_vm1, %v2143_v60, %v2144_v32 }
 0x1d3   :  { %2118 = vrot.lane.b32.xlu1 %v2113_v57, %s2562_s4  ;;  %v2142_v35 = vsel %vm511_vm1, %v2140_v14, %v2141_v29  ;;  %v1506_v4 = vadd.f32 %v1502_v13, %v1476_v34  ;;  %v2175_v25 = vrot.slane %v2166_v63, 2  ;;  %v2172_v9 = vrot.slane %v2164_v6, 2  ;;  %v1573_v36 = vpop.permute.xlu0 %1572 }
 0x1d4   :  { %v1560_v27 = vadd.f32 %v1551_v10, %v1498_v37  ;;  %v1558_v56 = vadd.f32 %v1547_v31, %v1496_v1  ;;  %2114 = vrot.lane.b32.xlu0 %v2110_v54, %s2562_s4  ;;  %v1508_v39 = vadd.f32 %v1504_v18, %v1478_v52  ;;  %v1577_v38 = vpop.permute.xlu1 %1576  ;;  %v1667_v19 = vstv %s2471_s0 }
 0x1d5   :  { %v1584_v44 = vadd.f32 %v1573_v36, %v1506_v4  ;;  %v2177_v24 = vsel %vm511_vm1, %v2175_v25, %v2176_v3  ;;  %v2174_v17 = vsel %vm511_vm1, %v2172_v9, %v2173_v28  ;;  %v1671_v58 = vmul.f32 %v4158_v43, %v1667_v19 }
 0x1d6   :  { %v1586_v42 = vadd.f32 %v1577_v38, %v1508_v39  ;;  %v1669_v33 = vmul.f32 %v4165_v21, %v1667_v19  ;;  %v1715_v62 = vstv %s2473_s20  ;;  %v1670_v34 = vmul.f32 %v4366_v45, %v1667_v19 }
 0x1d7   :  { %2150 = vrot.lane.b32.xlu1 %v2145_v41, %s2562_s4  ;;  %v1601_v32 = vpop.permute.xlu0 %1600  ;;  %v1719_v14 = vmul.f32 %v4158_v43, %v1715_v62  ;;  %v1717_v63 = vmul.f32 %v4165_v21, %v1715_v62  ;;  %v1668_v47 = vmul.f32 %v4385_v26, %v1667_v19 }
 0x1d8   :  { %2146 = vrot.lane.b32.xlu0 %v2142_v35, %s2562_s4  ;;  %v1605_v49 = vpop.permute.xlu1 %1604  ;;  %v1611_v48 = vadd.f32 %v1601_v32, %v4360_v46  ;;  %v1677_v13 = vrot.slane %v1669_v33, 1  ;;  %v1679_v35 = vrot.slane %v1670_v34, 1 }
 0x1d9   :  { %v1613_v29 = vadd.f32 %v1605_v49, %v4358_v8  ;;  %v1728_v31 = vrot.slane %v1719_v14, 1  ;;  %v1676_v39 = vrot.slane %v1668_v47, 1 }
 0x1da   :  { %v1687_v52 = vadd.f32 %v1677_v13, %v1611_v48 }
 0x1db   :  { %2182 = vrot.lane.b32.xlu1 %v2177_v24, %s2562_s4  ;;  %v1627_v59 = vpop.permute.xlu0 %1626  ;;  %v1678_v49 = vsel %vm246_vm0, %v1676_v39, %v1677_v13 }
 0x1dc   :  { %2178 = vrot.lane.b32.xlu0 %v2174_v17, %s2562_s4  ;;  %v1631_v55 = vpop.permute.xlu1 %1630  ;;  %v1637_v22 = vadd.f32 %v1627_v59, %v4393_v12  ;;  %v1718_v59 = vmul.f32 %v4366_v45, %v1715_v62  ;;  %s2480_s4 = sld [smem:[#allocation5 + $0x18]] }
 0x1dd   :  { %v1639_v61 = vadd.f32 %v1631_v55, %v4391_v15  ;;  %v1691_v15 = vstv %s2472_s19 }
 0x1de   :  { %v1695_v18 = vmul.f32 %v4158_v43, %v1691_v15  ;;  %v1694_v9 = vmul.f32 %v4366_v45, %v1691_v15  ;;  %v1692_v38 = vmul.f32 %v4385_v26, %v1691_v15 }
 0x1df   :  { %v1653_v28 = vpop.permute.xlu0 %1652 }
 0x1e0   :  { %v1657_v3 = vpop.permute.xlu1 %1656  ;;  %v1663_v8 = vadd.f32 %v1653_v28, %v4418_v16  ;;  %v1680_v16 = vrot.slane %v1671_v58, 1  ;;  %v1703_v48 = vrot.slane %v1694_v9, 1  ;;  %v1700_v55 = vrot.slane %v1692_v38, 1 }
 0x1e1   :  { %v1665_v0 = vadd.f32 %v1657_v3, %v4416_v2  ;;  %v1693_v2 = vmul.f32 %v4165_v21, %v1691_v15  ;;  %v1727_v58 = vrot.slane %v1718_v59, 1 }
 0x1e2   :  { %v1689_v6 = vadd.f32 %v1680_v16, %v1613_v29  ;;  %v1681_v17 = vsel %vm246_vm0, %v1679_v35, %v1680_v16  ;;  %v1931_v9 = vstv %s2480_s4 }
 0x1e3   :  { %v1599_v40 = vpop.permute.xlu0 %1598  ;;  %v1701_v60 = vrot.slane %v1693_v2, 1  ;;  %v1729_v13 = vsel %vm246_vm0, %v1727_v58, %v1728_v31 }
 0x1e4   :  { %v1603_v46 = vpop.permute.xlu1 %1602  ;;  %v1610_v30 = vadd.f32 %v1599_v40, %v1532_v7  ;;  %v1704_v7 = vrot.slane %v1695_v18, 1 }
 0x1e5   :  { %v1612_v51 = vadd.f32 %v1603_v46, %v1534_v53  ;;  %v1711_v41 = vadd.f32 %v1701_v60, %v1637_v22  ;;  %v1702_v19 = vsel %vm246_vm0, %v1700_v55, %v1701_v60 }
 0x1e6   :  { %v1686_v46 = vadd.f32 %v1678_v49, %v1610_v30  ;;  %v1705_v40 = vsel %vm246_vm0, %v1703_v48, %v1704_v7  ;;  %v1955_v49 = vstv %s2481_s21 }
 0x1e7   :  { %v1625_v12 = vpop.permute.xlu0 %1624  ;;  %v1688_v28 = vadd.f32 %v1681_v17, %v1612_v51  ;;  %v1933_v17 = vmul.f32 %v4165_v21, %v1931_v9  ;;  %v1959_v48 = vmul.f32 %v4158_v43, %v1955_v49  ;;  %v1957_v55 = vmul.f32 %v4165_v21, %v1955_v49 }
 0x1e8   :  { %v1629_v57 = vpop.permute.xlu1 %1628  ;;  %v1636_v5 = vadd.f32 %v1625_v12, %v1558_v56  ;;  %v1713_v56 = vadd.f32 %v1704_v7, %v1639_v61  ;;  %v1716_v61 = vmul.f32 %v4385_v26, %v1715_v62 }
 0x1e9   :  { %v1638_v54 = vadd.f32 %v1629_v57, %v1560_v27  ;;  %v1725_v27 = vrot.slane %v1717_v63, 1 }
 0x1ea   :  { %v1724_v33 = vrot.slane %v1716_v61, 1  ;;  %v1710_v18 = vadd.f32 %v1702_v19, %v1636_v5  ;;  %v1932_v19 = vmul.f32 %v4385_v26, %v1931_v9 }
 0x1eb   :  { %v1651_v20 = vpop.permute.xlu0 %1650  ;;  %v1735_v24 = vadd.f32 %v1725_v27, %v1663_v8  ;;  %v1712_v12 = vadd.f32 %v1705_v40, %v1638_v54 }
 0x1ec   :  { %v1655_v11 = vpop.permute.xlu1 %1654  ;;  %v1662_v53 = vadd.f32 %v1651_v20, %v1584_v44  ;;  %v1737_v44 = vadd.f32 %v1728_v31, %v1665_v0  ;;  %v1726_v51 = vsel %vm246_vm0, %v1724_v33, %v1725_v27 }
 0x1ed   :  { %v1664_v23 = vadd.f32 %v1655_v11, %v1586_v42 }
 0x1ee   :  { %v1734_v20 = vadd.f32 %v1726_v51, %v1662_v53 }
 0x1ef   :  { %v1757_v50 = vpop.permute.xlu0 %1756  ;;  %v1736_v11 = vadd.f32 %v1729_v13, %v1664_v23 }
 0x1f0   :  { %v1761_v37 = vpop.permute.xlu1 %1760  ;;  %v4483_v10 = vadd.f32 %v1757_v50, %v1687_v52 }
 0x1f1   :  { %v4481_v1 = vadd.f32 %v1761_v37, %v1689_v6 }
 0x1f3   :  { %v1789_v25 = vpop.permute.xlu0 %1788 }
 0x1f4   :  { %v1793_v4 = vpop.permute.xlu1 %1792  ;;  %v4489_v42 = vadd.f32 %v1789_v25, %v1711_v41 }
 0x1f5   :  { %v4487_v36 = vadd.f32 %v1793_v4, %v1713_v56 }
 0x1f7   :  { %v1821_v29 = vpop.permute.xlu0 %1820 }
 0x1f8   :  { %v1825_v32 = vpop.permute.xlu1 %1824  ;;  %v4497_v3 = vadd.f32 %v1821_v29, %v1735_v24  ;;  %v1935_v24 = vmul.f32 %v4158_v43, %v1931_v9  ;;  %v1934_v29 = vmul.f32 %v4366_v45, %v1931_v9 }
 0x1f9   :  { %v4495_v22 = vadd.f32 %v1825_v32, %v1737_v44  ;;  %v1979_v32 = vstv %s2482_s1 }
 0x1fa   :  { %v1983_v40 = vmul.f32 %v4158_v43, %v1979_v32  ;;  %v4549_v58 = vmul.f32 %v4165_v21, %v1979_v32  ;;  %v1943_v33 = vrot.slane %v1934_v29, 2  ;;  %v1940_v43 = vrot.slane %v1932_v19, 2 }
 0x1fb   :  { %v1755_v8 = vpop.permute.xlu0 %1754  ;;  %v1956_v21 = vmul.f32 %v4385_v26, %v1955_v49 }
 0x1fc   :  { %v1759_v0 = vpop.permute.xlu1 %1758  ;;  %v4503_v57 = vadd.f32 %v1755_v8, %v1686_v46  ;;  %v1941_v8 = vrot.slane %v1933_v17, 2 }
 0x1fd   :  { %v4501_v15 = vadd.f32 %v1759_v0, %v1688_v28  ;;  %v1944_v0 = vrot.slane %v1935_v24, 2 }
 0x1ff   :  { %v1787_v16 = vpop.permute.xlu0 %1786 }
 0x200   :  { %v1791_v2 = vpop.permute.xlu1 %1790  ;;  %v4509_v62 = vadd.f32 %v1787_v16, %v1710_v18  ;;  %v1965_v16 = vrot.slane %v1957_v55, 2  ;;  %v1980_v55 = vmul.f32 %v4385_v26, %v1979_v32 }
 0x201   :  { %v4507_v30 = vadd.f32 %v1791_v2, %v1712_v12  ;;  %v1968_v2 = vrot.slane %v1959_v48, 2  ;;  %v1964_v48 = vrot.slane %v1956_v21, 2 }
 0x203   :  { %v1819_v60 = vpop.permute.xlu0 %1818 }
 0x204   :  { %v1823_v7 = vpop.permute.xlu1 %1822  ;;  %v4513_v63 = vadd.f32 %v1819_v60, %v1734_v20  ;;  %v1958_v20 = vmul.f32 %v4366_v45, %v1955_v49 }
 0x205   :  { %v4511_v14 = vadd.f32 %v1823_v7, %v1736_v11  ;;  %v1992_v11 = vrot.slane %v1983_v40, 2 }
 0x207   :  { %v1853_v5 = vpop.permute.xlu0 %1852 }
 0x208   :  { %v1857_v54 = vpop.permute.xlu1 %1856  ;;  %v1863_v46 = vadd.f32 %v1853_v5, %v4483_v10 }
 0x209   :  { %v1865_v28 = vadd.f32 %v1857_v54, %v4481_v1 }
 0x20a   :  { %v1951_v51 = vadd.f32 %v1941_v8, %v1863_v46 }
 0x20b   :  { %v1885_v52 = vpop.permute.xlu0 %1884  ;;  %v1953_v10 = vadd.f32 %v1944_v0, %v1865_v28 }
 0x20c   :  { %v1889_v6 = vpop.permute.xlu1 %1888  ;;  %v1895_v18 = vadd.f32 %v1885_v52, %v4489_v42  ;;  %v1945_v42 = vsel %vm511_vm1, %v1943_v33, %v1944_v0  ;;  %v1988_v33 = vrot.slane %v1980_v55, 2 }
 0x20d   :  { %v1897_v12 = vadd.f32 %v1889_v6, %v4487_v36  ;;  %v1989_v36 = vrot.slane %v4549_v58, 2  ;;  %v1982_v6 = vmul.f32 %v4366_v45, %v1979_v32  ;;  %v1966_v58 = vsel %vm511_vm1, %v1964_v48, %v1965_v16 }
 0x20e   :  { %v1975_v5 = vadd.f32 %v1965_v16, %v1895_v18 }
 0x20f   :  { %v1917_v47 = vpop.permute.xlu0 %1916  ;;  %v1977_v54 = vadd.f32 %v1968_v2, %v1897_v12 }
 0x210   :  { %v1921_v34 = vpop.permute.xlu1 %1920  ;;  %v1927_v17 = vadd.f32 %v1917_v47, %v4497_v3  ;;  %v1991_v47 = vrot.slane %v1982_v6, 2 }
 0x211   :  { %v1929_v24 = vadd.f32 %v1921_v34, %v4495_v22 }
 0x212   :  { %v1999_v26 = vadd.f32 %v1989_v36, %v1927_v17 }
 0x213   :  { %v4517_v50 = vpop.permute.xlu0 %1850  ;;  %v2001_v19 = vadd.f32 %v1992_v11, %v1929_v24 }
 0x214   :  { %v4515_v37 = vpop.permute.xlu1 %1854  ;;  %v1862_v34 = vadd.f32 %v4517_v50, %v4503_v57 }
 0x215   :  { %v1864_v3 = vadd.f32 %v4515_v37, %v4501_v15 }
 0x217   :  { %v4521_v23 = vpop.permute.xlu0 %1882  ;;  %v1952_v18 = vadd.f32 %v1945_v42, %v1864_v3 }
 0x218   :  { %v4519_v31 = vpop.permute.xlu1 %1886 }
 0x21b   :  { %v4525_v27 = vpop.permute.xlu0 %1914 }
 0x21c   :  { %v4523_v53 = vpop.permute.xlu1 %1918 }
 0x21f   :  { %v2021_v41 = vpop.permute.xlu0 %2020 }
 0x220   :  { %v2025_v56 = vpop.permute.xlu1 %2024  ;;  %v2031_v60 = vadd.f32 %v2021_v41, %v1951_v51  ;;  %v1967_v41 = vrot.slane %v1958_v20, 2  ;;  %v1896_v20 = vadd.f32 %v4519_v31, %v4507_v30 }
 0x221   :  { %v2033_v7 = vadd.f32 %v2025_v56, %v1953_v10  ;;  %v1942_v56 = vsel %vm511_vm1, %v1940_v43, %v1941_v8 }
 0x222   :  { %v1969_v32 = vsel %vm511_vm1, %v1967_v41, %v1968_v2  ;;  %v1950_v10 = vadd.f32 %v1942_v56, %v1862_v34  ;;  %v1993_v2 = vsel %vm511_vm1, %v1991_v47, %v1992_v11  ;;  %v1990_v11 = vsel %vm511_vm1, %v1988_v33, %v1989_v36 }
 0x225   :  { %v2057_v35 = vpop.permute.xlu1 %2056  ;;  %v2053_v39 = vpop.permute.xlu0 %2052 }
 0x226   :  { %v2065_v28 = vadd.f32 %v2057_v35, %v1977_v54  ;;  %v2063_v46 = vadd.f32 %v2053_v39, %v1975_v5 }
 0x229   :  { %v4527_v4 = vpop.permute.xlu1 %2088 }
 0x22a   :  { %v4529_v25 = vpop.permute.xlu0 %2084  ;;  %v2097_v37 = vadd.f32 %v4527_v4, %v2001_v19  ;;  %v1894_v4 = vadd.f32 %v4521_v23, %v4509_v62 }
 0x22b   :  { %v2095_v57 = vadd.f32 %v4529_v25, %v1999_v26 }
 0x22c   :  { %v1974_v36 = vadd.f32 %v1966_v58, %v1894_v4 }
 0x22d   :  { %v4531_v38 = vpop.permute.xlu1 %2022 }
 0x22e   :  { %v4533_v44 = vpop.permute.xlu0 %2018  ;;  %v2032_v54 = vadd.f32 %v4531_v38, %v1952_v18  ;;  %v1976_v38 = vadd.f32 %v1969_v32, %v1896_v20 }
 0x22f   :  { %v2030_v30 = vadd.f32 %v4533_v44, %v1950_v10 }
 0x231   :  { %v4540_v59 = vpop.permute.xlu1 %2054 }
 0x232   :  { %v4542_v61 = vpop.permute.xlu0 %2050  ;;  %v2064_v24 = vadd.f32 %v4540_v59, %v1976_v38 }
 0x233   :  { %v2062_v17 = vadd.f32 %v4542_v61, %v1974_v36 }
 0x235   :  { %v4553_v13 = vpop.permute.xlu1 %2086 }
 0x236   :  { %v4555_v1 = vpop.permute.xlu0 %2082 }
 0x239   :  { %v2121_v52 = vpop.permute.xlu1 %2120 }
 0x23a   :  { %v2117_v9 = vpop.permute.xlu0 %2116  ;;  %v4564_v29 = vadd.f32 %v2121_v52, %v2033_v7  ;;  %v1928_v7 = vadd.f32 %v4523_v53, %v4511_v14 }
 0x23b   :  { %v4566_v49 = vadd.f32 %v2117_v9, %v2031_v60  ;;  %v1926_v60 = vadd.f32 %v4525_v27, %v4513_v63 }
 0x23c   :  { %v2200_v22 = vsel %vm2198_vm2, %v4564_v29, 0.0  ;;  %v2219_v14 = vmul.f32 %v4564_v29, %v4564_v29  ;;  %v2000_v6 = vadd.f32 %v1993_v2, %v1928_v7 }
 0x23d   :  { %v2199_v45 = vsel %vm2198_vm2, %v4566_v49, 0.0  ;;  %v2153_v0 = vpop.permute.xlu1 %2152  ;;  %v2217_v63 = vmul.f32 %v4566_v49, %v4566_v49  ;;  %v1998_v52 = vadd.f32 %v1990_v11, %v1926_v60 }
 0x23e   :  { %v2149_v8 = vpop.permute.xlu0 %2148  ;;  %v2201_v40 = vadd.f32 %v2200_v22, %v2199_v45  ;;  %v4578_v35 = vadd.f32 %v2153_v0, %v2065_v28  ;;  %v2224_v22 = vsel %vm2198_vm2, %v2219_v14, 0.0 }
 0x23f   :  { %v4580_v39 = vadd.f32 %v2149_v8, %v2063_v46  ;;  %v2223_v45 = vsel %vm2198_vm2, %v2217_v63, 0.0  ;;  %v2096_v8 = vadd.f32 %v4553_v13, %v2000_v6 }
 0x240   :  { %v2205_v15 = vsel %vm2198_vm2, %v2201_v40, 0.0  ;;  %v2265_v12 = vsel %vm2198_vm2, %v4578_v35, 0.0  ;;  %v2284_v59 = vmul.f32 %v4578_v35, %v4578_v35  ;;  %v2094_v40 = vadd.f32 %v4555_v1, %v1998_v52 }
 0x241   :  { %2206 = vadd.xlane.f32.xlu0 %v2205_v15  ;;  %v2264_v50 = vsel %vm2198_vm2, %v4580_v39, 0.0  ;;  %v2185_v51 = vpop.permute.xlu1 %2184  ;;  %v2282_v48 = vmul.f32 %v4580_v39, %v4580_v39  ;;  %v2225_v15 = vadd.f32 %v2224_v22, %v2223_v45 }
 0x242   :  { %v2181_v16 = vpop.permute.xlu0 %2180  ;;  %v2266_v43 = vadd.f32 %v2265_v12, %v2264_v50  ;;  %v4596_v25 = vadd.f32 %v2185_v51, %v2097_v37  ;;  %v2289_v1 = vsel %vm2198_vm2, %v2284_v59, 0.0 }
 0x243   :  { %v4598_v21 = vadd.f32 %v2181_v16, %v2095_v57  ;;  %v2288_v37 = vsel %vm2198_vm2, %v2282_v48, 0.0  ;;  %v2229_v7 = vsel %vm2198_vm2, %v2225_v15, 0.0 }
 0x244   :  { %v2270_v42 = vsel %vm2198_vm2, %v2266_v43, 0.0  ;;  %v2330_v31 = vsel %vm2198_vm2, %v4596_v25, 0.0  ;;  %v2349_v47 = vmul.f32 %v4596_v25, %v4596_v25  ;;  %v2290_v60 = vadd.f32 %v2289_v1, %v2288_v37 }
 0x245   :  { %2271 = vadd.xlane.f32.xlu1 %v2270_v42  ;;  %v2329_v62 = vsel %vm2198_vm2, %v4598_v21, 0.0  ;;  %v2119_v23 = vpop.permute.xlu1 %2118  ;;  %v2347_v61 = vmul.f32 %v4598_v21, %v4598_v21 }
 0x246   :  { %v2115_v53 = vpop.permute.xlu0 %2114  ;;  %v2331_v27 = vadd.f32 %v2330_v31, %v2329_v62  ;;  %v4616_v44 = vadd.f32 %v2119_v23, %v2032_v54  ;;  %v2354_v2 = vsel %vm2198_vm2, %v2349_v47, 0.0 }
 0x247   :  { %v4618_v5 = vadd.f32 %v2115_v53, %v2030_v30  ;;  %v2353_v13 = vsel %vm2198_vm2, %v2347_v61, 0.0  ;;  %v2294_v53 = vsel %vm2198_vm2, %v2290_v60, 0.0 }
 0x248   :  { %v2335_v9 = vsel %vm2198_vm2, %v2331_v27, 0.0  ;;  %v2196_v41 = vsel %vm2194_vm3, %v4616_v44, 0.0  ;;  %v2218_v12 = vmul.f32 %v4616_v44, %v4616_v44  ;;  %v2355_v42 = vadd.f32 %v2354_v2, %v2353_v13 }
 0x249   :  { %2336 = vadd.xlane.f32.xlu0 %v2335_v9  ;;  %v2195_v56 = vsel %vm2194_vm3, %v4618_v5, 0.0  ;;  %v2151_v55 = vpop.permute.xlu1 %2150  ;;  %v2216_v18 = vmul.f32 %v4618_v5, %v4618_v5 }
 0x24a   :  { %v2147_v28 = vpop.permute.xlu0 %2146  ;;  %v2197_v46 = vadd.f32 %v2196_v41, %v2195_v56  ;;  %v4635_v3 = vadd.f32 %v2151_v55, %v2064_v24  ;;  %v2221_v30 = vsel %vm2194_vm3, %v2218_v12, 0.0  ;;  %v2359_v23 = vsel %vm2198_vm2, %v2355_v42, 0.0 }
 0x24b   :  { %v4637_v34 = vadd.f32 %v2147_v28, %v2062_v17  ;;  %v2220_v54 = vsel %vm2194_vm3, %v2216_v18, 0.0 }
 0x24c   :  { %v2202_v0 = vsel %vm2194_vm3, %v2197_v46, 0.0  ;;  %v2262_v26 = vsel %vm2194_vm3, %v4635_v3, 0.0  ;;  %v2283_v51 = vmul.f32 %v4635_v3, %v4635_v3  ;;  %v2222_v38 = vadd.f32 %v2221_v30, %v2220_v54 }
 0x24d   :  { %2203 = vadd.xlane.f32.xlu0 %v2202_v0  ;;  %v2261_v19 = vsel %vm2194_vm3, %v4637_v34, 0.0  ;;  %v2183_v32 = vpop.permute.xlu1 %2182  ;;  %v2281_v16 = vmul.f32 %v4637_v34, %v4637_v34 }
 0x24e   :  { %v2179_v58 = vpop.permute.xlu0 %2178  ;;  %v2263_v33 = vadd.f32 %v2262_v26, %v2261_v19  ;;  %v4649_v57 = vadd.f32 %v2183_v32, %v2096_v8  ;;  %v2286_v63 = vsel %vm2194_vm3, %v2283_v51, 0.0  ;;  %v2226_v9 = vsel %vm2194_vm3, %v2222_v38, 0.0 }
 0x24f   :  { %v4651_v50 = vadd.f32 %v2179_v58, %v2094_v40  ;;  %v2285_v14 = vsel %vm2194_vm3, %v2281_v16, 0.0 }
 0x250   :  { %v2267_v10 = vsel %vm2194_vm3, %v2263_v33, 0.0  ;;  %v2327_v20 = vsel %vm2194_vm3, %v4649_v57, 0.0  ;;  %v2348_v62 = vmul.f32 %v4649_v57, %v4649_v57  ;;  %v2287_v27 = vadd.f32 %v2286_v63, %v2285_v14 }
 0x251   :  { %2268 = vadd.xlane.f32.xlu1 %v2267_v10  ;;  %v2326_v43 = vsel %vm2194_vm3, %v4651_v50, 0.0  ;;  %v2346_v31 = vmul.f32 %v4651_v50, %v4651_v50 }
 0x252   :  { %v2328_v4 = vadd.f32 %v2327_v20, %v2326_v43  ;;  %v2351_v6 = vsel %vm2194_vm3, %v2348_v62, 0.0  ;;  %v2291_v52 = vsel %vm2194_vm3, %v2287_v27, 0.0 }
 0x253   :  { %v2350_v36 = vsel %vm2194_vm3, %v2346_v31, 0.0 }
 0x254   :  { %v2332_v11 = vsel %vm2194_vm3, %v2328_v4, 0.0  ;;  %v2352_v24 = vadd.f32 %v2351_v6, %v2350_v36 }
 0x255   :  { %2230 = vadd.xlane.f32.xlu1 %v2229_v7  ;;  %2333 = vadd.xlane.f32.xlu0 %v2332_v11 }
 0x256   :  { %v2356_v17 = vsel %vm2194_vm3, %v2352_v24, 0.0 }
 0x259   :  { %2360 = vadd.xlane.f32.xlu1 %v2359_v23  ;;  %2295 = vadd.xlane.f32.xlu0 %v2294_v53 }
 0x25d   :  { %2292 = vadd.xlane.f32.xlu1 %v2291_v52  ;;  %2227 = vadd.xlane.f32.xlu0 %v2226_v9 }
 0x261   :  { %2357 = vadd.xlane.f32.xlu0 %v2356_v17 }
 0x2ce   :  { %v2207_v56 = vpop.xlane.xlu0 %2206 }
 0x2cf   :  { %v2208_v48 = vsel %vm511_vm1, %v2207_v56, 0.0 }
 0x2d2   :  { %v2272_v55 = vpop.xlane.xlu1 %2271 }
 0x2d3   :  { %v2273_v45 = vsel %vm511_vm1, %v2272_v55, 0.0 }
 0x2d6   :  { %v2337_v41 = vpop.xlane.xlu0 %2336 }
 0x2d7   :  { %v2338_v0 = vsel %vm511_vm1, %v2337_v41, 0.0 }
 0x2da   :  { %v2204_v28 = vpop.xlane.xlu0 %2203 }
 0x2db   :  { %v2209_v46 = vadd.f32 %v2208_v48, %v2204_v28 }
 0x2dd   :  { %v2210_v22 = vrot.slane %v2209_v46, 4 }
 0x2de   :  { %v2269_v59 = vpop.xlane.xlu1 %2268 }
 0x2df   :  { %v2274_v61 = vadd.f32 %v2273_v45, %v2269_v59  ;;  %v2211_v8 = vadd.f32 %v2210_v22, %v2209_v46 }
 0x2e1   :  { %v2275_v47 = vrot.slane %v2274_v61, 4  ;;  %v2212_v15 = vrot.slane %v2211_v8, 2 }
 0x2e2   :  { %v2231_v40 = vpop.xlane.xlu1 %2230  ;;  %v2334_v19 = vpop.xlane.xlu0 %2333 }
 0x2e3   :  { %v2276_v26 = vadd.f32 %v2275_v47, %v2274_v61  ;;  %v2339_v32 = vadd.f32 %v2338_v0, %v2334_v19  ;;  %v2213_v10 = vadd.f32 %v2212_v15, %v2211_v8  ;;  %v2232_v43 = vsel %vm511_vm1, %v2231_v40, 0.0 }
 0x2e5   :  { %v2277_v58 = vrot.slane %v2276_v26, 2  ;;  %v2340_v33 = vrot.slane %v2339_v32, 4  ;;  %v2214_v42 = vrot.slane %v2213_v10, 1 }
 0x2e6   :  { %v2361_v37 = vpop.xlane.xlu1 %2360  ;;  %v2296_v13 = vpop.xlane.xlu0 %2295 }
 0x2e7   :  { %v2341_v1 = vadd.f32 %v2340_v33, %v2339_v32  ;;  %v2278_v12 = vadd.f32 %v2277_v58, %v2276_v26  ;;  %v2297_v2 = vsel %vm511_vm1, %v2296_v13, 0.0  ;;  %v2362_v54 = vsel %vm511_vm1, %v2361_v37, 0.0 }
 0x2e8   :  { %v2215_v36 = vadd.f32 %v2214_v42, %v2213_v10 }
 0x2e9   :  { %v2342_v18 = vrot.slane %v2341_v1, 2  ;;  %v2279_v7 = vrot.slane %v2278_v12, 1 }
 0x2ea   :  { %v2293_v51 = vpop.xlane.xlu1 %2292  ;;  %v2228_v16 = vpop.xlane.xlu0 %2227  ;;  %v2240_v55 = vmul.f32 0.0025510204, %v2215_v36 }
 0x2eb   :  { %v2298_v20 = vadd.f32 %v2297_v2, %v2293_v51  ;;  %v2233_v4 = vadd.f32 %v2232_v43, %v2228_v16  ;;  %v2343_v60 = vadd.f32 %v2342_v18, %v2341_v1  ;;  %v2280_v23 = vadd.f32 %v2279_v7, %v2278_v12 }
 0x2ec   :  { %v2242_v8 = vmul.f32 %v2240_v55, %v2240_v55  ;;  %v2313_v12 = vstv %s2491_s22  ;;  %v2248_v18 = vstv %s2489_s23  ;;  %v2316_v16 = vstv %s2492_s24 }
 0x2ed   :  { %v2299_v11 = vrot.slane %v2298_v20, 4  ;;  %v2234_v30 = vrot.slane %v2233_v4, 4  ;;  %v2344_v53 = vrot.slane %v2343_v60, 1  ;;  %v2305_v17 = vmul.f32 0.0025510204, %v2280_v23 }
 0x2ee   :  { %v2358_v62 = vpop.xlane.xlu0 %2357  ;;  %v2251_v7 = vstv %s2490_s26 }
 0x2ef   :  { %v2300_v31 = vadd.f32 %v2299_v11, %v2298_v20  ;;  %v2363_v14 = vadd.f32 %v2362_v54, %v2358_v62  ;;  %v2235_v63 = vadd.f32 %v2234_v30, %v2233_v4  ;;  %v2345_v56 = vadd.f32 %v2344_v53, %v2343_v60 }
 0x2f0   :  { %v2307_v59 = vmul.f32 %v2305_v17, %v2305_v17  ;;  %v2378_v20 = vstv %s2493_s25  ;;  %v2381_v60 = vstv %s4692_s27 }
 0x2f1   :  { %v2301_v27 = vrot.slane %v2300_v31, 2  ;;  %v2364_v38 = vrot.slane %v2363_v14, 4  ;;  %v2236_v6 = vrot.slane %v2235_v63, 2  ;;  %v2370_v61 = vmul.f32 0.0025510204, %v2345_v56 }
 0x2f3   :  { %v2302_v52 = vadd.f32 %v2301_v27, %v2300_v31  ;;  %v2365_v9 = vadd.f32 %v2364_v38, %v2363_v14  ;;  %v2237_v24 = vadd.f32 %v2236_v6, %v2235_v63  ;;  %v2372_v58 = vmul.f32 %v2370_v61, %v2370_v61 }
 0x2f5   :  { %v2303_v41 = vrot.slane %v2302_v52, 1  ;;  %v2366_v48 = vrot.slane %v2365_v9, 2  ;;  %v2238_v28 = vrot.slane %v2237_v24, 1 }
 0x2f7   :  { %v2304_v46 = vadd.f32 %v2303_v41, %v2302_v52  ;;  %v2367_v45 = vadd.f32 %v2366_v48, %v2365_v9  ;;  %v2239_v22 = vadd.f32 %v2238_v28, %v2237_v24 }
 0x2f9   :  { %v2306_v47 = vmul.f32 0.0025510204, %v2304_v46  ;;  %v2368_v0 = vrot.slane %v2367_v45, 1  ;;  %v2241_v40 = vmul.f32 0.0025510204, %v2239_v22 }
 0x2fb   :  { %v2308_v19 = vsub.f32 %v2306_v47, %v2307_v59  ;;  %v2369_v26 = vadd.f32 %v2368_v0, %v2367_v45  ;;  %v2243_v32 = vsub.f32 %v2241_v40, %v2242_v8 }
 0x2fd   :  { %v2311_v33 = vadd.f32 1e-05, %v2308_v19  ;;  %v2371_v15 = vmul.f32 0.0025510204, %v2369_v26  ;;  %v2246_v37 = vadd.f32 1e-05, %v2243_v32 }
 0x2ff   :  { %2501 = vrsqrt.f32 %v2311_v33  ;;  %v2373_v13 = vsub.f32 %v2371_v15, %v2372_v58 }
 0x300   :  { %2503 = vrsqrt.f32 %v2246_v37 }
 0x301   :  { %v2376_v1 = vadd.f32 1e-05, %v2373_v13 }
 0x303   :  { %2505 = vrsqrt.f32 %v2376_v1 }
 0x309   :  { %v2502_v10 = vpop.eup %2501 }
 0x30a   :  { %v2504_v2 = vpop.eup %2503  ;;  %v2314_v51 = vmul.f32 %v2502_v10, %v2313_v12 }
 0x30b   :  { %v2249_v43 = vmul.f32 %v2504_v2, %v2248_v18 }
 0x30c   :  { %v2315_v4 = vmul.f32 %v2314_v51, %v2305_v17  ;;  %v2318_v42 = vmul.f32 %v2314_v51, %v4637_v34  ;;  %v2319_v54 = vmul.f32 %v2314_v51, %v4580_v39  ;;  %v2320_v30 = vmul.f32 %v2314_v51, %v4635_v3 }
 0x30d   :  { %v2506_v11 = vpop.eup %2505  ;;  %v2250_v62 = vmul.f32 %v2249_v43, %v2240_v55  ;;  %v2321_v14 = vmul.f32 %v2314_v51, %v4578_v35  ;;  %v2253_v63 = vmul.f32 %v2249_v43, %v4618_v5  ;;  %v2254_v27 = vmul.f32 %v2249_v43, %v4566_v49 }
 0x30e   :  { %v2317_v31 = vsub.f32 %v2316_v16, %v2315_v4  ;;  %v2379_v23 = vmul.f32 %v2506_v11, %v2378_v20  ;;  %v2255_v38 = vmul.f32 %v2249_v43, %v4616_v44  ;;  %v2256_v36 = vmul.f32 %v2249_v43, %v4564_v29 }
 0x30f   :  { %v2252_v53 = vsub.f32 %v2251_v7, %v2250_v62 }
 0x310   :  { %v2322_v6 = vadd.f32 %v2318_v42, %v2317_v31  ;;  %v2323_v34 = vadd.f32 %v2319_v54, %v2317_v31  ;;  %v2324_v52 = vadd.f32 %v2320_v30, %v2317_v31  ;;  %v2325_v39 = vadd.f32 %v2321_v14, %v2317_v31 }
 0x311   :  { %v2257_v9 = vadd.f32 %v2253_v63, %v2252_v53  ;;  %v2258_v3 = vadd.f32 %v2254_v27, %v2252_v53  ;;  %v2259_v24 = vadd.f32 %v2255_v38, %v2252_v53  ;;  %v2260_v17 = vadd.f32 %v2256_v36, %v2252_v53 }
 0x312   :  { %2393 = vst.msk [vmem:[%s4757_s2 + $0x10] sm:$0xff] %vm2194_vm3, %v2322_v6  ;;  %2399 = vst.msk [vmem:[%s4757_s2 + $0x40] sm:$0xff] %vm2194_vm3, %v2324_v52  ;;  %v2380_v29 = vmul.f32 %v2379_v23, %v2370_v61  ;;  %v2383_v49 = vmul.f32 %v2379_v23, %v4651_v50  ;;  %v2384_v44 = vmul.f32 %v2379_v23, %v4598_v21 }
 0x313   :  { %2394 = vst.msk [vmem:[%s4757_s2 + $0x18] sm:$0x3f] %vm2198_vm2, %v2323_v34  ;;  %2400 = vst.msk [vmem:[%s4757_s2 + $0x48] sm:$0x3f] %vm2198_vm2, %v2325_v39  ;;  %v2385_v5 = vmul.f32 %v2379_v23, %v4649_v57  ;;  %v2386_v56 = vmul.f32 %v2379_v23, %v4596_v25 }
 0x314   :  { %2391 = vst.msk [vmem:[%s4757_s2] sm:$0xff] %vm2194_vm3, %v2257_v9  ;;  %2397 = vst.msk [vmem:[%s4757_s2 + $0x30] sm:$0xff] %vm2194_vm3, %v2259_v24  ;;  %v2382_v35 = vsub.f32 %v2381_v60, %v2380_v29 }
 0x315   :  { %2392 = vst.msk [vmem:[%s4757_s2 + $0x8] sm:$0x3f] %vm2198_vm2, %v2258_v3  ;;  %2398 = vst.msk [vmem:[%s4757_s2 + $0x38] sm:$0x3f] %vm2198_vm2, %v2260_v17 }
 0x316   :  { %v2387_v41 = vadd.f32 %v2383_v49, %v2382_v35  ;;  %v2388_v48 = vadd.f32 %v2384_v44, %v2382_v35  ;;  %v2389_v55 = vadd.f32 %v2385_v5, %v2382_v35  ;;  %v2390_v28 = vadd.f32 %v2386_v56, %v2382_v35 }
 0x318   :  { %2395 = vst.msk [vmem:[%s4757_s2 + $0x20] sm:$0xff] %vm2194_vm3, %v2387_v41  ;;  %2401 = vst.msk [vmem:[%s4757_s2 + $0x50] sm:$0xff] %vm2194_vm3, %v2389_v55 }
 0x319   :  { %2396 = vst.msk [vmem:[%s4757_s2 + $0x28] sm:$0x3f] %vm2198_vm2, %v2388_v48  ;;  %2402 = vst.msk [vmem:[%s4757_s2 + $0x58] sm:$0x3f] %vm2198_vm2, %v2390_v28 }
 0x31a   :  { %2407 = vsyncpa [#allocation3], 1 }
 0x31b   :  { %2408 = vsyncpa [#allocation4], 1 }

</bundles_post_ra>
